<compile_context>
chip_gen: v6e
topology: v6e:2x2x1
jax: 0.10.0
libtpu: 0.0.40
codegen_flags: <defaults>
</compile_context>

<pallas_src>
import numpy as np
import jax
import jax.numpy as jnp
from jax import lax
from jax.experimental import pallas as pl
from jax.experimental.pallas import tpu as pltpu

L = 100            # time length, fixed by the scale Conv2d kernel [100, 2]
LP = 128           # lane-padded time length
C1, C2, C3 = 5, 10, 15
W1P, W2P, W3P = 512, 1024, 1536   # round_up(Ci * L, 128)


def _round_up(x, m):
    return ((x + m - 1) // m) * m


def _device_kind():
    try:
        return jax.devices()[0].device_kind.lower()
    except Exception:
        return ""


def _select_weight_dtype():
    kind = _device_kind()
    # v5e/v5p/v6e have an int8 MXU / cheap int8->bf16 path; v7x has no int MXU,
    # keep bf16 there (batching dominates on v7x per the review).
    if ("v5" in kind) or ("v6" in kind):
        return jnp.int8
    return jnp.bfloat16


def _batch_tile_target():
    return 128 if "v5" in _device_kind() else 256


# -----------------------------------------------------------------------------
# Host-side: deterministic parameter init + folding convs into block matrices
# -----------------------------------------------------------------------------
def _conv_toeplitz(w, pad):
    """T s.t. (x @ T)[t] = sum_k w[k] * x[t + k - pad] with zero padding (PyTorch
    cross-correlation, 'same' length)."""
    k = w.shape[0]
    d = np.arange(L)[:, None] - np.arange(L)[None, :] + pad
    return np.where((d >= 0) & (d < k), w[np.clip(d, 0, k - 1)], 0.0)


def _quantize(m, weight_dtype):
    """Per-matrix symmetric int8 quantization (or bf16 passthrough)."""
    if weight_dtype == jnp.int8:
        s = float(np.max(np.abs(m)))
        s = (s / 127.0) if s > 0 else 1.0
        q = np.clip(np.rint(m / s), -127, 127).astype(np.int8)
        return jnp.asarray(q), s
    return jnp.asarray(m, weight_dtype), 1.0


def build_recon_params(seed=0, weight_dtype=None):
    if weight_dtype is None:
        weight_dtype = _select_weight_dtype()
    rng = np.random.RandomState(seed)

    def conv_w(shape, fan_in):  # torch default Conv init style (deterministic)
        b = 1.0 / np.sqrt(fan_in)
        return rng.uniform(-b, b, size=shape)

    w1 = conv_w((C1, 1, 21), 1 * 21)        # Classify[0]
    w2 = conv_w((C2, C1, 11), C1 * 11)      # Classify[2]
    w3 = conv_w((C3, C2, 5), C2 * 5)        # Classify[4]
    wc = conv_w((1, 1, C3, 99), C3 * 99)    # Combine (Conv2d [15, 99], pad [0, 49])
    ws = conv_w((1, 1, L, 2), L * 2)        # scale (Conv2d [100, 2], pad 0)

    m1 = np.zeros((LP, W1P))
    for co in range(C1):
        m1[:L, co * L:co * L + L] = _conv_toeplitz(w1[co, 0], 10)

    m2 = np.zeros((W1P, W2P))
    for co in range(C2):
        for ci in range(C1):
            m2[ci * L:ci * L + L, co * L:co * L + L] = _conv_toeplitz(w2[co, ci], 5)

    m3 = np.zeros((W2P, W3P))
    for co in range(C3):
        for ci in range(C2):
            m3[ci * L:ci * L + L, co * L:co * L + L] = _conv_toeplitz(w3[co, ci], 2)

    # Combine: Conv2d(1,1,[15,99],pad=[0,49]) == sum over 15 channels of a
    # width-99 / pad-49 conv along time.
    mc = np.zeros((W3P, LP))
    for ci in range(C3):
        mc[ci * L:ci * L + L, :L] = _conv_toeplitz(wc[0, 0, ci], 49)

    # scale: Conv2d(1,1,[100,2]) over y = stack([wf*c, SPE*c], -1) is a single
    # dot product per batch row.
    ws_rows = np.zeros((2, LP))
    ws_rows[0, :L] = ws[0, 0, :, 0]
    ws_rows[1, :L] = ws[0, 0, :, 1]

    m1q, s1 = _quantize(m1, weight_dtype)
    m2q, s2 = _quantize(m2, weight_dtype)
    m3q, s3 = _quantize(m3, weight_dtype)
    mcq, s4 = _quantize(mc, weight_dtype)

    return dict(
        m1=m1q,                                # (128, 512)
        m2=m2q,                                # (512, 1024)
        m3=m3q,                                # (1024, 1536)
        mc=mcq,                                # (1536, 128)
        scales=(s1, s2, s3, s4),               # python floats, baked into kernel
        ws=jnp.asarray(ws_rows, jnp.float32),  # (2, 128)
    )


# -----------------------------------------------------------------------------
# Pallas kernel: grid over batch tiles, weights VMEM-resident (constant blocks)
# -----------------------------------------------------------------------------
def _make_recon_kernel(scales):
    s1, s2, s3, s4 = scales

    def _mm(x_bf16, m_ref, scale):
        # int8 weights are dequantized to bf16 on-chip (HBM stream is the
        # bottleneck, not MXU compute); f32 accumulation; scale applied to the
        # small (Bt, N) result.
        acc = jnp.dot(x_bf16, m_ref[...].astype(jnp.bfloat16),
                      preferred_element_type=jnp.float32)
        if scale != 1.0:
            acc = acc * scale
        return acc

    def kernel(wf_ref, gate_ref, m1_ref, m2_ref, m3_ref, mc_ref, out_ref):
        wf = wf_ref[...]                                           # (Bt, 128) f32

        # Classify: Conv1d(1->5,21)/ReLU -> Conv1d(5->10,11)/ReLU -> Conv1d(10->15,5)/ReLU
        # folded into block-Toeplitz matmuls; bf16 activations between stages.
        h1 = jnp.maximum(_mm(wf.astype(jnp.bfloat16), m1_ref, s1), 0.0).astype(jnp.bfloat16)
        h2 = jnp.maximum(_mm(h1, m2_ref, s2), 0.0).astype(jnp.bfloat16)
        h3 = jnp.maximum(_mm(h2, m3_ref, s3), 0.0).astype(jnp.bfloat16)

        # Combine -> features  (S / features_norm of the reference are dead code)
        features = _mm(h3, mc_ref, s4)                             # (Bt, 128) f32

        # c = softmax(5 * features, dim=1) over the L=100 valid lanes
        lane = lax.broadcasted_iota(jnp.int32, features.shape, 1)
        valid = lane < L
        z = jnp.where(valid, 5.0 * features, -1e30)
        z = z - jnp.max(z, axis=1, keepdims=True)
        e = jnp.where(valid, jnp.exp(z), 0.0)
        c = e * (1.0 / jnp.sum(e, axis=1, keepdims=True))          # exact reciprocal

        # scale conv + sigmoid:  a = sigmoid( sum_t c[t] * g[t] ) with
        # g[t] = Ws[t,0]*wf[t] + Ws[t,1]*SPE[t]  (SPE term precomputed on host)
        g = wf * gate_ref[0:1, :] + gate_ref[1:2, :]               # (Bt, 128)
        a_pre = jnp.sum(c * g, axis=1, keepdims=True)              # (Bt, 1)
        out_ref[...] = 1.0 / (1.0 + jnp.exp(-a_pre)) + 0.1

    return kernel


def recon_forward(wf, spe, params, plot=False, cluster=True, I=0):
    # TODO(synk): the matplotlib branch (plot and not cluster) is host-side
    # visualization only and is not reproduced in the kernel.
    del plot, cluster, I
    B = wf.shape[0]
    assert wf.shape[-1] == L

    Bt = min(_batch_tile_target(), _round_up(B, 8))   # batch tile (multiple of 8)
    Bp = _round_up(B, Bt)

    wf2 = jnp.zeros((Bp, LP), jnp.float32).at[:B, :L].set(
        wf.reshape(B, L).astype(jnp.float32))

    ws = params["ws"]                                              # (2, 128) f32
    spe_row = jnp.zeros((LP,), jnp.float32).at[:L].set(
        jnp.asarray(spe, jnp.float32).reshape(L))
    gate = jnp.stack([ws[0], ws[1] * spe_row])                     # (2, 128)

    kernel = _make_recon_kernel(params["scales"])

    out = pl.pallas_call(
        kernel,
        out_shape=jax.ShapeDtypeStruct((Bp, 1), jnp.float32),
        grid=(Bp // Bt,),
        in_specs=[
            pl.BlockSpec((Bt, LP), lambda i: (i, 0)),    # wf tile marches over batch
            pl.BlockSpec((2, LP), lambda i: (0, 0)),     # gate rows (constant block)
            pl.BlockSpec((LP, W1P), lambda i: (0, 0)),   # M1 (resident, not re-DMA'd)
            pl.BlockSpec((W1P, W2P), lambda i: (0, 0)),  # M2 (resident)
            pl.BlockSpec((W2P, W3P), lambda i: (0, 0)),  # M3 (resident)
            pl.BlockSpec((W3P, LP), lambda i: (0, 0)),   # MC (resident)
        ],
        out_specs=pl.BlockSpec((Bt, 1), lambda i: (i, 0)),
        compiler_params=pltpu.CompilerParams(
            dimension_semantics=("parallel",),           # megacore-shard the batch axis
            vmem_limit_bytes=32 * 1024 * 1024),
    )(wf2, gate, params["m1"], params["m2"], params["m3"], params["mc"])

    return out[:B, 0]   # matches torch `a + 0.1`, shape (B,)


# -----------------------------------------------------------------------------
# Pure-JAX reference (same folded, dequantized matrices) for validation
# -----------------------------------------------------------------------------
def recon_reference(wf, spe, params):
    B = wf.shape[0]
    s1, s2, s3, s4 = params["scales"]
    m1 = params["m1"].astype(jnp.float32) * s1
    m2 = params["m2"].astype(jnp.float32) * s2
    m3 = params["m3"].astype(jnp.float32) * s3
    mc = params["mc"].astype(jnp.float32) * s4

    x = jnp.zeros((B, LP), jnp.float32).at[:, :L].set(wf.reshape(B, L).astype(jnp.float32))
    h1 = jax.nn.relu(x @ m1)
    h2 = jax.nn.relu(h1 @ m2)
    h3 = jax.nn.relu(h2 @ m3)
    feats = (h3 @ mc)[:, :L]
    c = jax.nn.softmax(5.0 * feats, axis=1)

    ws = params["ws"]
    spe_l = jnp.asarray(spe, jnp.float32).reshape(L)
    g = wf.reshape(B, L).astype(jnp.float32) * ws[0, :L] + spe_l * ws[1, :L]
    a_pre = jnp.sum(c * g, axis=1)
    return jax.nn.sigmoid(a_pre) + 0.1


if __name__ == "__main__":
    key = jax.random.PRNGKey(0)
    k_wf, k_spe, k_big = jax.random.split(key, 3)

    params = build_recon_params(seed=0)

    # Small-batch check (shapes implied by the module: wf is NCW (B, 1, 100)).
    B = 2
    wf = jax.random.normal(k_wf, (B, 1, L), dtype=jnp.float32)
    spe = jnp.abs(jax.random.normal(k_spe, (L,), dtype=jnp.float32)) + 0.1

    a = jax.block_until_ready(recon_forward(wf, spe, params, plot=False, cluster=True, I=0))
    ref = jax.block_until_ready(recon_reference(wf, spe, params))
    assert a.shape == (B,)
    assert bool(jnp.all(jnp.isfinite(a)))
    assert bool(jnp.all((a >= 0.1) & (a <= 1.1)))   # output is sigmoid(.) + 0.1
    assert float(jnp.max(jnp.abs(a - ref))) < 2e-2

    # Larger batch: exercises the multi-step batch grid with resident weights.
    B2 = 300
    wf_big = jax.random.normal(k_big, (B2, 1, L), dtype=jnp.float32)
    a2 = jax.block_until_ready(recon_forward(wf_big, spe, params))
    ref2 = jax.block_until_ready(recon_reference(wf_big, spe, params))
    assert a2.shape == (B2,)
    assert bool(jnp.all(jnp.isfinite(a2)))
    assert bool(jnp.all((a2 >= 0.1) & (a2 <= 1.1)))
    assert float(jnp.max(jnp.abs(a2 - ref2))) < 2e-2

    print("KERNEL_OK")
</pallas_src>

<mosaic_0001>
module attributes {stable_mosaic.version = 11 : i64} {
  func.func @kernel(%arg0: i32, %arg1: memref<8x128xf32, #tpu.memory_space<vmem>>, %arg2: memref<2x128xf32, #tpu.memory_space<vmem>>, %arg3: memref<128x512xbf16, #tpu.memory_space<vmem>>, %arg4: memref<512x1024xbf16, #tpu.memory_space<vmem>>, %arg5: memref<1024x1536xbf16, #tpu.memory_space<vmem>>, %arg6: memref<1536x128xbf16, #tpu.memory_space<vmem>>, %arg7: memref<8x1xf32, #tpu.memory_space<vmem>>) attributes {dimension_semantics = [#tpu.dimension_semantics<parallel>], iteration_bounds = array<i64: 1>, scalar_prefetch = 0 : i64, scratch_operands = 0 : i64, tpu.core_type = #tpu.core_type<tc>, window_params = [{transform_indices = @transform_0, window_bounds = array<i64: 8, 128>}, {pipeline_mode = #tpu.pipeline_mode<synchronous>, transform_indices = @transform_1, window_bounds = array<i64: 2, 128>}, {pipeline_mode = #tpu.pipeline_mode<synchronous>, transform_indices = @transform_2, window_bounds = array<i64: 128, 512>}, {pipeline_mode = #tpu.pipeline_mode<synchronous>, transform_indices = @transform_3, window_bounds = array<i64: 512, 1024>}, {pipeline_mode = #tpu.pipeline_mode<synchronous>, transform_indices = @transform_4, window_bounds = array<i64: 1024, 1536>}, {pipeline_mode = #tpu.pipeline_mode<synchronous>, transform_indices = @transform_5, window_bounds = array<i64: 1536, 128>}, {transform_indices = @transform_6, window_bounds = array<i64: 8, 1>}]} {
    %c0 = arith.constant 0 : index
    %c0_0 = arith.constant 0 : index
    %0 = vector.load %arg1[%c0, %c0_0] : memref<8x128xf32, #tpu.memory_space<vmem>>, vector<8x128xf32>
    %1 = arith.truncf %0 : vector<8x128xf32> to vector<8x128xbf16>
    %c0_1 = arith.constant 0 : index
    %c0_2 = arith.constant 0 : index
    %2 = vector.load %arg3[%c0_1, %c0_2] : memref<128x512xbf16, #tpu.memory_space<vmem>>, vector<128x512xbf16>
    %cst = arith.constant dense<0.000000e+00> : vector<8x512xf32>
    %3 = tpu.matmul %1, %2, %cst {dimension_numbers = #tpu.dot_dimension_numbers<[1], [0], [0], [1], [0, 0, 1, 1], [], []>} : vector<8x128xbf16>, vector<128x512xbf16>, vector<8x512xf32> -> vector<8x512xf32>
    %cst_3 = arith.constant 0.000000e+00 : f32
    %4 = vector.broadcast %cst_3 : f32 to vector<8x512xf32>
    %5 = arith.maximumf %3, %4 : vector<8x512xf32>
    %6 = arith.truncf %5 : vector<8x512xf32> to vector<8x512xbf16>
    %c0_4 = arith.constant 0 : index
    %c0_5 = arith.constant 0 : index
    %7 = vector.load %arg4[%c0_4, %c0_5] : memref<512x1024xbf16, #tpu.memory_space<vmem>>, vector<512x1024xbf16>
    %cst_6 = arith.constant dense<0.000000e+00> : vector<8x1024xf32>
    %8 = tpu.matmul %6, %7, %cst_6 {dimension_numbers = #tpu.dot_dimension_numbers<[1], [0], [0], [1], [0, 0, 1, 1], [], []>} : vector<8x512xbf16>, vector<512x1024xbf16>, vector<8x1024xf32> -> vector<8x1024xf32>
    %cst_7 = arith.constant 0.000000e+00 : f32
    %9 = vector.broadcast %cst_7 : f32 to vector<8x1024xf32>
    %10 = arith.maximumf %8, %9 : vector<8x1024xf32>
    %11 = arith.truncf %10 : vector<8x1024xf32> to vector<8x1024xbf16>
    %c0_8 = arith.constant 0 : index
    %c0_9 = arith.constant 0 : index
    %12 = vector.load %arg5[%c0_8, %c0_9] : memref<1024x1536xbf16, #tpu.memory_space<vmem>>, vector<1024x1536xbf16>
    %cst_10 = arith.constant dense<0.000000e+00> : vector<8x1536xf32>
    %13 = tpu.matmul %11, %12, %cst_10 {dimension_numbers = #tpu.dot_dimension_numbers<[1], [0], [0], [1], [0, 0, 1, 1], [], []>} : vector<8x1024xbf16>, vector<1024x1536xbf16>, vector<8x1536xf32> -> vector<8x1536xf32>
    %cst_11 = arith.constant 0.000000e+00 : f32
    %14 = vector.broadcast %cst_11 : f32 to vector<8x1536xf32>
    %15 = arith.maximumf %13, %14 : vector<8x1536xf32>
    %16 = arith.truncf %15 : vector<8x1536xf32> to vector<8x1536xbf16>
    %c0_12 = arith.constant 0 : index
    %c0_13 = arith.constant 0 : index
    %17 = vector.load %arg6[%c0_12, %c0_13] : memref<1536x128xbf16, #tpu.memory_space<vmem>>, vector<1536x128xbf16>
    %cst_14 = arith.constant dense<0.000000e+00> : vector<8x128xf32>
    %18 = tpu.matmul %16, %17, %cst_14 {dimension_numbers = #tpu.dot_dimension_numbers<[1], [0], [0], [1], [0, 0, 1, 1], [], []>} : vector<8x1536xbf16>, vector<1536x128xbf16>, vector<8x128xf32> -> vector<8x128xf32>
    %19 = tpu.iota {dimensions = array<i32: 1>} : vector<8x128xi32>
    %c100_i32 = arith.constant 100 : i32
    %20 = vector.broadcast %c100_i32 : i32 to vector<8x128xi32>
    %21 = arith.cmpi slt, %19, %20 : vector<8x128xi32>
    %cst_15 = arith.constant 5.000000e+00 : f32
    %22 = vector.broadcast %cst_15 : f32 to vector<8x128xf32>
    %23 = arith.mulf %22, %18 : vector<8x128xf32>
    %cst_16 = arith.constant -1.000000e+30 : f32
    %24 = vector.broadcast %cst_16 : f32 to vector<8x128xf32>
    %25 = arith.select %21, %23, %24 : vector<8x128xi1>, vector<8x128xf32>
    %cst_17 = arith.constant dense<0xFF800000> : vector<8xf32>
    %26 = vector.multi_reduction <maximumf>, %25, %cst_17 [1] : vector<8x128xf32> to vector<8xf32>
    %27 = vector.shape_cast %26 : vector<8xf32> to vector<8x1xf32>
    %28 = vector.broadcast %27 : vector<8x1xf32> to vector<8x128xf32>
    %29 = arith.subf %25, %28 : vector<8x128xf32>
    %30 = math.exp %29 : vector<8x128xf32>
    %cst_18 = arith.constant 0.000000e+00 : f32
    %31 = vector.broadcast %cst_18 : f32 to vector<8x128xf32>
    %32 = arith.select %21, %30, %31 : vector<8x128xi1>, vector<8x128xf32>
    %cst_19 = arith.constant dense<0.000000e+00> : vector<8xf32>
    %33 = vector.multi_reduction <add>, %32, %cst_19 [1] : vector<8x128xf32> to vector<8xf32>
    %34 = vector.shape_cast %33 : vector<8xf32> to vector<8x1xf32>
    %cst_20 = arith.constant 1.000000e+00 : f32
    %35 = vector.broadcast %cst_20 : f32 to vector<8x1xf32>
    %36 = arith.divf %35, %34 : vector<8x1xf32>
    %37 = vector.broadcast %36 : vector<8x1xf32> to vector<8x128xf32>
    %38 = arith.mulf %32, %37 : vector<8x128xf32>
    %c0_21 = arith.constant 0 : index
    %c0_22 = arith.constant 0 : index
    %39 = vector.load %arg2[%c0_21, %c0_22] : memref<2x128xf32, #tpu.memory_space<vmem>>, vector<1x128xf32>
    %40 = vector.broadcast %39 : vector<1x128xf32> to vector<8x128xf32>
    %41 = arith.mulf %0, %40 : vector<8x128xf32>
    %c1 = arith.constant 1 : index
    %c0_23 = arith.constant 0 : index
    %42 = vector.load %arg2[%c1, %c0_23] : memref<2x128xf32, #tpu.memory_space<vmem>>, vector<1x128xf32>
    %43 = vector.broadcast %42 : vector<1x128xf32> to vector<8x128xf32>
    %44 = arith.addf %41, %43 : vector<8x128xf32>
    %45 = arith.mulf %38, %44 : vector<8x128xf32>
    %cst_24 = arith.constant dense<0.000000e+00> : vector<8xf32>
    %46 = vector.multi_reduction <add>, %45, %cst_24 [1] : vector<8x128xf32> to vector<8xf32>
    %47 = vector.shape_cast %46 : vector<8xf32> to vector<8x1xf32>
    %cst_25 = arith.constant 0.000000e+00 : f32
    %48 = vector.broadcast %cst_25 : f32 to vector<8x1xf32>
    %49 = arith.subf %48, %47 : vector<8x1xf32>
    %50 = math.exp %49 : vector<8x1xf32>
    %cst_26 = arith.constant 1.000000e+00 : f32
    %51 = vector.broadcast %cst_26 : f32 to vector<8x1xf32>
    %52 = arith.addf %51, %50 : vector<8x1xf32>
    %cst_27 = arith.constant 1.000000e+00 : f32
    %53 = vector.broadcast %cst_27 : f32 to vector<8x1xf32>
    %54 = arith.divf %53, %52 : vector<8x1xf32>
    %cst_28 = arith.constant 1.000000e-01 : f32
    %55 = vector.broadcast %cst_28 : f32 to vector<8x1xf32>
    %56 = arith.addf %54, %55 : vector<8x1xf32>
    %c0_29 = arith.constant 0 : index
    %c0_30 = arith.constant 0 : index
    %57 = vector.load %arg7[%c0_29, %c0_30] : memref<8x1xf32, #tpu.memory_space<vmem>>, vector<8x1xf32>
    tpu.vector_store %arg7[%c0_29, %c0_30], %56 {strides = array<i32>} : memref<8x1xf32, #tpu.memory_space<vmem>>, vector<8x1xf32>,
    return
  }
  func.func @transform_0(%arg0: i32) -> (i32, i32) {
    %c0_i32 = arith.constant 0 : i32
    %c0_i32_0 = arith.constant 0 : i32
    return %arg0, %c0_i32 : i32, i32
  }
  func.func @transform_1(%arg0: i32) -> (i32, i32) {
    %c0_i32 = arith.constant 0 : i32
    %c0_i32_0 = arith.constant 0 : i32
    %c0_i32_1 = arith.constant 0 : i32
    return %c0_i32, %c0_i32_0 : i32, i32
  }
  func.func @transform_2(%arg0: i32) -> (i32, i32) {
    %c0_i32 = arith.constant 0 : i32
    %c0_i32_0 = arith.constant 0 : i32
    %c0_i32_1 = arith.constant 0 : i32
    return %c0_i32, %c0_i32_0 : i32, i32
  }
  func.func @transform_3(%arg0: i32) -> (i32, i32) {
    %c0_i32 = arith.constant 0 : i32
    %c0_i32_0 = arith.constant 0 : i32
    %c0_i32_1 = arith.constant 0 : i32
    return %c0_i32, %c0_i32_0 : i32, i32
  }
  func.func @transform_4(%arg0: i32) -> (i32, i32) {
    %c0_i32 = arith.constant 0 : i32
    %c0_i32_0 = arith.constant 0 : i32
    %c0_i32_1 = arith.constant 0 : i32
    return %c0_i32, %c0_i32_0 : i32, i32
  }
  func.func @transform_5(%arg0: i32) -> (i32, i32) {
    %c0_i32 = arith.constant 0 : i32
    %c0_i32_0 = arith.constant 0 : i32
    %c0_i32_1 = arith.constant 0 : i32
    return %c0_i32, %c0_i32_0 : i32, i32
  }
  func.func @transform_6(%arg0: i32) -> (i32, i32) {
    %c0_i32 = arith.constant 0 : i32
    %c0_i32_0 = arith.constant 0 : i32
    return %arg0, %c0_i32 : i32, i32
  }
}

</mosaic_0001>

<bundles_post_ra>
// kernel: tpu_custom_call.1
= control target key start
LH: loop header
LB: loop body
LE: loop exit
PB: predicated region body
PF: predicated region fallthrough
CT: control target
= control target key end

     0   :  { %11 = vsyncpa [#allocation3], 0  ;;  %s11924_s0 = inlined_call_operand.hbm [shape: f32[8,128], index: 0, kind: input, shape index: {}]   ;;  %s11925_s1 = inlined_call_operand.hbm [shape: f32[2,128], index: 1, kind: input, shape index: {}]   ;;  %s11926_s2 = inlined_call_operand.hbm [shape: bf16[128,512], index: 2, kind: input, shape index: {}]   ;;  %s11927_s3 = inlined_call_operand.hbm [shape: bf16[512,1024], index: 3, kind: input, shape index: {}]   ;;  %s11928_s4 = inlined_call_operand.hbm [shape: bf16[1024,1536], index: 4, kind: input, shape index: {}]   ;;  %s11929_s5 = inlined_call_operand.hbm [shape: bf16[1536,128], index: 5, kind: input, shape index: {}]   ;;  %s11930_s6 = inlined_call_operand.vmem [shape: f32[8,1], index: 6, kind: output, shape index: {}]  }
   0x1   :  { %12 = vsyncpa [#allocation5], 0 }
   0x2   :  { %13 = vsyncpa [#allocation8], 0 }
   0x3   :  { %14 = vsyncpa [#allocation11], 0  ;;  %s11672_s21 = smov [#allocation4]   ;;  %s11673_s23 = smov [#allocation7]  }
   0x4   :  { %s31_s22 = sshll.u32 %s11672_s21, 4  ;;  %s52_s24 = sshll.u32 %s11673_s23, 4  ;;  %s32_s22 = int_to_ptr.vmem [resolvable:$true] %s31_s22  ;;  %s53_s24 = int_to_ptr.vmem [resolvable:$true] %s52_s24 }
   0x5   :  { %s11552_s25 = scalar_lea.vmem %s32_s22, 32  ;;  %p11557_p1 = scmp.lt.s32.totalorder %s32_s22, %s32_s22 }
   0x6   :  { %p11553_p0 = scmp.ne.s32.totalorder %s32_s22, %s11552_s25  ;;  %p11558_p2 = scmp.lt.s32.totalorder %s11552_s25, %s11552_s25 }
   0x8   :  { %p11559_p3 = por %p11558_p2, %p11557_p1 }
   0xa   :  { %p11560_p4 = pnand %p11559_p3, %p11553_p0 }
   0xc   :  { %11563 = shalt.err (!%p11560_p4)
}
   0xd   :  { %34 = dma.hbm_to_vmem [thread:$0]  %s11925_s1, 32, %s32_s22, [#allocation5]  }
   0xe   :  { %s11572_s28 = scalar_lea.vmem %s53_s24, 32768  ;;  %p11577_p6 = scmp.lt.s32.totalorder %s53_s24, %s53_s24 }
   0xf   :  { %p11573_p5 = scmp.ne.s32.totalorder %s53_s24, %s11572_s28  ;;  %p11578_p7 = scmp.lt.s32.totalorder %s11572_s28, %s11572_s28 }
  0x11   :  { %p11579_p8 = por %p11578_p7, %p11577_p6 }
  0x13   :  { %p11580_p9 = pnand %p11579_p8, %p11573_p5 }
  0x15   :  { %11583 = shalt.err (!%p11580_p9)
}
  0x16   :  { %s11674_s29 = smov 512   ;;  %s11675_s30 = smov 32  }
  0x17   :  { %58 = dma.hbm_to_vmem [thread:$0]  %s11927_s3, 32768, %s53_s24, [#allocation8], %s11674_s29, %s11674_s29, %s11675_s30  }
  0x18   :  { %s11676_s9 = smov [#allocation2]   ;;  %s11677_s11 = smov [#allocation6]  }
  0x19   :  { %s21_s10 = sshll.u32 %s11676_s9, 4  ;;  %s40_s12 = sshll.u32 %s11677_s11, 4  ;;  %s22_s10 = int_to_ptr.vmem [resolvable:$true] %s21_s10  ;;  %s41_s12 = int_to_ptr.vmem [resolvable:$true] %s40_s12 }
  0x1a   :  { %s11592_s1 = scalar_lea.vmem %s22_s10, 128  ;;  %p11597_p11 = scmp.lt.s32.totalorder %s22_s10, %s22_s10 }
  0x1b   :  { %p11593_p10 = scmp.ne.s32.totalorder %s22_s10, %s11592_s1  ;;  %p11598_p12 = scmp.lt.s32.totalorder %s11592_s1, %s11592_s1 }
  0x1d   :  { %p11599_p13 = por %p11598_p12, %p11597_p11 }
  0x1f   :  { %p11600_p0 = pnand %p11599_p13, %p11593_p10 }
  0x21   :  { %11603 = shalt.err (!%p11600_p0)
}
  0x22   :  { %24 = dma.hbm_to_vmem [thread:$0]  %s11924_s0, 128, %s22_s10, [#allocation3]  }
  0x23   :  { %s11612_s15 = scalar_lea.vmem %s41_s12, 4096  ;;  %p11617_p2 = scmp.lt.s32.totalorder %s41_s12, %s41_s12 }
  0x24   :  { %p11613_p1 = scmp.ne.s32.totalorder %s41_s12, %s11612_s15  ;;  %p11618_p3 = scmp.lt.s32.totalorder %s11612_s15, %s11612_s15 }
  0x26   :  { %p11619_p4 = por %p11618_p3, %p11617_p2 }
  0x28   :  { %p11620_p5 = pnand %p11619_p4, %p11613_p1 }
  0x2a   :  { %11623 = shalt.err (!%p11620_p5)
}
  0x2b   :  { %s11678_s3 = smov 256   ;;  %s11679_s16 = smov 16  }
  0x2c   :  { %46 = dma.hbm_to_vmem [thread:$0]  %s11926_s2, 4096, %s41_s12, [#allocation5], %s11678_s3, %s11678_s3, %s11679_s16  }
  0x2d   :  { %s11680_s19 = smov [#allocation9]  }
  0x2e   :  { %s64_s20 = sshll.u32 %s11680_s19, 4  ;;  %s65_s20 = int_to_ptr.vmem [resolvable:$true] %s64_s20 }
  0x2f   :  { %s11632_s21 = scalar_lea.vmem %s65_s20, 98304  ;;  %p11637_p7 = scmp.lt.s32.totalorder %s65_s20, %s65_s20 }
  0x30   :  { %p11633_p6 = scmp.ne.s32.totalorder %s65_s20, %s11632_s21  ;;  %p11638_p8 = scmp.lt.s32.totalorder %s11632_s21, %s11632_s21 }
  0x32   :  { %p11639_p9 = por %p11638_p8, %p11637_p7 }
  0x34   :  { %p11640_p10 = pnand %p11639_p9, %p11633_p6 }
  0x36   :  { %11643 = shalt.err (!%p11640_p10)
}
  0x37   :  { %s11681_s0 = smov 768   ;;  %s11682_s22 = smov 48  }
  0x38   :  { %70 = dma.hbm_to_vmem [thread:$0]  %s11928_s4, 98304, %s65_s20, [#allocation8], %s11681_s0, %s11681_s0, %s11682_s22  }
  0x39   :  { %s11683_s25 = smov [#allocation10]  }
  0x3a   :  { %s76_s26 = sshll.u32 %s11683_s25, 4  ;;  %s77_s26 = int_to_ptr.vmem [resolvable:$true] %s76_s26 }
  0x3b   :  { %s11652_s2 = scalar_lea.vmem %s77_s26, 12288  ;;  %p11657_p12 = scmp.lt.s32.totalorder %s77_s26, %s77_s26 }
  0x3c   :  { %p11653_p11 = scmp.ne.s32.totalorder %s77_s26, %s11652_s2  ;;  %p11658_p13 = scmp.lt.s32.totalorder %s11652_s2, %s11652_s2 }
  0x3e   :  { %p11659_p0 = por %p11658_p13, %p11657_p12 }
  0x40   :  { %p11660_p1 = pnand %p11659_p0, %p11653_p11 }
  0x42   :  { %11663 = shalt.err (!%p11660_p1)
}
  0x43   :  { %s11684_s27 = smov 64   ;;  %s11685_s28 = smov 4  }
  0x44   :  { %82 = dma.hbm_to_vmem [thread:$0]  %s11929_s5, 12288, %s77_s26, [#allocation11], %s11684_s27, %s11684_s27, %s11685_s28  }
  0x45   :  { %11664 = dma.done.wait [#allocation3], 128  }
  0x46   :  { %11665 = vsyncadd [#allocation3], 4294967168 }
  0x47   :  { %11666 = dma.done.wait [#allocation5], 4128  }
  0x48   :  { %11667 = vsyncadd [#allocation5], 4294963168 }
  0x49   :  { %11668 = dma.done.wait [#allocation8], 131072  }
  0x4a   :  { %11669 = vsyncadd [#allocation8], 4294836224 }
  0x4b   :  { %11670 = dma.done.wait [#allocation11], 12288  }
  0x4c   :  { %11671 = vsyncadd [#allocation11], 4294955008  ;;  %v11686_v0 = vmov 0   ;;  %v10239_v1 = vld [vmem:[#allocation6 + $0xe4] ss:$16 sps:$4 sm:$0xff]   ;;  %vm8928_vm1 = vcmask 7168  }
  0x4d   :  { %328 = vmatprep.mubr.bf16.mxu0 %v11686_v0  ;;  %369 = vmatprep.mubr.bf16.mxu1 %v11686_v0  ;;  %v10241_v2 = vld [vmem:[#allocation6 + $0xec] ss:$16 sps:$4 sm:$0xff]   ;;  %v10243_v3 = vld [vmem:[#allocation6 + $0xe0] ss:$16 sps:$4 sm:$0xff]   ;;  %v10244_v4 = vld [vmem:[#allocation6 + $0xe8] ss:$16 sps:$4 sm:$0xff]  }
  0x4e   :  { %296 = vmatprep.subr.bf16.mxu0 %v10239_v1  ;;  %337 = vmatprep.subr.bf16.mxu1 %v10241_v2  ;;  %v10245_v5 = vld [vmem:[#allocation6 + $0xc4] ss:$16 sps:$4 sm:$0xff]   ;;  %v10247_v6 = vld [vmem:[#allocation6 + $0xcc] ss:$16 sps:$4 sm:$0xff]   ;;  %v10249_v7 = vld [vmem:[#allocation6 + $0xc0] ss:$16 sps:$4 sm:$0xff]  }
  0x4f   :  { %297 = vmatpush1.bf16.msra.mxu0 %v10243_v3  ;;  %338 = vmatpush1.bf16.msra.mxu1 %v10244_v4  ;;  %v10250_v8 = vld [vmem:[#allocation6 + $0xc8] ss:$16 sps:$4 sm:$0xff]   ;;  %v10251_v9 = vld [vmem:[#allocation6 + $0xa4] ss:$16 sps:$4 sm:$0xff]   ;;  %v10253_v10 = vld [vmem:[#allocation6 + $0xac] ss:$16 sps:$4 sm:$0xff]  }
  0x50   :  { %298 = vmatprep.subr.bf16.mxu0 %v10245_v5  ;;  %339 = vmatprep.subr.bf16.mxu1 %v10247_v6  ;;  %v10255_v11 = vld [vmem:[#allocation6 + $0xa0] ss:$16 sps:$4 sm:$0xff]   ;;  %v10256_v12 = vld [vmem:[#allocation6 + $0xa8] ss:$16 sps:$4 sm:$0xff]   ;;  %v10257_v13 = vld [vmem:[#allocation6 + $0x84] ss:$16 sps:$4 sm:$0xff]  }
  0x51   :  { %v10259_v14 = vld [vmem:[#allocation6 + $0x8c] ss:$16 sps:$4 sm:$0xff]   ;;  %v10261_v15 = vld [vmem:[#allocation6 + $0x80] ss:$16 sps:$4 sm:$0xff]   ;;  %v10262_v16 = vld [vmem:[#allocation6 + $0x88] ss:$16 sps:$4 sm:$0xff]  }
  0x52   :  { %v10263_v17 = vld [vmem:[#allocation6 + $0x64] ss:$16 sps:$4 sm:$0xff]   ;;  %v10265_v18 = vld [vmem:[#allocation6 + $0x6c] ss:$16 sps:$4 sm:$0xff]   ;;  %v10267_v19 = vld [vmem:[#allocation6 + $0x60] ss:$16 sps:$4 sm:$0xff]  }
  0x53   :  { %299 = vmatpush1.bf16.msra.mxu0 %v10249_v7  ;;  %340 = vmatpush1.bf16.msra.mxu1 %v10250_v8  ;;  %v10268_v20 = vld [vmem:[#allocation6 + $0x68] ss:$16 sps:$4 sm:$0xff]   ;;  %v10269_v21 = vld [vmem:[#allocation6 + $0x44] ss:$16 sps:$4 sm:$0xff]   ;;  %v10271_v22 = vld [vmem:[#allocation6 + $0x4c] ss:$16 sps:$4 sm:$0xff]  }
  0x54   :  { %300 = vmatprep.subr.bf16.mxu0 %v10251_v9  ;;  %341 = vmatprep.subr.bf16.mxu1 %v10253_v10  ;;  %v10273_v23 = vld [vmem:[#allocation6 + $0x40] ss:$16 sps:$4 sm:$0xff]   ;;  %v10274_v24 = vld [vmem:[#allocation6 + $0x48] ss:$16 sps:$4 sm:$0xff]   ;;  %v10275_v25 = vld [vmem:[#allocation6 + $0x24] ss:$16 sps:$4 sm:$0xff]  }
  0x55   :  { %v10277_v26 = vld [vmem:[#allocation6 + $0x2c] ss:$16 sps:$4 sm:$0xff]   ;;  %v10279_v27 = vld [vmem:[#allocation6 + $0x20] ss:$16 sps:$4 sm:$0xff]   ;;  %v10280_v28 = vld [vmem:[#allocation6 + $0x28] ss:$16 sps:$4 sm:$0xff]  }
  0x56   :  { %v10281_v29 = vld [vmem:[#allocation6 + $0x4] ss:$16 sps:$4 sm:$0xff]   ;;  %v10283_v30 = vld [vmem:[#allocation6 + $0xc] ss:$16 sps:$4 sm:$0xff]   ;;  %v10285_v35 = vld [vmem:[#allocation6] ss:$16 sps:$4 sm:$0xff]  }
  0x57   :  { %301 = vmatpush1.bf16.msra.mxu0 %v10255_v11  ;;  %342 = vmatpush1.bf16.msra.mxu1 %v10256_v12  ;;  %v442_v31 = vld [vmem:[#allocation7 + $0x1c0] sm:$0xff]  ;;  %v10286_v36 = vld [vmem:[#allocation6 + $0x8] ss:$16 sps:$4 sm:$0xff]  }
  0x58   :  { %302 = vmatprep.subr.bf16.mxu0 %v10257_v13  ;;  %343 = vmatprep.subr.bf16.mxu1 %v10259_v14  ;;  %v446_v32 = vld [vmem:[#allocation7 + $0x1e0] sm:$0xff]  ;;  %v102_v37 = vld [vmem:[#allocation2] sm:$0xff] }
  0x59   :  { %v570_v33 = vld [vmem:[#allocation7 + $0x5c0] sm:$0xff]  ;;  %v9027_v38 = vcombine.high %v442_v31, %v446_v32  ;;  %v103_v44 = vpack.c.bf16 %v102_v37, %v102_v37  ;;  %v9026_v45 = vcombine.low %v442_v31, %v446_v32 }
  0x5a   :  { %v574_v34 = vld [vmem:[#allocation7 + $0x5e0] sm:$0xff] }
  0x5b   :  { %303 = vmatpush1.bf16.msra.mxu0 %v10261_v15  ;;  %344 = vmatpush1.bf16.msra.mxu1 %v10262_v16  ;;  %v9155_v39 = vcombine.high %v570_v33, %v574_v34  ;;  %v434_v40 = vld [vmem:[#allocation7 + $0x180] sm:$0xff]  ;;  %v9154_v46 = vcombine.low %v570_v33, %v574_v34 }
  0x5c   :  { %304 = vmatprep.subr.bf16.mxu0 %v10263_v17  ;;  %345 = vmatprep.subr.bf16.mxu1 %v10265_v18  ;;  %v438_v41 = vld [vmem:[#allocation7 + $0x1a0] sm:$0xff] }
  0x5d   :  { %v562_v42 = vld [vmem:[#allocation7 + $0x580] sm:$0xff]  ;;  %v9019_v47 = vcombine.high %v434_v40, %v438_v41  ;;  %v9018_v53 = vcombine.low %v434_v40, %v438_v41 }
  0x5e   :  { %v566_v43 = vld [vmem:[#allocation7 + $0x5a0] sm:$0xff] }
  0x5f   :  { %305 = vmatpush1.bf16.msra.mxu0 %v10267_v19  ;;  %346 = vmatpush1.bf16.msra.mxu1 %v10268_v20  ;;  %v9147_v48 = vcombine.high %v562_v42, %v566_v43  ;;  %v426_v49 = vld [vmem:[#allocation7 + $0x140] sm:$0xff]  ;;  %v9146_v54 = vcombine.low %v562_v42, %v566_v43 }
  0x60   :  { %306 = vmatprep.subr.bf16.mxu0 %v10269_v21  ;;  %347 = vmatprep.subr.bf16.mxu1 %v10271_v22  ;;  %v430_v50 = vld [vmem:[#allocation7 + $0x160] sm:$0xff] }
  0x61   :  { %v554_v51 = vld [vmem:[#allocation7 + $0x540] sm:$0xff]  ;;  %v9011_v55 = vcombine.high %v426_v49, %v430_v50  ;;  %v9010_v61 = vcombine.low %v426_v49, %v430_v50 }
  0x62   :  { %v558_v52 = vld [vmem:[#allocation7 + $0x560] sm:$0xff] }
  0x63   :  { %307 = vmatpush1.bf16.msra.mxu0 %v10273_v23  ;;  %348 = vmatpush1.bf16.msra.mxu1 %v10274_v24  ;;  %v9139_v56 = vcombine.high %v554_v51, %v558_v52  ;;  %v418_v57 = vld [vmem:[#allocation7 + $0x100] sm:$0xff]  ;;  %v9138_v62 = vcombine.low %v554_v51, %v558_v52 }
  0x64   :  { %308 = vmatprep.subr.bf16.mxu0 %v10275_v25  ;;  %349 = vmatprep.subr.bf16.mxu1 %v10277_v26  ;;  %v422_v58 = vld [vmem:[#allocation7 + $0x120] sm:$0xff] }
  0x65   :  { %v546_v59 = vld [vmem:[#allocation7 + $0x500] sm:$0xff]  ;;  %v9003_v1 = vcombine.high %v418_v57, %v422_v58  ;;  %v9002_v5 = vcombine.low %v418_v57, %v422_v58 }
  0x66   :  { %v550_v60 = vld [vmem:[#allocation7 + $0x520] sm:$0xff] }
  0x67   :  { %309 = vmatpush1.bf16.msra.mxu0 %v10279_v27  ;;  %350 = vmatpush1.bf16.msra.mxu1 %v10280_v28  ;;  %v410_v63 = vld [vmem:[#allocation7 + $0xc0] sm:$0xff]  ;;  %v9131_v2 = vcombine.high %v546_v59, %v550_v60  ;;  %v9130_v6 = vcombine.low %v546_v59, %v550_v60 }
  0x68   :  { %310 = vmatprep.subr.bf16.mxu0 %v10281_v29  ;;  %351 = vmatprep.subr.bf16.mxu1 %v10283_v30  ;;  %v414_v0 = vld [vmem:[#allocation7 + $0xe0] sm:$0xff] }
  0x69   :  { %v538_v3 = vld [vmem:[#allocation7 + $0x4c0] sm:$0xff]  ;;  %v8995_v11 = vcombine.high %v410_v63, %v414_v0  ;;  %v8994_v13 = vcombine.low %v410_v63, %v414_v0 }
  0x6a   :  { %v542_v4 = vld [vmem:[#allocation7 + $0x4e0] sm:$0xff] }
  0x6b   :  { %311 = vmatpush1.bf16.msra.mxu0 %v10285_v35  ;;  %352 = vmatpush1.bf16.msra.mxu1 %v10286_v36  ;;  %v402_v7 = vld [vmem:[#allocation7 + $0x80] sm:$0xff]  ;;  %v9123_v12 = vcombine.high %v538_v3, %v542_v4  ;;  %v9122_v14 = vcombine.low %v538_v3, %v542_v4 }
  0x6c   :  { %1922 = vmatprep.subr.bf16.mxu0 %v9027_v38  ;;  %1963 = vmatprep.subr.bf16.mxu1 %v9155_v39  ;;  %v406_v8 = vld [vmem:[#allocation7 + $0xa0] sm:$0xff] }
  0x6d   :  { %v530_v9 = vld [vmem:[#allocation7 + $0x480] sm:$0xff]  ;;  %v8987_v19 = vcombine.high %v402_v7, %v406_v8  ;;  %v8986_v21 = vcombine.low %v402_v7, %v406_v8 }
  0x6e   :  { %329 = vmatmul.mubr.bf16.vlgmr.msra.gmra.mxu0 %v103_v44  ;;  %370 = vmatmul.mubr.bf16.vlgmr.msra.gmra.mxu1 %v103_v44  ;;  %v534_v10 = vld [vmem:[#allocation7 + $0x4a0] sm:$0xff] }
  0x6f   :  { %1923 = vmatpush1.bf16.msra.mxu0 %v9026_v45  ;;  %1964 = vmatpush1.bf16.msra.mxu1 %v9154_v46  ;;  %v394_v15 = vld [vmem:[#allocation7 + $0x40] sm:$0xff]  ;;  %v9115_v20 = vcombine.high %v530_v9, %v534_v10  ;;  %v9114_v22 = vcombine.low %v530_v9, %v534_v10 }
  0x70   :  { %1924 = vmatprep.subr.bf16.mxu0 %v9019_v47  ;;  %1965 = vmatprep.subr.bf16.mxu1 %v9147_v48  ;;  %v398_v16 = vld [vmem:[#allocation7 + $0x60] sm:$0xff] }
  0x71   :  { %v522_v17 = vld [vmem:[#allocation7 + $0x440] sm:$0xff]  ;;  %v8979_v27 = vcombine.high %v394_v15, %v398_v16  ;;  %v8978_v29 = vcombine.low %v394_v15, %v398_v16 }
  0x72   :  { %v526_v18 = vld [vmem:[#allocation7 + $0x460] sm:$0xff] }
  0x73   :  { %1925 = vmatpush1.bf16.msra.mxu0 %v9018_v53  ;;  %1966 = vmatpush1.bf16.msra.mxu1 %v9146_v54  ;;  %v386_v23 = vld [vmem:[#allocation7] sm:$0xff]  ;;  %v9107_v28 = vcombine.high %v522_v17, %v526_v18  ;;  %v9106_v30 = vcombine.low %v522_v17, %v526_v18 }
  0x74   :  { %1926 = vmatprep.subr.bf16.mxu0 %v9011_v55  ;;  %1967 = vmatprep.subr.bf16.mxu1 %v9139_v56  ;;  %v390_v24 = vld [vmem:[#allocation7 + $0x20] sm:$0xff] }
  0x75   :  { %v514_v25 = vld [vmem:[#allocation7 + $0x400] sm:$0xff]  ;;  %v8971_v35 = vcombine.high %v386_v23, %v390_v24  ;;  %v8970_v37 = vcombine.low %v386_v23, %v390_v24 }
  0x76   :  { %v518_v26 = vld [vmem:[#allocation7 + $0x420] sm:$0xff] }
  0x77   :  { %1927 = vmatpush1.bf16.msra.mxu0 %v9010_v61  ;;  %1968 = vmatpush1.bf16.msra.mxu1 %v9138_v62  ;;  %v506_v31 = vld [vmem:[#allocation7 + $0x3c0] sm:$0xff]  ;;  %v9099_v36 = vcombine.high %v514_v25, %v518_v26  ;;  %v9098_v38 = vcombine.low %v514_v25, %v518_v26 }
  0x78   :  { %1928 = vmatprep.subr.bf16.mxu0 %v9003_v1  ;;  %1969 = vmatprep.subr.bf16.mxu1 %v9131_v2  ;;  %v510_v32 = vld [vmem:[#allocation7 + $0x3e0] sm:$0xff] }
  0x79   :  { %v634_v33 = vld [vmem:[#allocation7 + $0x7c0] sm:$0xff]  ;;  %v9091_v43 = vcombine.high %v506_v31, %v510_v32  ;;  %v9090_v45 = vcombine.low %v506_v31, %v510_v32 }
  0x7a   :  { %v638_v34 = vld [vmem:[#allocation7 + $0x7e0] sm:$0xff] }
  0x7b   :  { %1929 = vmatpush1.bf16.msra.mxu0 %v9002_v5  ;;  %1970 = vmatpush1.bf16.msra.mxu1 %v9130_v6  ;;  %v498_v39 = vld [vmem:[#allocation7 + $0x380] sm:$0xff]  ;;  %v9219_v44 = vcombine.high %v634_v33, %v638_v34  ;;  %v9218_v46 = vcombine.low %v634_v33, %v638_v34 }
  0x7c   :  { %1930 = vmatprep.subr.bf16.mxu0 %v8995_v11  ;;  %1971 = vmatprep.subr.bf16.mxu1 %v9123_v12  ;;  %v502_v40 = vld [vmem:[#allocation7 + $0x3a0] sm:$0xff] }
  0x7d   :  { %v626_v41 = vld [vmem:[#allocation7 + $0x780] sm:$0xff]  ;;  %v9083_v51 = vcombine.high %v498_v39, %v502_v40  ;;  %v9082_v53 = vcombine.low %v498_v39, %v502_v40  ;;  %v575_v39 = vld [vmem:[#allocation7 + $0x5e8] sm:$0xff] }
  0x7e   :  { %v630_v42 = vld [vmem:[#allocation7 + $0x7a0] sm:$0xff] }
  0x7f   :  { %1931 = vmatpush1.bf16.msra.mxu0 %v8994_v13  ;;  %1972 = vmatpush1.bf16.msra.mxu1 %v9122_v14  ;;  %v490_v47 = vld [vmem:[#allocation7 + $0x340] sm:$0xff]  ;;  %v9211_v52 = vcombine.high %v626_v41, %v630_v42  ;;  %v9210_v54 = vcombine.low %v626_v41, %v630_v42 }
  0x80   :  { %1932 = vmatprep.subr.bf16.mxu0 %v8987_v19  ;;  %1973 = vmatprep.subr.bf16.mxu1 %v9115_v20  ;;  %v494_v48 = vld [vmem:[#allocation7 + $0x360] sm:$0xff] }
  0x81   :  { %v618_v49 = vld [vmem:[#allocation7 + $0x740] sm:$0xff]  ;;  %v9075_v59 = vcombine.high %v490_v47, %v494_v48  ;;  %v9074_v61 = vcombine.low %v490_v47, %v494_v48 }
  0x82   :  { %v622_v50 = vld [vmem:[#allocation7 + $0x760] sm:$0xff] }
  0x83   :  { %1933 = vmatpush1.bf16.msra.mxu0 %v8986_v21  ;;  %1974 = vmatpush1.bf16.msra.mxu1 %v9114_v22  ;;  %v482_v55 = vld [vmem:[#allocation7 + $0x300] sm:$0xff]  ;;  %v9203_v60 = vcombine.high %v618_v49, %v622_v50  ;;  %v9202_v62 = vcombine.low %v618_v49, %v622_v50  ;;  %v435_v49 = vld [vmem:[#allocation7 + $0x188] sm:$0xff] }
  0x84   :  { %1934 = vmatprep.subr.bf16.mxu0 %v8979_v27  ;;  %1975 = vmatprep.subr.bf16.mxu1 %v9107_v28  ;;  %v486_v56 = vld [vmem:[#allocation7 + $0x320] sm:$0xff]  ;;  %v439_v50 = vld [vmem:[#allocation7 + $0x1a8] sm:$0xff] }
  0x85   :  { %v610_v57 = vld [vmem:[#allocation7 + $0x700] sm:$0xff]  ;;  %v9067_v3 = vcombine.high %v482_v55, %v486_v56  ;;  %v9066_v5 = vcombine.low %v482_v55, %v486_v56 }
  0x86   :  { %v614_v58 = vld [vmem:[#allocation7 + $0x720] sm:$0xff] }
  0x87   :  { %1935 = vmatpush1.bf16.msra.mxu0 %v8978_v29  ;;  %1976 = vmatpush1.bf16.msra.mxu1 %v9106_v30  ;;  %v474_v63 = vld [vmem:[#allocation7 + $0x2c0] sm:$0xff]  ;;  %v9195_v4 = vcombine.high %v610_v57, %v614_v58  ;;  %v9194_v6 = vcombine.low %v610_v57, %v614_v58 }
  0x88   :  { %1936 = vmatprep.subr.bf16.mxu0 %v8971_v35  ;;  %1977 = vmatprep.subr.bf16.mxu1 %v9099_v36  ;;  %v478_v0 = vld [vmem:[#allocation7 + $0x2e0] sm:$0xff]  ;;  %v443_v35 = vld [vmem:[#allocation7 + $0x1c8] sm:$0xff] }
  0x89   :  { %v602_v1 = vld [vmem:[#allocation7 + $0x6c0] sm:$0xff]  ;;  %v9059_v11 = vcombine.high %v474_v63, %v478_v0  ;;  %v9058_v13 = vcombine.low %v474_v63, %v478_v0  ;;  %v447_v36 = vld [vmem:[#allocation7 + $0x1e8] sm:$0xff] }
  0x8a   :  { %v606_v2 = vld [vmem:[#allocation7 + $0x6e0] sm:$0xff]  ;;  %v9028_v40 = vcombine.low %v443_v35, %v447_v36  ;;  %v427_v63 = vld [vmem:[#allocation7 + $0x148] sm:$0xff] }
  0x8b   :  { %1937 = vmatpush1.bf16.msra.mxu0 %v8970_v37  ;;  %1978 = vmatpush1.bf16.msra.mxu1 %v9098_v38  ;;  %v466_v7 = vld [vmem:[#allocation7 + $0x280] sm:$0xff]  ;;  %v9187_v12 = vcombine.high %v602_v1, %v606_v2  ;;  %v9186_v14 = vcombine.low %v602_v1, %v606_v2  ;;  %v571_v37 = vld [vmem:[#allocation7 + $0x5c8] sm:$0xff]  ;;  %v9029_v38 = vcombine.high %v443_v35, %v447_v36 }
  0x8c   :  { %1938 = vmatprep.subr.bf16.mxu0 %v9091_v43  ;;  %1979 = vmatprep.subr.bf16.mxu1 %v9219_v44  ;;  %v470_v8 = vld [vmem:[#allocation7 + $0x2a0] sm:$0xff]  ;;  %v9156_v41 = vcombine.low %v571_v37, %v575_v39  ;;  %v9157_v42 = vcombine.high %v571_v37, %v575_v39  ;;  %v431_v0 = vld [vmem:[#allocation7 + $0x168] sm:$0xff]  ;;  %v9021_v2 = vcombine.high %v435_v49, %v439_v50 }
  0x8d   :  { %v594_v9 = vld [vmem:[#allocation7 + $0x680] sm:$0xff]  ;;  %v9051_v19 = vcombine.high %v466_v7, %v470_v8  ;;  %v9050_v21 = vcombine.low %v466_v7, %v470_v8  ;;  %v555_v1 = vld [vmem:[#allocation7 + $0x548] sm:$0xff]  ;;  %v9013_v8 = vcombine.high %v427_v63, %v431_v0 }
  0x8e   :  { %v598_v10 = vld [vmem:[#allocation7 + $0x6a0] sm:$0xff]  ;;  %v419_v7 = vld [vmem:[#allocation7 + $0x108] sm:$0xff] }
  0x8f   :  { %1939 = vmatpush2.bf16.msra.mxu0 %v9090_v45  ;;  %1980 = vmatpush2.bf16.msra.mxu1 %v9218_v46  ;;  %v458_v15 = vld [vmem:[#allocation7 + $0x240] sm:$0xff]  ;;  %v9179_v20 = vcombine.high %v594_v9, %v598_v10  ;;  %v9178_v22 = vcombine.low %v594_v9, %v598_v10  ;;  %v423_v10 = vld [vmem:[#allocation7 + $0x128] sm:$0xff] }
  0x90   :  { %1940 = vmatprep.subr.bf16.mxu0 %v9083_v51  ;;  %1981 = vmatprep.subr.bf16.mxu1 %v9211_v52  ;;  %v462_v16 = vld [vmem:[#allocation7 + $0x260] sm:$0xff]  ;;  %v563_v51 = vld [vmem:[#allocation7 + $0x588] sm:$0xff] }
  0x91   :  { %v586_v17 = vld [vmem:[#allocation7 + $0x640] sm:$0xff]  ;;  %v9043_v23 = vcombine.high %v458_v15, %v462_v16  ;;  %v9042_v25 = vcombine.low %v458_v15, %v462_v16  ;;  %v9005_v15 = vcombine.high %v419_v7, %v423_v10  ;;  %v523_v35 = vld [vmem:[#allocation7 + $0x448] sm:$0xff] }
  0x92   :  { %v590_v18 = vld [vmem:[#allocation7 + $0x660] sm:$0xff]  ;;  %v527_v36 = vld [vmem:[#allocation7 + $0x468] sm:$0xff] }
  0x93   :  { %1941 = vmatpush2.bf16.msra.mxu0 %v9082_v53  ;;  %1982 = vmatpush2.bf16.msra.mxu1 %v9210_v54  ;;  %v9171_v24 = vcombine.high %v586_v17, %v590_v18  ;;  %v9170_v26 = vcombine.low %v586_v17, %v590_v18  ;;  %v450_v27 = vld [vmem:[#allocation7 + $0x200] sm:$0xff]  ;;  %v567_v54 = vld [vmem:[#allocation7 + $0x5a8] sm:$0xff] }
  0x94   :  { %1942 = vmatprep.subr.bf16.mxu0 %v9075_v59  ;;  %1983 = vmatprep.subr.bf16.mxu1 %v9203_v60  ;;  %v454_v28 = vld [vmem:[#allocation7 + $0x220] sm:$0xff]  ;;  %v411_v17 = vld [vmem:[#allocation7 + $0xc8] sm:$0xff] }
  0x95   :  { %v578_v29 = vld [vmem:[#allocation7 + $0x600] sm:$0xff]  ;;  %v9035_v30 = vcombine.high %v450_v27, %v454_v28  ;;  %v9034_v32 = vcombine.low %v450_v27, %v454_v28  ;;  %v415_v18 = vld [vmem:[#allocation7 + $0xe8] sm:$0xff] }
  0x96   :  { %v582_v31 = vld [vmem:[#allocation7 + $0x620] sm:$0xff]  ;;  %v531_v27 = vld [vmem:[#allocation7 + $0x488] sm:$0xff] }
  0x97   :  { %1943 = vmatpush2.bf16.msra.mxu0 %v9074_v61  ;;  %1984 = vmatpush2.bf16.msra.mxu1 %v9202_v62  ;;  %v9162_v33 = vcombine.low %v578_v29, %v582_v31  ;;  %v9163_v34 = vcombine.high %v578_v29, %v582_v31  ;;  %v535_v28 = vld [vmem:[#allocation7 + $0x4a8] sm:$0xff]  ;;  %v8996_v29 = vcombine.low %v411_v17, %v415_v18 }
  0x98   :  { %1944 = vmatprep.subr.bf16.mxu0 %v9067_v3  ;;  %1985 = vmatprep.subr.bf16.mxu1 %v9195_v4  ;;  %v9149_v3 = vcombine.high %v563_v51, %v567_v54  ;;  %v559_v4 = vld [vmem:[#allocation7 + $0x568] sm:$0xff] }
  0x99   :  { %v9141_v9 = vcombine.high %v555_v1, %v559_v4 }
  0x9b   :  { %1945 = vmatpush2.bf16.msra.mxu0 %v9066_v5  ;;  %1986 = vmatpush2.bf16.msra.mxu1 %v9194_v6  ;;  %v9020_v5 = vcombine.low %v435_v49, %v439_v50  ;;  %v9148_v6 = vcombine.low %v563_v51, %v567_v54  ;;  %v507_v49 = vld [vmem:[#allocation7 + $0x3c8] sm:$0xff] }
  0x9c   :  { %1946 = vmatprep.subr.bf16.mxu0 %v9059_v11  ;;  %1987 = vmatprep.subr.bf16.mxu1 %v9187_v12  ;;  %v547_v11 = vld [vmem:[#allocation7 + $0x508] sm:$0xff] }
  0x9d   :  { %v551_v12 = vld [vmem:[#allocation7 + $0x528] sm:$0xff] }
  0x9e   :  { %v9133_v16 = vcombine.high %v547_v11, %v551_v12  ;;  %v511_v50 = vld [vmem:[#allocation7 + $0x3e8] sm:$0xff] }
  0x9f   :  { %1947 = vmatpush2.bf16.msra.mxu0 %v9058_v13  ;;  %1988 = vmatpush2.bf16.msra.mxu1 %v9186_v14  ;;  %v9012_v13 = vcombine.low %v427_v63, %v431_v0  ;;  %v9140_v14 = vcombine.low %v555_v1, %v559_v4  ;;  %v635_v51 = vld [vmem:[#allocation7 + $0x7c8] sm:$0xff]  ;;  %v9092_v1 = vcombine.low %v507_v49, %v511_v50 }
  0xa0   :  { %1948 = vmatprep.subr.bf16.mxu0 %v9051_v19  ;;  %1989 = vmatprep.subr.bf16.mxu1 %v9179_v20  ;;  %v539_v19 = vld [vmem:[#allocation7 + $0x4c8] sm:$0xff] }
  0xa1   :  { %v543_v20 = vld [vmem:[#allocation7 + $0x4e8] sm:$0xff] }
  0xa2   :  { %v627_v63 = vld [vmem:[#allocation7 + $0x788] sm:$0xff] }
  0xa3   :  { %1949 = vmatpush2.bf16.msra.mxu0 %v9050_v21  ;;  %1990 = vmatpush2.bf16.msra.mxu1 %v9178_v22  ;;  %v9004_v21 = vcombine.low %v419_v7, %v423_v10  ;;  %v9132_v22 = vcombine.low %v547_v11, %v551_v12  ;;  %v631_v0 = vld [vmem:[#allocation7 + $0x7a8] sm:$0xff] }
  0xa4   :  { %1950 = vmatprep.subr.bf16.mxu0 %v9043_v23  ;;  %1991 = vmatprep.subr.bf16.mxu1 %v9171_v24  ;;  %v8997_v23 = vcombine.high %v411_v17, %v415_v18  ;;  %v9125_v24 = vcombine.high %v539_v19, %v543_v20  ;;  %v9213_v4 = vcombine.high %v627_v63, %v631_v0  ;;  %v619_v7 = vld [vmem:[#allocation7 + $0x748] sm:$0xff] }
  0xa5   :  { %v9212_v10 = vcombine.low %v627_v63, %v631_v0 }
  0xa7   :  { %1951 = vmatpush2.bf16.msra.mxu0 %v9042_v25  ;;  %1992 = vmatpush2.bf16.msra.mxu1 %v9170_v26  ;;  %v403_v25 = vld [vmem:[#allocation7 + $0x88] sm:$0xff] }
  0xa8   :  { %1952 = vmatprep.subr.bf16.mxu0 %v9035_v30  ;;  %1993 = vmatprep.subr.bf16.mxu1 %v9163_v34  ;;  %v407_v26 = vld [vmem:[#allocation7 + $0xa8] sm:$0xff]  ;;  %v9124_v30 = vcombine.low %v539_v19, %v543_v20 }
  0xa9   :  { %v8989_v31 = vcombine.high %v403_v25, %v407_v26  ;;  %v399_v34 = vld [vmem:[#allocation7 + $0x68] sm:$0xff]  ;;  %v8988_v37 = vcombine.low %v403_v25, %v407_v26 }
  0xab   :  { %1953 = vmatpush2.bf16.msra.mxu0 %v9034_v32  ;;  %1994 = vmatpush2.bf16.msra.mxu1 %v9162_v33  ;;  %v9117_v32 = vcombine.high %v531_v27, %v535_v28  ;;  %v395_v33 = vld [vmem:[#allocation7 + $0x48] sm:$0xff] }
  0xac   :  { %2004 = vmatprep.subr.bf16.mxu0 %v9029_v38  ;;  %2045 = vmatprep.subr.bf16.mxu1 %v9157_v42  ;;  %v9116_v38 = vcombine.low %v531_v27, %v535_v28  ;;  %v8981_v39 = vcombine.high %v395_v33, %v399_v34  ;;  %v391_v42 = vld [vmem:[#allocation7 + $0x28] sm:$0xff] }
 0x12e   :  { %v330_v43 = vpop.f32.mrf.mxu0  ;;  %v371_v44 = vpop.f32.mrf.mxu1 }
 0x12f   :  { %v378_v45 = vmax.f32 %v330_v43, 0.0  ;;  %v380_v46 = vmax.f32 %v371_v44, 0.0  ;;  %v515_v43 = vld [vmem:[#allocation7 + $0x408] sm:$0xff] }
 0x130   :  { %v332_v47 = vpop.f32.mrf.mxu0  ;;  %v373_v48 = vpop.f32.mrf.mxu1  ;;  %v519_v44 = vld [vmem:[#allocation7 + $0x428] sm:$0xff] }
 0x131   :  { %v379_v52 = vmax.f32 %v332_v47, 0.0  ;;  %v381_v53 = vmax.f32 %v373_v48, 0.0  ;;  %v11744_v59 = vpack.c.bf16 %v378_v45, %v378_v45  ;;  %v11746_v60 = vpack.c.bf16 %v380_v46, %v380_v46 }
 0x132   :  { %v334_v55 = vpop.f32.mrf.mxu0  ;;  %v375_v56 = vpop.f32.mrf.mxu1  ;;  %v8980_v45 = vcombine.low %v395_v33, %v399_v34  ;;  %v9108_v46 = vcombine.low %v523_v35, %v527_v36  ;;  %v9101_v48 = vcombine.high %v515_v43, %v519_v44  ;;  %v9100_v54 = vcombine.low %v515_v43, %v519_v44 }
 0x133   :  { %v11740_v57 = vpack.c.bf16 %v379_v52, %v379_v52  ;;  %v11742_v58 = vpack.c.bf16 %v381_v53, %v381_v53  ;;  %v639_v52 = vld [vmem:[#allocation7 + $0x7e8] sm:$0xff]  ;;  %v9093_v55 = vcombine.high %v507_v49, %v511_v50 }
 0x134   :  { %v335_v61 = vpop.f32.mrf.mxu0  ;;  %v376_v62 = vpop.f32.mrf.mxu1  ;;  %v9221_v56 = vcombine.high %v635_v51, %v639_v52 }
 0x135   :  { %1954 = vmatprep.mubr.bf16.mxu0 %v11740_v57  ;;  %1995 = vmatprep.mubr.bf16.mxu1 %v11742_v58  ;;  %v499_v61 = vld [vmem:[#allocation7 + $0x388] sm:$0xff] }
 0x136   :  { %1955 = vmatmul.mubr.bf16.vlgmr.msra.gmra.mxu0 %v11744_v59  ;;  %1996 = vmatmul.mubr.bf16.vlgmr.msra.gmra.mxu1 %v11746_v60  ;;  %v503_v62 = vld [vmem:[#allocation7 + $0x3a8] sm:$0xff] }
 0x137   :  { %2005 = vmatpush1.bf16.msra.mxu0 %v9028_v40  ;;  %2046 = vmatpush1.bf16.msra.mxu1 %v9156_v41  ;;  %v9109_v40 = vcombine.high %v523_v35, %v527_v36  ;;  %v387_v41 = vld [vmem:[#allocation7 + $0x8] sm:$0xff] }
 0x138   :  { %2036 = vmatprep.mubr.bf16.mxu0 %v11740_v57  ;;  %2077 = vmatprep.mubr.bf16.mxu1 %v11742_v58  ;;  %v8973_v47 = vcombine.high %v387_v41, %v391_v42  ;;  %v8972_v53 = vcombine.low %v387_v41, %v391_v42 }
 0x139   :  { %2006 = vmatprep.subr.bf16.mxu0 %v9021_v2  ;;  %2047 = vmatprep.subr.bf16.mxu1 %v9149_v3  ;;  %v9220_v2 = vcombine.low %v635_v51, %v639_v52  ;;  %v9085_v3 = vcombine.high %v499_v61, %v503_v62 }
 0x13b   :  { %2007 = vmatpush1.bf16.msra.mxu0 %v9020_v5  ;;  %2048 = vmatpush1.bf16.msra.mxu1 %v9148_v6  ;;  %v491_v5 = vld [vmem:[#allocation7 + $0x348] sm:$0xff] }
 0x13c   :  { %2008 = vmatprep.subr.bf16.mxu0 %v9013_v8  ;;  %2049 = vmatprep.subr.bf16.mxu1 %v9141_v9  ;;  %v495_v6 = vld [vmem:[#allocation7 + $0x368] sm:$0xff]  ;;  %v9084_v9 = vcombine.low %v499_v61, %v503_v62 }
 0x13d   :  { %v623_v8 = vld [vmem:[#allocation7 + $0x768] sm:$0xff]  ;;  %v9077_v11 = vcombine.high %v491_v5, %v495_v6  ;;  %v9076_v17 = vcombine.low %v491_v5, %v495_v6  ;;  %v428_v6 = vld [vmem:[#allocation7 + $0x150] sm:$0xff] }
 0x13e   :  { %v9205_v12 = vcombine.high %v619_v7, %v623_v8  ;;  %v9204_v18 = vcombine.low %v619_v7, %v623_v8  ;;  %v432_v7 = vld [vmem:[#allocation7 + $0x170] sm:$0xff] }
 0x13f   :  { %2009 = vmatpush1.bf16.msra.mxu0 %v9012_v13  ;;  %2050 = vmatpush1.bf16.msra.mxu1 %v9140_v14  ;;  %v483_v13 = vld [vmem:[#allocation7 + $0x308] sm:$0xff] }
 0x140   :  { %2010 = vmatprep.subr.bf16.mxu0 %v9005_v15  ;;  %2051 = vmatprep.subr.bf16.mxu1 %v9133_v16  ;;  %v487_v14 = vld [vmem:[#allocation7 + $0x328] sm:$0xff] }
 0x141   :  { %v611_v15 = vld [vmem:[#allocation7 + $0x708] sm:$0xff]  ;;  %v9069_v19 = vcombine.high %v483_v13, %v487_v14  ;;  %v9068_v25 = vcombine.low %v483_v13, %v487_v14  ;;  %v420_v14 = vld [vmem:[#allocation7 + $0x110] sm:$0xff] }
 0x142   :  { %v615_v16 = vld [vmem:[#allocation7 + $0x728] sm:$0xff] }
 0x143   :  { %2011 = vmatpush1.bf16.msra.mxu0 %v9004_v21  ;;  %2052 = vmatpush1.bf16.msra.mxu1 %v9132_v22  ;;  %v9197_v20 = vcombine.high %v611_v15, %v615_v16  ;;  %v475_v21 = vld [vmem:[#allocation7 + $0x2c8] sm:$0xff]  ;;  %v9196_v26 = vcombine.low %v611_v15, %v615_v16  ;;  %v424_v15 = vld [vmem:[#allocation7 + $0x130] sm:$0xff] }
 0x144   :  { %2012 = vmatprep.subr.bf16.mxu0 %v8997_v23  ;;  %2053 = vmatprep.subr.bf16.mxu1 %v9125_v24  ;;  %v479_v22 = vld [vmem:[#allocation7 + $0x2e8] sm:$0xff] }
 0x145   :  { %v603_v23 = vld [vmem:[#allocation7 + $0x6c8] sm:$0xff]  ;;  %v9061_v27 = vcombine.high %v475_v21, %v479_v22  ;;  %v9060_v33 = vcombine.low %v475_v21, %v479_v22  ;;  %v9014_v21 = vcombine.low %v428_v6, %v432_v7  ;;  %v412_v22 = vld [vmem:[#allocation7 + $0xd0] sm:$0xff] }
 0x146   :  { %v607_v24 = vld [vmem:[#allocation7 + $0x6e8] sm:$0xff] }
 0x147   :  { %2013 = vmatpush1.bf16.msra.mxu0 %v8996_v29  ;;  %2054 = vmatpush1.bf16.msra.mxu1 %v9124_v30  ;;  %v9189_v28 = vcombine.high %v603_v23, %v607_v24  ;;  %v467_v29 = vld [vmem:[#allocation7 + $0x288] sm:$0xff]  ;;  %v9188_v34 = vcombine.low %v603_v23, %v607_v24  ;;  %v416_v23 = vld [vmem:[#allocation7 + $0xf0] sm:$0xff] }
 0x148   :  { %2014 = vmatprep.subr.bf16.mxu0 %v8989_v31  ;;  %2055 = vmatprep.subr.bf16.mxu1 %v9117_v32  ;;  %v471_v30 = vld [vmem:[#allocation7 + $0x2a8] sm:$0xff] }
 0x149   :  { %v595_v31 = vld [vmem:[#allocation7 + $0x688] sm:$0xff]  ;;  %v9053_v35 = vcombine.high %v467_v29, %v471_v30  ;;  %v9052_v41 = vcombine.low %v467_v29, %v471_v30  ;;  %v9006_v29 = vcombine.low %v420_v14, %v424_v15  ;;  %v404_v30 = vld [vmem:[#allocation7 + $0x90] sm:$0xff] }
 0x14a   :  { %v599_v32 = vld [vmem:[#allocation7 + $0x6a8] sm:$0xff] }
 0x14b   :  { %2015 = vmatpush1.bf16.msra.mxu0 %v8988_v37  ;;  %2056 = vmatpush1.bf16.msra.mxu1 %v9116_v38  ;;  %v9181_v36 = vcombine.high %v595_v31, %v599_v32  ;;  %v459_v37 = vld [vmem:[#allocation7 + $0x248] sm:$0xff]  ;;  %v9180_v42 = vcombine.low %v595_v31, %v599_v32  ;;  %v408_v31 = vld [vmem:[#allocation7 + $0xb0] sm:$0xff] }
 0x14c   :  { %2016 = vmatprep.subr.bf16.mxu0 %v8981_v39  ;;  %2057 = vmatprep.subr.bf16.mxu1 %v9109_v40  ;;  %v463_v38 = vld [vmem:[#allocation7 + $0x268] sm:$0xff] }
 0x14d   :  { %v587_v39 = vld [vmem:[#allocation7 + $0x648] sm:$0xff]  ;;  %v9045_v43 = vcombine.high %v459_v37, %v463_v38  ;;  %v9044_v49 = vcombine.low %v459_v37, %v463_v38  ;;  %v8998_v37 = vcombine.low %v412_v22, %v416_v23  ;;  %v396_v38 = vld [vmem:[#allocation7 + $0x50] sm:$0xff] }
 0x14e   :  { %v591_v40 = vld [vmem:[#allocation7 + $0x668] sm:$0xff] }
 0x14f   :  { %2017 = vmatpush1.bf16.msra.mxu0 %v8980_v45  ;;  %2058 = vmatpush1.bf16.msra.mxu1 %v9108_v46  ;;  %v9173_v44 = vcombine.high %v587_v39, %v591_v40  ;;  %v451_v45 = vld [vmem:[#allocation7 + $0x208] sm:$0xff]  ;;  %v9172_v50 = vcombine.low %v587_v39, %v591_v40  ;;  %v400_v39 = vld [vmem:[#allocation7 + $0x70] sm:$0xff] }
 0x150   :  { %2018 = vmatprep.subr.bf16.mxu0 %v8973_v47  ;;  %2059 = vmatprep.subr.bf16.mxu1 %v9101_v48  ;;  %v455_v46 = vld [vmem:[#allocation7 + $0x228] sm:$0xff] }
 0x151   :  { %v579_v47 = vld [vmem:[#allocation7 + $0x608] sm:$0xff]  ;;  %v9037_v51 = vcombine.high %v451_v45, %v455_v46  ;;  %v9036_v61 = vcombine.low %v451_v45, %v455_v46  ;;  %v8990_v45 = vcombine.low %v404_v30, %v408_v31  ;;  %v388_v46 = vld [vmem:[#allocation7 + $0x10] sm:$0xff] }
 0x152   :  { %v583_v48 = vld [vmem:[#allocation7 + $0x628] sm:$0xff] }
 0x153   :  { %2019 = vmatpush1.bf16.msra.mxu0 %v8972_v53  ;;  %2060 = vmatpush1.bf16.msra.mxu1 %v9100_v54  ;;  %v9165_v52 = vcombine.high %v579_v47, %v583_v48  ;;  %v444_v53 = vld [vmem:[#allocation7 + $0x1d0] sm:$0xff]  ;;  %v9164_v62 = vcombine.low %v579_v47, %v583_v48 }
 0x154   :  { %2020 = vmatprep.subr.bf16.mxu0 %v9093_v55  ;;  %2061 = vmatprep.subr.bf16.mxu1 %v9221_v56  ;;  %v448_v54 = vld [vmem:[#allocation7 + $0x1f0] sm:$0xff] }
 0x155   :  { %v572_v55 = vld [vmem:[#allocation7 + $0x5d0] sm:$0xff]  ;;  %v9031_v63 = vcombine.high %v444_v53, %v448_v54  ;;  %v9030_v5 = vcombine.low %v444_v53, %v448_v54  ;;  %v8982_v53 = vcombine.low %v396_v38, %v400_v39 }
 0x156   :  { %v576_v56 = vld [vmem:[#allocation7 + $0x5f0] sm:$0xff] }
 0x157   :  { %2021 = vmatpush2.bf16.msra.mxu0 %v9092_v1  ;;  %2062 = vmatpush2.bf16.msra.mxu1 %v9220_v2  ;;  %v9159_v0 = vcombine.high %v572_v55, %v576_v56  ;;  %v436_v1 = vld [vmem:[#allocation7 + $0x190] sm:$0xff]  ;;  %v9158_v8 = vcombine.low %v572_v55, %v576_v56 }
 0x158   :  { %2022 = vmatprep.subr.bf16.mxu0 %v9085_v3  ;;  %2063 = vmatprep.subr.bf16.mxu1 %v9213_v4  ;;  %v440_v2 = vld [vmem:[#allocation7 + $0x1b0] sm:$0xff] }
 0x159   :  { %v564_v3 = vld [vmem:[#allocation7 + $0x590] sm:$0xff]  ;;  %v9022_v13 = vcombine.low %v436_v1, %v440_v2 }
 0x15a   :  { %v568_v4 = vld [vmem:[#allocation7 + $0x5b0] sm:$0xff] }
 0x15b   :  { %2023 = vmatpush2.bf16.msra.mxu0 %v9084_v9  ;;  %2064 = vmatpush2.bf16.msra.mxu1 %v9212_v10  ;;  %v556_v9 = vld [vmem:[#allocation7 + $0x550] sm:$0xff]  ;;  %v9023_v10 = vcombine.high %v436_v1, %v440_v2  ;;  %v9150_v16 = vcombine.low %v564_v3, %v568_v4 }
 0x15c   :  { %2024 = vmatprep.subr.bf16.mxu0 %v9077_v11  ;;  %2065 = vmatprep.subr.bf16.mxu1 %v9205_v12  ;;  %v9151_v11 = vcombine.high %v564_v3, %v568_v4  ;;  %v560_v12 = vld [vmem:[#allocation7 + $0x570] sm:$0xff] }
 0x15d   :  { %v9142_v24 = vcombine.low %v556_v9, %v560_v12  ;;  %v392_v47 = vld [vmem:[#allocation7 + $0x30] sm:$0xff] }
 0x15e   :  { %v508_v54 = vld [vmem:[#allocation7 + $0x3d0] sm:$0xff]  ;;  %v8974_v1 = vcombine.low %v388_v46, %v392_v47 }
 0x15f   :  { %2025 = vmatpush2.bf16.msra.mxu0 %v9076_v17  ;;  %2066 = vmatpush2.bf16.msra.mxu1 %v9204_v18  ;;  %v9015_v17 = vcombine.high %v428_v6, %v432_v7  ;;  %v548_v18 = vld [vmem:[#allocation7 + $0x510] sm:$0xff] }
 0x160   :  { %2026 = vmatprep.subr.bf16.mxu0 %v9069_v19  ;;  %2067 = vmatprep.subr.bf16.mxu1 %v9197_v20  ;;  %v9143_v19 = vcombine.high %v556_v9, %v560_v12  ;;  %v552_v20 = vld [vmem:[#allocation7 + $0x530] sm:$0xff] }
 0x161   :  { %v9134_v32 = vcombine.low %v548_v18, %v552_v20  ;;  %v512_v55 = vld [vmem:[#allocation7 + $0x3f0] sm:$0xff] }
 0x162   :  { %v500_v2 = vld [vmem:[#allocation7 + $0x390] sm:$0xff]  ;;  %v9094_v9 = vcombine.low %v508_v54, %v512_v55 }
 0x163   :  { %2027 = vmatpush2.bf16.msra.mxu0 %v9068_v25  ;;  %2068 = vmatpush2.bf16.msra.mxu1 %v9196_v26  ;;  %v9007_v25 = vcombine.high %v420_v14, %v424_v15  ;;  %v9135_v26 = vcombine.high %v548_v18, %v552_v20  ;;  %v504_v3 = vld [vmem:[#allocation7 + $0x3b0] sm:$0xff] }
 0x164   :  { %2028 = vmatprep.subr.bf16.mxu0 %v9061_v27  ;;  %2069 = vmatprep.subr.bf16.mxu1 %v9189_v28  ;;  %v540_v27 = vld [vmem:[#allocation7 + $0x4d0] sm:$0xff] }
 0x165   :  { %v544_v28 = vld [vmem:[#allocation7 + $0x4f0] sm:$0xff] }
 0x166   :  { %v9126_v40 = vcombine.low %v540_v27, %v544_v28  ;;  %v628_v6 = vld [vmem:[#allocation7 + $0x790] sm:$0xff] }
 0x167   :  { %2029 = vmatpush2.bf16.msra.mxu0 %v9060_v33  ;;  %2070 = vmatpush2.bf16.msra.mxu1 %v9188_v34  ;;  %v8999_v33 = vcombine.high %v412_v22, %v416_v23  ;;  %v532_v34 = vld [vmem:[#allocation7 + $0x490] sm:$0xff] }
 0x168   :  { %2030 = vmatprep.subr.bf16.mxu0 %v9053_v35  ;;  %2071 = vmatprep.subr.bf16.mxu1 %v9181_v36  ;;  %v536_v35 = vld [vmem:[#allocation7 + $0x4b0] sm:$0xff]  ;;  %v9127_v36 = vcombine.high %v540_v27, %v544_v28 }
 0x169   :  { %v9118_v48 = vcombine.low %v532_v34, %v536_v35  ;;  %v632_v7 = vld [vmem:[#allocation7 + $0x7b0] sm:$0xff] }
 0x16a   :  { %v620_v14 = vld [vmem:[#allocation7 + $0x750] sm:$0xff]  ;;  %v9214_v20 = vcombine.low %v628_v6, %v632_v7 }
 0x16b   :  { %2031 = vmatpush2.bf16.msra.mxu0 %v9052_v41  ;;  %2072 = vmatpush2.bf16.msra.mxu1 %v9180_v42  ;;  %v8991_v41 = vcombine.high %v404_v30, %v408_v31  ;;  %v524_v42 = vld [vmem:[#allocation7 + $0x450] sm:$0xff] }
 0x16c   :  { %2032 = vmatprep.subr.bf16.mxu0 %v9045_v43  ;;  %2073 = vmatprep.subr.bf16.mxu1 %v9173_v44  ;;  %v528_v43 = vld [vmem:[#allocation7 + $0x470] sm:$0xff]  ;;  %v9119_v44 = vcombine.high %v532_v34, %v536_v35 }
 0x16d   :  { %v9110_v56 = vcombine.low %v524_v42, %v528_v43  ;;  %v624_v15 = vld [vmem:[#allocation7 + $0x770] sm:$0xff] }
 0x16e   :  { %v484_v18 = vld [vmem:[#allocation7 + $0x310] sm:$0xff]  ;;  %v9206_v28 = vcombine.low %v620_v14, %v624_v15 }
 0x16f   :  { %2033 = vmatpush2.bf16.msra.mxu0 %v9044_v49  ;;  %2074 = vmatpush2.bf16.msra.mxu1 %v9172_v50  ;;  %v8983_v49 = vcombine.high %v396_v38, %v400_v39  ;;  %v516_v50 = vld [vmem:[#allocation7 + $0x410] sm:$0xff] }
 0x170   :  { %2034 = vmatprep.subr.bf16.mxu0 %v9037_v51  ;;  %2075 = vmatprep.subr.bf16.mxu1 %v9165_v52  ;;  %v520_v51 = vld [vmem:[#allocation7 + $0x430] sm:$0xff]  ;;  %v9111_v52 = vcombine.high %v524_v42, %v528_v43 }
 0x171   :  { %v9102_v4 = vcombine.low %v516_v50, %v520_v51  ;;  %v612_v22 = vld [vmem:[#allocation7 + $0x710] sm:$0xff] }
 0x172   :  { %v616_v23 = vld [vmem:[#allocation7 + $0x730] sm:$0xff] }
 0x173   :  { %2035 = vmatpush2.bf16.msra.mxu0 %v9036_v61  ;;  %2076 = vmatpush2.bf16.msra.mxu1 %v9164_v62  ;;  %v8975_v61 = vcombine.high %v388_v46, %v392_v47  ;;  %v636_v62 = vld [vmem:[#allocation7 + $0x7d0] sm:$0xff] }
 0x174   :  { %2086 = vmatprep.subr.bf16.mxu0 %v9031_v63  ;;  %2127 = vmatprep.subr.bf16.mxu1 %v9159_v0  ;;  %v640_v63 = vld [vmem:[#allocation7 + $0x7f0] sm:$0xff]  ;;  %v9103_v0 = vcombine.high %v516_v50, %v520_v51 }
 0x175   :  { %v9222_v12 = vcombine.low %v636_v62, %v640_v63  ;;  %v480_v27 = vld [vmem:[#allocation7 + $0x2f0] sm:$0xff] }
 0x176   :  { %2037 = vmatmul.mubr.bf16.vlgmr.msra.gmra.mxu0 %v11744_v59  ;;  %2078 = vmatmul.mubr.bf16.vlgmr.msra.gmra.mxu1 %v11746_v60  ;;  %v604_v30 = vld [vmem:[#allocation7 + $0x6d0] sm:$0xff] }
 0x177   :  { %2087 = vmatpush1.bf16.msra.mxu0 %v9030_v5  ;;  %2118 = vmatprep.mubr.bf16.mxu0 %v11740_v57  ;;  %v9095_v5 = vcombine.high %v508_v54, %v512_v55  ;;  %v608_v31 = vld [vmem:[#allocation7 + $0x6f0] sm:$0xff] }
 0x178   :  { %2128 = vmatpush1.bf16.msra.mxu1 %v9158_v8  ;;  %2159 = vmatprep.mubr.bf16.mxu1 %v11742_v58  ;;  %v9223_v8 = vcombine.high %v636_v62, %v640_v63  ;;  %v468_v34 = vld [vmem:[#allocation7 + $0x290] sm:$0xff]  ;;  %v445_v62 = vld [vmem:[#allocation7 + $0x1d8] sm:$0xff] }
 0x179   :  { %2088 = vmatprep.subr.bf16.mxu0 %v9023_v10  ;;  %2129 = vmatprep.subr.bf16.mxu1 %v9151_v11  ;;  %v492_v10 = vld [vmem:[#allocation7 + $0x350] sm:$0xff]  ;;  %v449_v63 = vld [vmem:[#allocation7 + $0x1f8] sm:$0xff] }
 0x17a   :  { %v496_v11 = vld [vmem:[#allocation7 + $0x370] sm:$0xff] }
 0x17b   :  { %2089 = vmatpush1.bf16.msra.mxu0 %v9022_v13  ;;  %v9087_v13 = vcombine.high %v500_v2, %v504_v3  ;;  %v472_v35 = vld [vmem:[#allocation7 + $0x2b0] sm:$0xff] }
 0x17c   :  { %2130 = vmatpush1.bf16.msra.mxu1 %v9150_v16  ;;  %2090 = vmatprep.subr.bf16.mxu0 %v9015_v17  ;;  %v9215_v16 = vcombine.high %v628_v6, %v632_v7  ;;  %v9086_v17 = vcombine.low %v500_v2, %v504_v3  ;;  %v596_v38 = vld [vmem:[#allocation7 + $0x690] sm:$0xff]  ;;  %v573_v2 = vld [vmem:[#allocation7 + $0x5d8] sm:$0xff]  ;;  %v9033_v7 = vcombine.high %v445_v62, %v449_v63 }
 0x17d   :  { %2131 = vmatprep.subr.bf16.mxu1 %v9143_v19  ;;  %v488_v19 = vld [vmem:[#allocation7 + $0x330] sm:$0xff]  ;;  %v577_v3 = vld [vmem:[#allocation7 + $0x5f8] sm:$0xff] }
 0x17e   :  { %v600_v39 = vld [vmem:[#allocation7 + $0x6b0] sm:$0xff] }
 0x17f   :  { %2091 = vmatpush1.bf16.msra.mxu0 %v9014_v21  ;;  %v9079_v21 = vcombine.high %v492_v10, %v496_v11  ;;  %v460_v42 = vld [vmem:[#allocation7 + $0x250] sm:$0xff] }
 0x180   :  { %2132 = vmatpush1.bf16.msra.mxu1 %v9142_v24  ;;  %2092 = vmatprep.subr.bf16.mxu0 %v9007_v25  ;;  %v9207_v24 = vcombine.high %v620_v14, %v624_v15  ;;  %v9078_v25 = vcombine.low %v492_v10, %v496_v11  ;;  %v464_v43 = vld [vmem:[#allocation7 + $0x270] sm:$0xff]  ;;  %v9161_v10 = vcombine.high %v573_v2, %v577_v3  ;;  %v565_v11 = vld [vmem:[#allocation7 + $0x598] sm:$0xff] }
 0x181   :  { %2133 = vmatprep.subr.bf16.mxu1 %v9135_v26  ;;  %v476_v26 = vld [vmem:[#allocation7 + $0x2d0] sm:$0xff]  ;;  %v429_v14 = vld [vmem:[#allocation7 + $0x158] sm:$0xff] }
 0x182   :  { %v588_v46 = vld [vmem:[#allocation7 + $0x650] sm:$0xff]  ;;  %v433_v15 = vld [vmem:[#allocation7 + $0x178] sm:$0xff] }
 0x183   :  { %2093 = vmatpush1.bf16.msra.mxu0 %v9006_v29  ;;  %v9071_v29 = vcombine.high %v484_v18, %v488_v19  ;;  %v592_v47 = vld [vmem:[#allocation7 + $0x670] sm:$0xff] }
 0x184   :  { %2134 = vmatpush1.bf16.msra.mxu1 %v9134_v32  ;;  %2094 = vmatprep.subr.bf16.mxu0 %v8999_v33  ;;  %v9199_v32 = vcombine.high %v612_v22, %v616_v23  ;;  %v9070_v33 = vcombine.low %v484_v18, %v488_v19  ;;  %v452_v50 = vld [vmem:[#allocation7 + $0x210] sm:$0xff]  ;;  %v561_v18 = vld [vmem:[#allocation7 + $0x578] sm:$0xff] }
 0x185   :  { %2135 = vmatprep.subr.bf16.mxu1 %v9127_v36  ;;  %v9198_v36 = vcombine.low %v612_v22, %v616_v23  ;;  %v456_v51 = vld [vmem:[#allocation7 + $0x230] sm:$0xff]  ;;  %v421_v22 = vld [vmem:[#allocation7 + $0x118] sm:$0xff] }
 0x186   :  { %v580_v54 = vld [vmem:[#allocation7 + $0x610] sm:$0xff]  ;;  %v425_v23 = vld [vmem:[#allocation7 + $0x138] sm:$0xff] }
 0x187   :  { %2095 = vmatpush1.bf16.msra.mxu0 %v8998_v37  ;;  %v9063_v37 = vcombine.high %v476_v26, %v480_v27  ;;  %v584_v55 = vld [vmem:[#allocation7 + $0x630] sm:$0xff] }
 0x188   :  { %2136 = vmatpush1.bf16.msra.mxu1 %v9126_v40  ;;  %2096 = vmatprep.subr.bf16.mxu0 %v8991_v41  ;;  %v9191_v40 = vcombine.high %v604_v30, %v608_v31  ;;  %v9062_v41 = vcombine.low %v476_v26, %v480_v27  ;;  %v9166_v6 = vcombine.low %v580_v54, %v584_v55  ;;  %v549_v26 = vld [vmem:[#allocation7 + $0x518] sm:$0xff] }
 0x189   :  { %2137 = vmatprep.subr.bf16.mxu1 %v9119_v44  ;;  %v9190_v44 = vcombine.low %v604_v30, %v608_v31  ;;  %v413_v30 = vld [vmem:[#allocation7 + $0xd8] sm:$0xff] }
 0x18a   :  { %v417_v31 = vld [vmem:[#allocation7 + $0xf8] sm:$0xff] }
 0x18b   :  { %2097 = vmatpush1.bf16.msra.mxu0 %v8990_v45  ;;  %v9055_v45 = vcombine.high %v468_v34, %v472_v35 }
 0x18c   :  { %2138 = vmatpush1.bf16.msra.mxu1 %v9118_v48  ;;  %2098 = vmatprep.subr.bf16.mxu0 %v8983_v49  ;;  %v9183_v48 = vcombine.high %v596_v38, %v600_v39  ;;  %v9054_v49 = vcombine.low %v468_v34, %v472_v35  ;;  %v541_v34 = vld [vmem:[#allocation7 + $0x4d8] sm:$0xff] }
 0x18d   :  { %2139 = vmatprep.subr.bf16.mxu1 %v9111_v52  ;;  %v9182_v52 = vcombine.low %v596_v38, %v600_v39  ;;  %v545_v35 = vld [vmem:[#allocation7 + $0x4f8] sm:$0xff] }
 0x18e   :  { %v405_v38 = vld [vmem:[#allocation7 + $0x98] sm:$0xff]  ;;  %v9129_v39 = vcombine.high %v541_v34, %v545_v35 }
 0x18f   :  { %2099 = vmatpush1.bf16.msra.mxu0 %v8982_v53  ;;  %v9047_v53 = vcombine.high %v460_v42, %v464_v43 }
 0x190   :  { %2140 = vmatpush1.bf16.msra.mxu1 %v9110_v56  ;;  %2100 = vmatprep.subr.bf16.mxu0 %v8975_v61  ;;  %v9175_v56 = vcombine.high %v588_v46, %v592_v47  ;;  %v9046_v61 = vcombine.low %v460_v42, %v464_v43  ;;  %v537_v42 = vld [vmem:[#allocation7 + $0x4b8] sm:$0xff]  ;;  %v9000_v43 = vcombine.low %v413_v30, %v417_v31 }
 0x191   :  { %2141 = vmatprep.subr.bf16.mxu1 %v9103_v0  ;;  %v9174_v0 = vcombine.low %v588_v46, %v592_v47  ;;  %v9128_v46 = vcombine.low %v541_v34, %v545_v35  ;;  %v605_v35 = vld [vmem:[#allocation7 + $0x6d8] sm:$0xff] }
 0x193   :  { %2101 = vmatpush1.bf16.msra.mxu0 %v8974_v1  ;;  %v9039_v1 = vcombine.high %v452_v50, %v456_v51 }
 0x194   :  { %2142 = vmatpush1.bf16.msra.mxu1 %v9102_v4  ;;  %2102 = vmatprep.subr.bf16.mxu0 %v9095_v5  ;;  %v9167_v4 = vcombine.high %v580_v54, %v584_v55  ;;  %v9038_v5 = vcombine.low %v452_v50, %v456_v51 }
 0x195   :  { %2143 = vmatprep.subr.bf16.mxu1 %v9223_v8  ;;  %v437_v8 = vld [vmem:[#allocation7 + $0x198] sm:$0xff] }
 0x197   :  { %2103 = vmatpush2.bf16.msra.mxu0 %v9094_v9  ;;  %v441_v9 = vld [vmem:[#allocation7 + $0x1b8] sm:$0xff] }
 0x198   :  { %2144 = vmatpush2.bf16.msra.mxu1 %v9222_v12  ;;  %2104 = vmatprep.subr.bf16.mxu0 %v9087_v13  ;;  %v569_v12 = vld [vmem:[#allocation7 + $0x5b8] sm:$0xff]  ;;  %v9032_v13 = vcombine.low %v445_v62, %v449_v63  ;;  %v9025_v19 = vcombine.high %v437_v8, %v441_v9 }
 0x199   :  { %2145 = vmatprep.subr.bf16.mxu1 %v9215_v16  ;;  %v9160_v16 = vcombine.low %v573_v2, %v577_v3 }
 0x19b   :  { %2105 = vmatpush2.bf16.msra.mxu0 %v9086_v17  ;;  %v557_v17 = vld [vmem:[#allocation7 + $0x558] sm:$0xff] }
 0x19c   :  { %2146 = vmatpush2.bf16.msra.mxu1 %v9214_v20  ;;  %2106 = vmatprep.subr.bf16.mxu0 %v9079_v21  ;;  %v9153_v20 = vcombine.high %v565_v11, %v569_v12  ;;  %v9024_v21 = vcombine.low %v437_v8, %v441_v9  ;;  %v9145_v27 = vcombine.high %v557_v17, %v561_v18  ;;  %v501_v8 = vld [vmem:[#allocation7 + $0x398] sm:$0xff] }
 0x19d   :  { %2147 = vmatprep.subr.bf16.mxu1 %v9207_v24  ;;  %v9152_v24 = vcombine.low %v565_v11, %v569_v12  ;;  %v505_v9 = vld [vmem:[#allocation7 + $0x3b8] sm:$0xff] }
 0x19e   :  { %v629_v12 = vld [vmem:[#allocation7 + $0x798] sm:$0xff] }
 0x19f   :  { %2107 = vmatpush2.bf16.msra.mxu0 %v9078_v25  ;;  %v9017_v25 = vcombine.high %v429_v14, %v433_v15 }
 0x1a0   :  { %2148 = vmatpush2.bf16.msra.mxu1 %v9206_v28  ;;  %2108 = vmatprep.subr.bf16.mxu0 %v9071_v29  ;;  %v553_v28 = vld [vmem:[#allocation7 + $0x538] sm:$0xff]  ;;  %v9016_v29 = vcombine.low %v429_v14, %v433_v15 }
 0x1a1   :  { %2149 = vmatprep.subr.bf16.mxu1 %v9199_v32  ;;  %v9144_v32 = vcombine.low %v557_v17, %v561_v18  ;;  %v497_v17 = vld [vmem:[#allocation7 + $0x378] sm:$0xff] }
 0x1a3   :  { %2109 = vmatpush2.bf16.msra.mxu0 %v9070_v33  ;;  %v9009_v33 = vcombine.high %v421_v22, %v425_v23 }
 0x1a4   :  { %2150 = vmatpush2.bf16.msra.mxu1 %v9198_v36  ;;  %2110 = vmatprep.subr.bf16.mxu0 %v9063_v37  ;;  %v9008_v36 = vcombine.low %v421_v22, %v425_v23  ;;  %v9001_v37 = vcombine.high %v413_v30, %v417_v31  ;;  %v9088_v23 = vcombine.low %v501_v8, %v505_v9 }
 0x1a5   :  { %2151 = vmatprep.subr.bf16.mxu1 %v9191_v40  ;;  %v409_v40 = vld [vmem:[#allocation7 + $0xb8] sm:$0xff] }
 0x1a6   :  { %v8993_v47 = vcombine.high %v405_v38, %v409_v40  ;;  %v8992_v51 = vcombine.low %v405_v38, %v409_v40  ;;  %v469_v38 = vld [vmem:[#allocation7 + $0x298] sm:$0xff] }
 0x1a7   :  { %2111 = vmatpush2.bf16.msra.mxu0 %v9062_v41  ;;  %v533_v41 = vld [vmem:[#allocation7 + $0x498] sm:$0xff] }
 0x1a8   :  { %2152 = vmatpush2.bf16.msra.mxu1 %v9190_v44  ;;  %2112 = vmatprep.subr.bf16.mxu0 %v9055_v45  ;;  %v397_v44 = vld [vmem:[#allocation7 + $0x58] sm:$0xff]  ;;  %v9121_v50 = vcombine.high %v533_v41, %v537_v42  ;;  %v9120_v54 = vcombine.low %v533_v41, %v537_v42 }
 0x1a9   :  { %2153 = vmatprep.subr.bf16.mxu1 %v9183_v48  ;;  %v401_v45 = vld [vmem:[#allocation7 + $0x78] sm:$0xff] }
 0x1aa   :  { %v525_v48 = vld [vmem:[#allocation7 + $0x458] sm:$0xff]  ;;  %v8985_v55 = vcombine.high %v397_v44, %v401_v45  ;;  %v8984_v63 = vcombine.low %v397_v44, %v401_v45 }
 0x1ab   :  { %2113 = vmatpush2.bf16.msra.mxu0 %v9054_v49  ;;  %v529_v49 = vld [vmem:[#allocation7 + $0x478] sm:$0xff] }
 0x1ac   :  { %2154 = vmatpush2.bf16.msra.mxu1 %v9182_v52  ;;  %2114 = vmatprep.subr.bf16.mxu0 %v9047_v53  ;;  %v389_v52 = vld [vmem:[#allocation7 + $0x18] sm:$0xff]  ;;  %v9113_v62 = vcombine.high %v525_v48, %v529_v49  ;;  %v9112_v2 = vcombine.low %v525_v48, %v529_v49 }
 0x1ad   :  { %2155 = vmatprep.subr.bf16.mxu1 %v9175_v56  ;;  %v393_v53 = vld [vmem:[#allocation7 + $0x38] sm:$0xff] }
 0x1ae   :  { %v517_v56 = vld [vmem:[#allocation7 + $0x418] sm:$0xff]  ;;  %v8977_v3 = vcombine.high %v389_v52, %v393_v53 }
 0x1af   :  { %2115 = vmatpush2.bf16.msra.mxu0 %v9046_v61  ;;  %v521_v61 = vld [vmem:[#allocation7 + $0x438] sm:$0xff] }
 0x1b0   :  { %2156 = vmatpush2.bf16.msra.mxu1 %v9174_v0  ;;  %2116 = vmatprep.subr.bf16.mxu0 %v9039_v1  ;;  %v509_v0 = vld [vmem:[#allocation7 + $0x3d8] sm:$0xff] }
 0x1b1   :  { %2157 = vmatprep.subr.bf16.mxu1 %v9167_v4  ;;  %v513_v1 = vld [vmem:[#allocation7 + $0x3f8] sm:$0xff] }
 0x1b2   :  { %v637_v4 = vld [vmem:[#allocation7 + $0x7d8] sm:$0xff]  ;;  %v9097_v11 = vcombine.high %v509_v0, %v513_v1  ;;  %v9096_v15 = vcombine.low %v509_v0, %v513_v1 }
 0x1b3   :  { %2117 = vmatpush2.bf16.msra.mxu0 %v9038_v5  ;;  %v641_v5 = vld [vmem:[#allocation7 + $0x7f8] sm:$0xff] }
 0x1b4   :  { %2158 = vmatpush2.bf16.msra.mxu1 %v9166_v6  ;;  %2168 = vmatprep.subr.bf16.mxu0 %v9033_v7  ;;  %v9105_v6 = vcombine.high %v517_v56, %v521_v61  ;;  %v8976_v7 = vcombine.low %v389_v52, %v393_v53  ;;  %v9225_v14 = vcombine.high %v637_v4, %v641_v5  ;;  %v597_v42 = vld [vmem:[#allocation7 + $0x698] sm:$0xff] }
 0x1b5   :  { %2209 = vmatprep.subr.bf16.mxu1 %v9161_v10  ;;  %v9104_v10 = vcombine.low %v517_v56, %v521_v61  ;;  %v9224_v18 = vcombine.low %v637_v4, %v641_v5  ;;  %v10289_v5 = vld [vmem:[#allocation9 + $0x2a4] ss:$48 sps:$4 sm:$0xff]  }
 0x1b6   :  { %2119 = vmatmul.mubr.bf16.vlgmr.msra.gmra.mxu0 %v11744_v59 }
 0x1b7   :  { %2160 = vmatmul.mubr.bf16.vlgmr.msra.gmra.mxu1 %v11746_v60  ;;  %2169 = vmatpush1.bf16.msra.mxu0 %v9032_v13  ;;  %v633_v13 = vld [vmem:[#allocation7 + $0x7b8] sm:$0xff] }
 0x1b8   :  { %2200 = vmatprep.mubr.bf16.mxu0 %v11740_v57  ;;  %2210 = vmatpush1.bf16.msra.mxu1 %v9160_v16  ;;  %v9137_v57 = vcombine.high %v549_v26, %v553_v28  ;;  %v493_v16 = vld [vmem:[#allocation7 + $0x358] sm:$0xff]  ;;  %v9217_v22 = vcombine.high %v629_v12, %v633_v13 }
 0x1b9   :  { %2241 = vmatprep.mubr.bf16.mxu1 %v11742_v58  ;;  %2170 = vmatprep.subr.bf16.mxu0 %v9025_v19  ;;  %v9136_v58 = vcombine.low %v549_v26, %v553_v28  ;;  %v9089_v19 = vcombine.high %v501_v8, %v505_v9  ;;  %v9216_v26 = vcombine.low %v629_v12, %v633_v13  ;;  %v613_v28 = vld [vmem:[#allocation7 + $0x718] sm:$0xff]  ;;  %v10287_v9 = vld [vmem:[#allocation9 + $0x2a0] ss:$48 sps:$4 sm:$0xff]   ;;  %v10304_v12 = vld [vmem:[#allocation9 + $0x844] ss:$48 sps:$4 sm:$0xff]  }
 0x1ba   :  { %2211 = vmatprep.subr.bf16.mxu1 %v9153_v20  ;;  %v621_v20 = vld [vmem:[#allocation7 + $0x758] sm:$0xff]  ;;  %v9080_v31 = vcombine.low %v493_v16, %v497_v17  ;;  %v10290_v13 = vld [vmem:[#allocation9 + $0x240] ss:$48 sps:$4 sm:$0xff]  }
 0x1bb   :  { %2171 = vmatpush1.bf16.msra.mxu0 %v9024_v21  ;;  %v625_v21 = vld [vmem:[#allocation7 + $0x778] sm:$0xff] }
 0x1bc   :  { %2212 = vmatpush1.bf16.msra.mxu1 %v9152_v24  ;;  %2172 = vmatprep.subr.bf16.mxu0 %v9017_v25  ;;  %v485_v24 = vld [vmem:[#allocation7 + $0x318] sm:$0xff]  ;;  %v9209_v30 = vcombine.high %v621_v20, %v625_v21  ;;  %v9208_v34 = vcombine.low %v621_v20, %v625_v21  ;;  %v10293_v21 = vld [vmem:[#allocation9 + $0x1e0] ss:$48 sps:$4 sm:$0xff]  }
 0x1bd   :  { %2213 = vmatprep.subr.bf16.mxu1 %v9145_v27  ;;  %v489_v25 = vld [vmem:[#allocation7 + $0x338] sm:$0xff]  ;;  %v9081_v27 = vcombine.high %v493_v16, %v497_v17  ;;  %v10295_v16 = vld [vmem:[#allocation9 + $0x1e4] ss:$48 sps:$4 sm:$0xff]  }
 0x1bf   :  { %2173 = vmatpush1.bf16.msra.mxu0 %v9016_v29  ;;  %v617_v29 = vld [vmem:[#allocation7 + $0x738] sm:$0xff] }
 0x1c0   :  { %2214 = vmatpush1.bf16.msra.mxu1 %v9144_v32  ;;  %2174 = vmatprep.subr.bf16.mxu0 %v9009_v33  ;;  %v477_v32 = vld [vmem:[#allocation7 + $0x2d8] sm:$0xff]  ;;  %v9200_v40 = vcombine.low %v613_v28, %v617_v29 }
 0x1c1   :  { %2215 = vmatprep.subr.bf16.mxu1 %v9137_v57  ;;  %v481_v33 = vld [vmem:[#allocation7 + $0x2f8] sm:$0xff]  ;;  %v9073_v57 = vcombine.high %v485_v24, %v489_v25 }
 0x1c2   :  { %v9065_v41 = vcombine.high %v477_v32, %v481_v33  ;;  %v9064_v45 = vcombine.low %v477_v32, %v481_v33  ;;  %v10314_v32 = vld [vmem:[#allocation9 + $0x780] ss:$48 sps:$4 sm:$0xff]   ;;  %v10322_v33 = vld [vmem:[#allocation9 + $0x724] ss:$48 sps:$4 sm:$0xff]  }
 0x1c3   :  { %2175 = vmatpush1.bf16.msra.mxu0 %v9008_v36  ;;  %v609_v36 = vld [vmem:[#allocation7 + $0x6f8] sm:$0xff] }
 0x1c4   :  { %2216 = vmatpush1.bf16.msra.mxu1 %v9136_v58  ;;  %2176 = vmatprep.subr.bf16.mxu0 %v9001_v37  ;;  %v9201_v58 = vcombine.high %v613_v28, %v617_v29  ;;  %v9072_v37 = vcombine.low %v485_v24, %v489_v25  ;;  %v9193_v44 = vcombine.high %v605_v35, %v609_v36 }
 0x1c5   :  { %2217 = vmatprep.subr.bf16.mxu1 %v9129_v39  ;;  %v473_v39 = vld [vmem:[#allocation7 + $0x2b8] sm:$0xff]  ;;  %v9192_v48 = vcombine.low %v605_v35, %v609_v36  ;;  %v10320_v35 = vld [vmem:[#allocation9 + $0x720] ss:$48 sps:$4 sm:$0xff]   ;;  %v10328_v36 = vld [vmem:[#allocation9 + $0x6c4] ss:$48 sps:$4 sm:$0xff]  }
 0x1c6   :  { %v9057_v49 = vcombine.high %v469_v38, %v473_v39  ;;  %v9056_v53 = vcombine.low %v469_v38, %v473_v39  ;;  %v10326_v38 = vld [vmem:[#allocation9 + $0x6c0] ss:$48 sps:$4 sm:$0xff]   ;;  %v10334_v39 = vld [vmem:[#allocation9 + $0x664] ss:$48 sps:$4 sm:$0xff]  }
 0x1c7   :  { %2177 = vmatpush1.bf16.msra.mxu0 %v9000_v43  ;;  %v601_v43 = vld [vmem:[#allocation7 + $0x6b8] sm:$0xff] }
 0x1c8   :  { %2218 = vmatpush1.bf16.msra.mxu1 %v9128_v46  ;;  %2178 = vmatprep.subr.bf16.mxu0 %v8993_v47  ;;  %v461_v46 = vld [vmem:[#allocation7 + $0x258] sm:$0xff]  ;;  %v9185_v52 = vcombine.high %v597_v42, %v601_v43  ;;  %v9184_v56 = vcombine.low %v597_v42, %v601_v43  ;;  %v10332_v42 = vld [vmem:[#allocation9 + $0x660] ss:$48 sps:$4 sm:$0xff]   ;;  %v10340_v43 = vld [vmem:[#allocation9 + $0x604] ss:$48 sps:$4 sm:$0xff]  }
 0x1c9   :  { %2219 = vmatprep.subr.bf16.mxu1 %v9121_v50  ;;  %v465_v47 = vld [vmem:[#allocation7 + $0x278] sm:$0xff] }
 0x1ca   :  { %v589_v50 = vld [vmem:[#allocation7 + $0x658] sm:$0xff]  ;;  %v9049_v61 = vcombine.high %v461_v46, %v465_v47  ;;  %v9048_v1 = vcombine.low %v461_v46, %v465_v47  ;;  %v10338_v46 = vld [vmem:[#allocation9 + $0x600] ss:$48 sps:$4 sm:$0xff]   ;;  %v10346_v47 = vld [vmem:[#allocation9 + $0xba4] ss:$48 sps:$4 sm:$0xff]  }
 0x1cb   :  { %2179 = vmatpush1.bf16.msra.mxu0 %v8992_v51  ;;  %v593_v51 = vld [vmem:[#allocation7 + $0x678] sm:$0xff] }
 0x1cc   :  { %2220 = vmatpush1.bf16.msra.mxu1 %v9120_v54  ;;  %2180 = vmatprep.subr.bf16.mxu0 %v8985_v55  ;;  %v453_v54 = vld [vmem:[#allocation7 + $0x218] sm:$0xff]  ;;  %v9177_v0 = vcombine.high %v589_v50, %v593_v51 }
 0x1cd   :  { %2221 = vmatprep.subr.bf16.mxu1 %v9113_v62  ;;  %v457_v55 = vld [vmem:[#allocation7 + $0x238] sm:$0xff] }
 0x1ce   :  { %v581_v62 = vld [vmem:[#allocation7 + $0x618] sm:$0xff] }
 0x1cf   :  { %2181 = vmatpush1.bf16.msra.mxu0 %v8984_v63  ;;  %v585_v63 = vld [vmem:[#allocation7 + $0x638] sm:$0xff] }
 0x1d0   :  { %2222 = vmatpush1.bf16.msra.mxu1 %v9112_v2  ;;  %2182 = vmatprep.subr.bf16.mxu0 %v8977_v3  ;;  %v9176_v2 = vcombine.low %v589_v50, %v593_v51  ;;  %v9041_v3 = vcombine.high %v453_v54, %v457_v55  ;;  %v9169_v4 = vcombine.high %v581_v62, %v585_v63  ;;  %v10344_v50 = vld [vmem:[#allocation9 + $0xba0] ss:$48 sps:$4 sm:$0xff]   ;;  %v10352_v51 = vld [vmem:[#allocation9 + $0xb44] ss:$48 sps:$4 sm:$0xff]  }
 0x1d1   :  { %2223 = vmatprep.subr.bf16.mxu1 %v9105_v6  ;;  %v9040_v6 = vcombine.low %v453_v54, %v457_v55  ;;  %v9168_v8 = vcombine.low %v581_v62, %v585_v63  ;;  %v10350_v54 = vld [vmem:[#allocation9 + $0xb40] ss:$48 sps:$4 sm:$0xff]   ;;  %v10358_v55 = vld [vmem:[#allocation9 + $0xae4] ss:$48 sps:$4 sm:$0xff]  }
 0x1d2   :  { %v10356_v62 = vld [vmem:[#allocation9 + $0xae0] ss:$48 sps:$4 sm:$0xff]   ;;  %v10364_v63 = vld [vmem:[#allocation9 + $0xa84] ss:$48 sps:$4 sm:$0xff]  }
 0x1d3   :  { %2183 = vmatpush1.bf16.msra.mxu0 %v8976_v7  ;;  %v10298_v7 = vld [vmem:[#allocation9 + $0x8a4] ss:$48 sps:$4 sm:$0xff]  }
 0x1d4   :  { %2224 = vmatpush1.bf16.msra.mxu1 %v9104_v10  ;;  %2184 = vmatprep.subr.bf16.mxu0 %v9097_v11  ;;  %v10292_v10 = vld [vmem:[#allocation9 + $0x244] ss:$48 sps:$4 sm:$0xff]   ;;  %v10296_v11 = vld [vmem:[#allocation9 + $0x8a0] ss:$48 sps:$4 sm:$0xff]  }
 0x1d5   :  { %2225 = vmatprep.subr.bf16.mxu1 %v9225_v14 }
 0x1d7   :  { %2185 = vmatpush2.bf16.msra.mxu0 %v9096_v15 }
 0x1d8   :  { %2226 = vmatpush2.bf16.msra.mxu1 %v9224_v18  ;;  %2186 = vmatprep.subr.bf16.mxu0 %v9089_v19  ;;  %v10302_v19 = vld [vmem:[#allocation9 + $0x840] ss:$48 sps:$4 sm:$0xff]  }
 0x1d9   :  { %2227 = vmatprep.subr.bf16.mxu1 %v9217_v22  ;;  %v10310_v22 = vld [vmem:[#allocation9 + $0x7e4] ss:$48 sps:$4 sm:$0xff]  }
 0x1db   :  { %2187 = vmatpush2.bf16.msra.mxu0 %v9088_v23 }
 0x1dc   :  { %2228 = vmatpush2.bf16.msra.mxu1 %v9216_v26  ;;  %2188 = vmatprep.subr.bf16.mxu0 %v9081_v27  ;;  %v10308_v26 = vld [vmem:[#allocation9 + $0x7e0] ss:$48 sps:$4 sm:$0xff]  }
 0x1dd   :  { %2229 = vmatprep.subr.bf16.mxu1 %v9209_v30  ;;  %v10299_v30 = vld [vmem:[#allocation9 + $0x180] ss:$48 sps:$4 sm:$0xff]  }
 0x1df   :  { %2189 = vmatpush2.bf16.msra.mxu0 %v9080_v31  ;;  %v10307_v31 = vld [vmem:[#allocation9 + $0x124] ss:$48 sps:$4 sm:$0xff]  }
 0x1e0   :  { %2230 = vmatpush2.bf16.msra.mxu1 %v9208_v34  ;;  %2190 = vmatprep.subr.bf16.mxu0 %v9073_v57  ;;  %v10305_v34 = vld [vmem:[#allocation9 + $0x120] ss:$48 sps:$4 sm:$0xff]   ;;  %v10313_v57 = vld [vmem:[#allocation9 + $0xc4] ss:$48 sps:$4 sm:$0xff]  }
 0x1e1   :  { %2231 = vmatprep.subr.bf16.mxu1 %v9201_v58  ;;  %v10311_v58 = vld [vmem:[#allocation9 + $0xc0] ss:$48 sps:$4 sm:$0xff]  }
 0x1e3   :  { %2191 = vmatpush2.bf16.msra.mxu0 %v9072_v37  ;;  %v10319_v37 = vld [vmem:[#allocation9 + $0x64] ss:$48 sps:$4 sm:$0xff]  }
 0x1e4   :  { %2232 = vmatpush2.bf16.msra.mxu1 %v9200_v40  ;;  %2192 = vmatprep.subr.bf16.mxu0 %v9065_v41  ;;  %v10317_v40 = vld [vmem:[#allocation9 + $0x60] ss:$48 sps:$4 sm:$0xff]   ;;  %v10325_v41 = vld [vmem:[#allocation9 + $0x4] ss:$48 sps:$4 sm:$0xff]  }
 0x1e5   :  { %2233 = vmatprep.subr.bf16.mxu1 %v9193_v44  ;;  %v10323_v44 = vld [vmem:[#allocation9] ss:$48 sps:$4 sm:$0xff]  }
 0x1e7   :  { %2193 = vmatpush2.bf16.msra.mxu0 %v9064_v45  ;;  %v10331_v45 = vld [vmem:[#allocation9 + $0x5a4] ss:$48 sps:$4 sm:$0xff]  }
 0x1e8   :  { %2234 = vmatpush2.bf16.msra.mxu1 %v9192_v48  ;;  %2194 = vmatprep.subr.bf16.mxu0 %v9057_v49  ;;  %v10329_v48 = vld [vmem:[#allocation9 + $0x5a0] ss:$48 sps:$4 sm:$0xff]   ;;  %v10337_v49 = vld [vmem:[#allocation9 + $0x544] ss:$48 sps:$4 sm:$0xff]  }
 0x1e9   :  { %2235 = vmatprep.subr.bf16.mxu1 %v9185_v52  ;;  %v10335_v52 = vld [vmem:[#allocation9 + $0x540] ss:$48 sps:$4 sm:$0xff]  }
 0x1eb   :  { %2195 = vmatpush2.bf16.msra.mxu0 %v9056_v53  ;;  %v10343_v53 = vld [vmem:[#allocation9 + $0x4e4] ss:$48 sps:$4 sm:$0xff]  }
 0x1ec   :  { %2236 = vmatpush2.bf16.msra.mxu1 %v9184_v56  ;;  %2196 = vmatprep.subr.bf16.mxu0 %v9049_v61  ;;  %v10341_v56 = vld [vmem:[#allocation9 + $0x4e0] ss:$48 sps:$4 sm:$0xff]   ;;  %v10349_v61 = vld [vmem:[#allocation9 + $0x484] ss:$48 sps:$4 sm:$0xff]  }
 0x1ed   :  { %2237 = vmatprep.subr.bf16.mxu1 %v9177_v0  ;;  %v10347_v0 = vld [vmem:[#allocation9 + $0x480] ss:$48 sps:$4 sm:$0xff]  }
 0x1ef   :  { %2197 = vmatpush2.bf16.msra.mxu0 %v9048_v1  ;;  %v10355_v1 = vld [vmem:[#allocation9 + $0x424] ss:$48 sps:$4 sm:$0xff]  }
 0x1f0   :  { %2238 = vmatpush2.bf16.msra.mxu1 %v9176_v2  ;;  %2198 = vmatprep.subr.bf16.mxu0 %v9041_v3  ;;  %v10362_v2 = vld [vmem:[#allocation9 + $0xa80] ss:$48 sps:$4 sm:$0xff]   ;;  %v10370_v3 = vld [vmem:[#allocation9 + $0xa24] ss:$48 sps:$4 sm:$0xff]  }
 0x1f1   :  { %2239 = vmatprep.subr.bf16.mxu1 %v9169_v4  ;;  %v10353_v4 = vld [vmem:[#allocation9 + $0x420] ss:$48 sps:$4 sm:$0xff]  }
 0x1f3   :  { %2199 = vmatpush2.bf16.msra.mxu0 %v9040_v6  ;;  %v10368_v6 = vld [vmem:[#allocation9 + $0xa20] ss:$48 sps:$4 sm:$0xff]  }
 0x1f4   :  { %2240 = vmatpush2.bf16.msra.mxu1 %v9168_v8  ;;  %6874 = vmatprep.subr.bf16.mxu0 %v10289_v5  ;;  %v10361_v5 = vld [vmem:[#allocation9 + $0x3c4] ss:$48 sps:$4 sm:$0xff]   ;;  %v10359_v8 = vld [vmem:[#allocation9 + $0x3c0] ss:$48 sps:$4 sm:$0xff]  }
 0x1f5   :  { %6915 = vmatprep.subr.bf16.mxu1 %v10298_v7  ;;  %v10376_v7 = vld [vmem:[#allocation9 + $0x9c4] ss:$48 sps:$4 sm:$0xff]  }
 0x1f6   :  { %2201 = vmatmul.mubr.bf16.vlgmr.msra.gmra.mxu0 %v11744_v59  ;;  %v11763_v14 = vpop.f32.mrf.mxu0  ;;  %v11765_v15 = vpop.f32.mrf.mxu1  ;;  %v10301_v59 = vld [vmem:[#allocation9 + $0x184] ss:$48 sps:$4 sm:$0xff]  }
 0x1f7   :  { %2242 = vmatmul.mubr.bf16.vlgmr.msra.gmra.mxu1 %v11746_v60  ;;  %6875 = vmatpush1.bf16.msra.mxu0 %v10287_v9  ;;  %v10316_v60 = vld [vmem:[#allocation9 + $0x784] ss:$48 sps:$4 sm:$0xff]  }
 0x1f8   :  { %v1958_v17 = vpop.f32.mrf.mxu0  ;;  %v1999_v18 = vpop.f32.mrf.mxu1  ;;  %6876 = vmatprep.subr.bf16.mxu0 %v10292_v10  ;;  %6916 = vmatpush1.bf16.msra.mxu1 %v10296_v11  ;;  %v10367_v9 = vld [vmem:[#allocation9 + $0x364] ss:$48 sps:$4 sm:$0xff]   ;;  %v10374_v10 = vld [vmem:[#allocation9 + $0x9c0] ss:$48 sps:$4 sm:$0xff]  }
 0x1f9   :  { %v2000_v20 = vadd.f32 %v1999_v18, %v1958_v17  ;;  %6917 = vmatprep.subr.bf16.mxu1 %v10304_v12  ;;  %v10379_v11 = vld [vmem:[#allocation9 + $0x964] ss:$48 sps:$4 sm:$0xff]   ;;  %v10365_v12 = vld [vmem:[#allocation9 + $0x360] ss:$48 sps:$4 sm:$0xff]  }
 0x1fa   :  { %v1960_v23 = vpop.f32.mrf.mxu0  ;;  %v2001_v24 = vpop.f32.mrf.mxu1  ;;  %v10377_v17 = vld [vmem:[#allocation9 + $0x960] ss:$48 sps:$4 sm:$0xff]   ;;  %v10382_v18 = vld [vmem:[#allocation9 + $0x904] ss:$48 sps:$4 sm:$0xff]  }
 0x1fb   :  { %v2251_v25 = vmax.f32 %v2000_v20, 0.0  ;;  %6877 = vmatpush1.bf16.msra.mxu0 %v10290_v13  ;;  %v1998_v13 = vadd.f32 %v11765_v15, %v11763_v14  ;;  %v10433_v23 = vld [vmem:[#allocation9 + $0x14a4] ss:$48 sps:$4 sm:$0xff]   ;;  %v10383_v24 = vld [vmem:[#allocation9 + $0xea0] ss:$48 sps:$4 sm:$0xff]  }
 0x1fc   :  { %v1961_v27 = vpop.f32.mrf.mxu0  ;;  %v2002_v28 = vpop.f32.mrf.mxu1  ;;  %6878 = vmatprep.subr.bf16.mxu0 %v10295_v16  ;;  %6918 = vmatpush1.bf16.msra.mxu1 %v10302_v19  ;;  %v10373_v16 = vld [vmem:[#allocation9 + $0x304] ss:$48 sps:$4 sm:$0xff]   ;;  %v10371_v19 = vld [vmem:[#allocation9 + $0x300] ss:$48 sps:$4 sm:$0xff]  }
 0x1fd   :  { %v11768_v29 = vpack.c.bf16 %v2251_v25, %v2251_v25  ;;  %6919 = vmatprep.subr.bf16.mxu1 %v10310_v22  ;;  %v2250_v20 = vmax.f32 %v1998_v13, 0.0  ;;  %v10385_v22 = vld [vmem:[#allocation9 + $0xea4] ss:$48 sps:$4 sm:$0xff]   ;;  %v10386_v27 = vld [vmem:[#allocation9 + $0xe40] ss:$48 sps:$4 sm:$0xff]  }
 0x1fe   :  { %v10388_v14 = vld [vmem:[#allocation9 + $0xe44] ss:$48 sps:$4 sm:$0xff]  }
 0x1ff   :  { %6879 = vmatpush1.bf16.msra.mxu0 %v10293_v21  ;;  %6906 = vmatprep.mubr.bf16.mxu0 %v11768_v29  ;;  %v10380_v21 = vld [vmem:[#allocation9 + $0x900] ss:$48 sps:$4 sm:$0xff]   ;;  %v10487_v13 = vld [vmem:[#allocation9 + $0x1744] ss:$48 sps:$4 sm:$0xff]  }
 0x200   :  { %6880 = vmatprep.subr.bf16.mxu0 %v10301_v59  ;;  %6920 = vmatpush1.bf16.msra.mxu1 %v10308_v26  ;;  %v11773_v59 = vpack.c.bf16 %v2250_v20, %v2250_v20  ;;  %v10419_v20 = vld [vmem:[#allocation9 + $0x1020] ss:$48 sps:$4 sm:$0xff]  }
 0x201   :  { %6921 = vmatprep.subr.bf16.mxu1 %v10316_v60 }
 0x203   :  { %6881 = vmatpush1.bf16.msra.mxu0 %v10299_v30  ;;  %v10391_v30 = vld [vmem:[#allocation9 + $0xde4] ss:$48 sps:$4 sm:$0xff]  }
 0x204   :  { %6882 = vmatprep.subr.bf16.mxu0 %v10307_v31  ;;  %6922 = vmatpush1.bf16.msra.mxu1 %v10314_v32 }
 0x205   :  { %6923 = vmatprep.subr.bf16.mxu1 %v10322_v33 }
 0x207   :  { %6883 = vmatpush1.bf16.msra.mxu0 %v10305_v34 }
 0x208   :  { %6884 = vmatprep.subr.bf16.mxu0 %v10313_v57  ;;  %6924 = vmatpush1.bf16.msra.mxu1 %v10320_v35  ;;  %v10389_v35 = vld [vmem:[#allocation9 + $0xde0] ss:$48 sps:$4 sm:$0xff]  }
 0x209   :  { %6925 = vmatprep.subr.bf16.mxu1 %v10328_v36 }
 0x20b   :  { %6885 = vmatpush1.bf16.msra.mxu0 %v10311_v58 }
 0x20c   :  { %6886 = vmatprep.subr.bf16.mxu0 %v10319_v37  ;;  %6926 = vmatpush1.bf16.msra.mxu1 %v10326_v38  ;;  %v10394_v37 = vld [vmem:[#allocation9 + $0xd84] ss:$48 sps:$4 sm:$0xff]  }
 0x20d   :  { %6927 = vmatprep.subr.bf16.mxu1 %v10334_v39  ;;  %v10431_v39 = vld [vmem:[#allocation9 + $0x14a0] ss:$48 sps:$4 sm:$0xff]  }
 0x20f   :  { %6887 = vmatpush1.bf16.msra.mxu0 %v10317_v40 }
 0x210   :  { %6888 = vmatprep.subr.bf16.mxu0 %v10325_v41  ;;  %6928 = vmatpush1.bf16.msra.mxu1 %v10332_v42  ;;  %v10439_v41 = vld [vmem:[#allocation9 + $0x1444] ss:$48 sps:$4 sm:$0xff]   ;;  %v10392_v42 = vld [vmem:[#allocation9 + $0xd80] ss:$48 sps:$4 sm:$0xff]  }
 0x211   :  { %6929 = vmatprep.subr.bf16.mxu1 %v10340_v43  ;;  %v10397_v43 = vld [vmem:[#allocation9 + $0xd24] ss:$48 sps:$4 sm:$0xff]  }
 0x213   :  { %6889 = vmatpush1.bf16.msra.mxu0 %v10323_v44  ;;  %v10437_v44 = vld [vmem:[#allocation9 + $0x1440] ss:$48 sps:$4 sm:$0xff]  }
 0x214   :  { %6890 = vmatprep.subr.bf16.mxu0 %v10331_v45  ;;  %6930 = vmatpush1.bf16.msra.mxu1 %v10338_v46  ;;  %v10445_v45 = vld [vmem:[#allocation9 + $0x13e4] ss:$48 sps:$4 sm:$0xff]   ;;  %v10395_v46 = vld [vmem:[#allocation9 + $0xd20] ss:$48 sps:$4 sm:$0xff]  }
 0x215   :  { %6931 = vmatprep.subr.bf16.mxu1 %v10346_v47  ;;  %v10400_v47 = vld [vmem:[#allocation9 + $0xcc4] ss:$48 sps:$4 sm:$0xff]  }
 0x217   :  { %6891 = vmatpush2.bf16.msra.mxu0 %v10329_v48  ;;  %v10443_v48 = vld [vmem:[#allocation9 + $0x13e0] ss:$48 sps:$4 sm:$0xff]  }
 0x218   :  { %6892 = vmatprep.subr.bf16.mxu0 %v10337_v49  ;;  %6932 = vmatpush2.bf16.msra.mxu1 %v10344_v50  ;;  %v10451_v49 = vld [vmem:[#allocation9 + $0x1384] ss:$48 sps:$4 sm:$0xff]   ;;  %v10398_v50 = vld [vmem:[#allocation9 + $0xcc0] ss:$48 sps:$4 sm:$0xff]  }
 0x219   :  { %6933 = vmatprep.subr.bf16.mxu1 %v10352_v51  ;;  %v10403_v51 = vld [vmem:[#allocation9 + $0xc64] ss:$48 sps:$4 sm:$0xff]  }
 0x21b   :  { %6893 = vmatpush2.bf16.msra.mxu0 %v10335_v52  ;;  %v10449_v52 = vld [vmem:[#allocation9 + $0x1380] ss:$48 sps:$4 sm:$0xff]  }
 0x21c   :  { %6894 = vmatprep.subr.bf16.mxu0 %v10343_v53  ;;  %6934 = vmatpush2.bf16.msra.mxu1 %v10350_v54  ;;  %v10457_v53 = vld [vmem:[#allocation9 + $0x1324] ss:$48 sps:$4 sm:$0xff]   ;;  %v10401_v54 = vld [vmem:[#allocation9 + $0xc60] ss:$48 sps:$4 sm:$0xff]  }
 0x21d   :  { %6935 = vmatprep.subr.bf16.mxu1 %v10358_v55  ;;  %v10406_v55 = vld [vmem:[#allocation9 + $0xc04] ss:$48 sps:$4 sm:$0xff]  }
 0x21f   :  { %6895 = vmatpush2.bf16.msra.mxu0 %v10341_v56  ;;  %v10455_v56 = vld [vmem:[#allocation9 + $0x1320] ss:$48 sps:$4 sm:$0xff]  }
 0x220   :  { %6896 = vmatprep.subr.bf16.mxu0 %v10349_v61  ;;  %6936 = vmatpush2.bf16.msra.mxu1 %v10356_v62  ;;  %v10463_v61 = vld [vmem:[#allocation9 + $0x12c4] ss:$48 sps:$4 sm:$0xff]   ;;  %v10404_v62 = vld [vmem:[#allocation9 + $0xc00] ss:$48 sps:$4 sm:$0xff]  }
 0x221   :  { %6937 = vmatprep.subr.bf16.mxu1 %v10364_v63  ;;  %v10409_v63 = vld [vmem:[#allocation9 + $0x11a4] ss:$48 sps:$4 sm:$0xff]  }
 0x223   :  { %6897 = vmatpush2.bf16.msra.mxu0 %v10347_v0  ;;  %v10461_v0 = vld [vmem:[#allocation9 + $0x12c0] ss:$48 sps:$4 sm:$0xff]  }
 0x224   :  { %6898 = vmatprep.subr.bf16.mxu0 %v10355_v1  ;;  %6938 = vmatpush2.bf16.msra.mxu1 %v10362_v2  ;;  %v10469_v1 = vld [vmem:[#allocation9 + $0x1264] ss:$48 sps:$4 sm:$0xff]   ;;  %v10407_v2 = vld [vmem:[#allocation9 + $0x11a0] ss:$48 sps:$4 sm:$0xff]  }
 0x225   :  { %6939 = vmatprep.subr.bf16.mxu1 %v10370_v3  ;;  %v10412_v3 = vld [vmem:[#allocation9 + $0x1144] ss:$48 sps:$4 sm:$0xff]  }
 0x227   :  { %6899 = vmatpush2.bf16.msra.mxu0 %v10353_v4  ;;  %v10467_v4 = vld [vmem:[#allocation9 + $0x1260] ss:$48 sps:$4 sm:$0xff]  }
 0x228   :  { %6900 = vmatprep.subr.bf16.mxu0 %v10361_v5  ;;  %6940 = vmatpush2.bf16.msra.mxu1 %v10368_v6  ;;  %v10475_v5 = vld [vmem:[#allocation9 + $0x1204] ss:$48 sps:$4 sm:$0xff]   ;;  %v10410_v6 = vld [vmem:[#allocation9 + $0x1140] ss:$48 sps:$4 sm:$0xff]  }
 0x229   :  { %6941 = vmatprep.subr.bf16.mxu1 %v10376_v7  ;;  %v10415_v7 = vld [vmem:[#allocation9 + $0x10e4] ss:$48 sps:$4 sm:$0xff]  }
 0x22b   :  { %6901 = vmatpush2.bf16.msra.mxu0 %v10359_v8  ;;  %v10473_v8 = vld [vmem:[#allocation9 + $0x1200] ss:$48 sps:$4 sm:$0xff]  }
 0x22c   :  { %6902 = vmatprep.subr.bf16.mxu0 %v10367_v9  ;;  %6942 = vmatpush2.bf16.msra.mxu1 %v10374_v10  ;;  %v10481_v9 = vld [vmem:[#allocation9 + $0x17a4] ss:$48 sps:$4 sm:$0xff]   ;;  %v10413_v10 = vld [vmem:[#allocation9 + $0x10e0] ss:$48 sps:$4 sm:$0xff]  }
 0x22d   :  { %6943 = vmatprep.subr.bf16.mxu1 %v10379_v11  ;;  %v10418_v11 = vld [vmem:[#allocation9 + $0x1084] ss:$48 sps:$4 sm:$0xff]  }
 0x22f   :  { %6903 = vmatpush2.bf16.msra.mxu0 %v10365_v12  ;;  %v10479_v12 = vld [vmem:[#allocation9 + $0x17a0] ss:$48 sps:$4 sm:$0xff]  }
 0x230   :  { %6904 = vmatprep.subr.bf16.mxu0 %v10373_v16  ;;  %6944 = vmatpush2.bf16.msra.mxu1 %v10377_v17  ;;  %v10416_v16 = vld [vmem:[#allocation9 + $0x1080] ss:$48 sps:$4 sm:$0xff]   ;;  %v10421_v17 = vld [vmem:[#allocation9 + $0x1024] ss:$48 sps:$4 sm:$0xff]  }
 0x231   :  { %6945 = vmatprep.subr.bf16.mxu1 %v10382_v18  ;;  %v10485_v18 = vld [vmem:[#allocation9 + $0x1740] ss:$48 sps:$4 sm:$0xff]  }
 0x233   :  { %6905 = vmatpush2.bf16.msra.mxu0 %v10371_v19  ;;  %v10493_v19 = vld [vmem:[#allocation9 + $0x16e4] ss:$48 sps:$4 sm:$0xff]  }
 0x234   :  { %6946 = vmatpush2.bf16.msra.mxu1 %v10380_v21  ;;  %6956 = vmatprep.subr.bf16.mxu0 %v10385_v22  ;;  %v10424_v21 = vld [vmem:[#allocation9 + $0xfc4] ss:$48 sps:$4 sm:$0xff]   ;;  %v10491_v22 = vld [vmem:[#allocation9 + $0x16e0] ss:$48 sps:$4 sm:$0xff]  }
 0x235   :  { %6997 = vmatprep.subr.bf16.mxu1 %v10433_v23  ;;  %v10499_v23 = vld [vmem:[#allocation9 + $0x1684] ss:$48 sps:$4 sm:$0xff]  }
 0x236   :  { %v2038_v15 = vpop.f32.mrf.mxu0  ;;  %v2079_v25 = vpop.f32.mrf.mxu1  ;;  %6907 = vmatmul.mubr.bf16.vlgmr.msra.gmra.mxu0 %v11773_v59 }
 0x237   :  { %v2080_v26 = vadd.f32 %v2079_v25, %v2038_v15  ;;  %6957 = vmatpush1.bf16.msra.mxu0 %v10383_v24  ;;  %v10422_v24 = vld [vmem:[#allocation9 + $0xfc0] ss:$48 sps:$4 sm:$0xff]   ;;  %v10505_v25 = vld [vmem:[#allocation9 + $0x1624] ss:$48 sps:$4 sm:$0xff]  }
 0x238   :  { %v2040_v28 = vpop.f32.mrf.mxu0  ;;  %v2081_v60 = vpop.f32.mrf.mxu1  ;;  %6958 = vmatprep.subr.bf16.mxu0 %v10388_v14  ;;  %v10427_v14 = vld [vmem:[#allocation9 + $0xf64] ss:$48 sps:$4 sm:$0xff]   ;;  %v10497_v15 = vld [vmem:[#allocation9 + $0x1680] ss:$48 sps:$4 sm:$0xff]  }
 0x239   :  { %v2082_v31 = vadd.f32 %v2081_v60, %v2040_v28  ;;  %v2252_v32 = vmax.f32 %v2080_v26, 0.0  ;;  %v10425_v26 = vld [vmem:[#allocation9 + $0xf60] ss:$48 sps:$4 sm:$0xff]   ;;  %v10511_v60 = vld [vmem:[#allocation9 + $0x15c4] ss:$48 sps:$4 sm:$0xff]  }
 0x23a   :  { %v2042_v33 = vpop.f32.mrf.mxu0  ;;  %v2083_v34 = vpop.f32.mrf.mxu1  ;;  %v10503_v28 = vld [vmem:[#allocation9 + $0x1620] ss:$48 sps:$4 sm:$0xff]  }
 0x23b   :  { %v2253_v57 = vmax.f32 %v2082_v31, 0.0  ;;  %6959 = vmatpush1.bf16.msra.mxu0 %v10386_v27  ;;  %v11778_v40 = vpack.c.bf16 %v2252_v32, %v2252_v32  ;;  %v10430_v27 = vld [vmem:[#allocation9 + $0xf04] ss:$48 sps:$4 sm:$0xff]   ;;  %v10436_v31 = vld [vmem:[#allocation9 + $0x2ac] ss:$48 sps:$4 sm:$0xff]  }
 0x23c   :  { %v2043_v36 = vpop.f32.mrf.mxu0  ;;  %v2084_v58 = vpop.f32.mrf.mxu1  ;;  %6960 = vmatprep.subr.bf16.mxu0 %v10391_v30  ;;  %v10428_v30 = vld [vmem:[#allocation9 + $0xf00] ss:$48 sps:$4 sm:$0xff]   ;;  %v10517_v33 = vld [vmem:[#allocation9 + $0x1564] ss:$48 sps:$4 sm:$0xff]  }
 0x23d   :  { %v11776_v38 = vpack.c.bf16 %v2253_v57, %v2253_v57  ;;  %v10509_v32 = vld [vmem:[#allocation9 + $0x15c0] ss:$48 sps:$4 sm:$0xff]  }
 0x23e   :  { %v10515_v34 = vld [vmem:[#allocation9 + $0x1560] ss:$48 sps:$4 sm:$0xff]  }
 0x23f   :  { %6947 = vmatprep.mubr.bf16.mxu1 %v11776_v38  ;;  %6961 = vmatpush1.bf16.msra.mxu0 %v10389_v35  ;;  %v10523_v35 = vld [vmem:[#allocation9 + $0x1504] ss:$48 sps:$4 sm:$0xff]  }
 0x240   :  { %6948 = vmatmul.mubr.bf16.vlgmr.msra.gmra.mxu1 %v11778_v40  ;;  %6962 = vmatprep.subr.bf16.mxu0 %v10394_v37 }
 0x241   :  { %6998 = vmatpush1.bf16.msra.mxu1 %v10431_v39 }
 0x242   :  { %6999 = vmatprep.subr.bf16.mxu1 %v10439_v41  ;;  %v10521_v41 = vld [vmem:[#allocation9 + $0x1500] ss:$48 sps:$4 sm:$0xff]  }
 0x243   :  { %6963 = vmatpush1.bf16.msra.mxu0 %v10392_v42 }
 0x244   :  { %6964 = vmatprep.subr.bf16.mxu0 %v10397_v43 }
 0x245   :  { %7000 = vmatpush1.bf16.msra.mxu1 %v10437_v44  ;;  %v10529_v44 = vld [vmem:[#allocation9 + $0x8ac] ss:$48 sps:$4 sm:$0xff]  }
 0x246   :  { %7001 = vmatprep.subr.bf16.mxu1 %v10445_v45 }
 0x247   :  { %6965 = vmatpush1.bf16.msra.mxu0 %v10395_v46 }
 0x248   :  { %6966 = vmatprep.subr.bf16.mxu0 %v10400_v47 }
 0x249   :  { %7002 = vmatpush1.bf16.msra.mxu1 %v10443_v48 }
 0x24a   :  { %7003 = vmatprep.subr.bf16.mxu1 %v10451_v49 }
 0x24b   :  { %6967 = vmatpush1.bf16.msra.mxu0 %v10398_v50 }
 0x24c   :  { %6968 = vmatprep.subr.bf16.mxu0 %v10403_v51  ;;  %v10434_v51 = vld [vmem:[#allocation9 + $0x2a8] ss:$48 sps:$4 sm:$0xff]  }
 0x24d   :  { %7004 = vmatpush1.bf16.msra.mxu1 %v10449_v52 }
 0x24e   :  { %7005 = vmatprep.subr.bf16.mxu1 %v10457_v53  ;;  %v10442_v53 = vld [vmem:[#allocation9 + $0x24c] ss:$48 sps:$4 sm:$0xff]  }
 0x24f   :  { %6969 = vmatpush1.bf16.msra.mxu0 %v10401_v54  ;;  %v10440_v54 = vld [vmem:[#allocation9 + $0x248] ss:$48 sps:$4 sm:$0xff]  }
 0x250   :  { %6970 = vmatprep.subr.bf16.mxu0 %v10406_v55  ;;  %v10448_v55 = vld [vmem:[#allocation9 + $0x1ec] ss:$48 sps:$4 sm:$0xff]  }
 0x251   :  { %7006 = vmatpush1.bf16.msra.mxu1 %v10455_v56  ;;  %v10446_v56 = vld [vmem:[#allocation9 + $0x1e8] ss:$48 sps:$4 sm:$0xff]  }
 0x252   :  { %7007 = vmatprep.subr.bf16.mxu1 %v10463_v61  ;;  %v10454_v61 = vld [vmem:[#allocation9 + $0x18c] ss:$48 sps:$4 sm:$0xff]  }
 0x253   :  { %6971 = vmatpush1.bf16.msra.mxu0 %v10404_v62  ;;  %v10452_v62 = vld [vmem:[#allocation9 + $0x188] ss:$48 sps:$4 sm:$0xff]  }
 0x254   :  { %6972 = vmatprep.subr.bf16.mxu0 %v10409_v63  ;;  %v10460_v63 = vld [vmem:[#allocation9 + $0x12c] ss:$48 sps:$4 sm:$0xff]  }
 0x255   :  { %7008 = vmatpush1.bf16.msra.mxu1 %v10461_v0  ;;  %v10458_v0 = vld [vmem:[#allocation9 + $0x128] ss:$48 sps:$4 sm:$0xff]  }
 0x256   :  { %7009 = vmatprep.subr.bf16.mxu1 %v10469_v1  ;;  %v10466_v1 = vld [vmem:[#allocation9 + $0xcc] ss:$48 sps:$4 sm:$0xff]  }
 0x257   :  { %6973 = vmatpush2.bf16.msra.mxu0 %v10407_v2  ;;  %v10464_v2 = vld [vmem:[#allocation9 + $0xc8] ss:$48 sps:$4 sm:$0xff]  }
 0x258   :  { %6974 = vmatprep.subr.bf16.mxu0 %v10412_v3  ;;  %v10472_v3 = vld [vmem:[#allocation9 + $0x6c] ss:$48 sps:$4 sm:$0xff]  }
 0x259   :  { %7010 = vmatpush1.bf16.msra.mxu1 %v10467_v4  ;;  %v10470_v4 = vld [vmem:[#allocation9 + $0x68] ss:$48 sps:$4 sm:$0xff]  }
 0x25a   :  { %7011 = vmatprep.subr.bf16.mxu1 %v10475_v5  ;;  %v10478_v5 = vld [vmem:[#allocation9 + $0xc] ss:$48 sps:$4 sm:$0xff]  }
 0x25b   :  { %6975 = vmatpush2.bf16.msra.mxu0 %v10410_v6  ;;  %v10476_v6 = vld [vmem:[#allocation9 + $0x8] ss:$48 sps:$4 sm:$0xff]  }
 0x25c   :  { %6976 = vmatprep.subr.bf16.mxu0 %v10415_v7  ;;  %v10484_v7 = vld [vmem:[#allocation9 + $0x5ac] ss:$48 sps:$4 sm:$0xff]  }
 0x25d   :  { %7012 = vmatpush1.bf16.msra.mxu1 %v10473_v8  ;;  %v10482_v8 = vld [vmem:[#allocation9 + $0x5a8] ss:$48 sps:$4 sm:$0xff]  }
 0x25e   :  { %7013 = vmatprep.subr.bf16.mxu1 %v10481_v9  ;;  %v10490_v9 = vld [vmem:[#allocation9 + $0x54c] ss:$48 sps:$4 sm:$0xff]  }
 0x25f   :  { %6977 = vmatpush2.bf16.msra.mxu0 %v10413_v10  ;;  %v10488_v10 = vld [vmem:[#allocation9 + $0x548] ss:$48 sps:$4 sm:$0xff]  }
 0x260   :  { %6978 = vmatprep.subr.bf16.mxu0 %v10418_v11  ;;  %v10496_v11 = vld [vmem:[#allocation9 + $0x4ec] ss:$48 sps:$4 sm:$0xff]  }
 0x261   :  { %7014 = vmatpush2.bf16.msra.mxu1 %v10479_v12  ;;  %v10494_v12 = vld [vmem:[#allocation9 + $0x4e8] ss:$48 sps:$4 sm:$0xff]  }
 0x262   :  { %7015 = vmatprep.subr.bf16.mxu1 %v10487_v13  ;;  %v10502_v13 = vld [vmem:[#allocation9 + $0x48c] ss:$48 sps:$4 sm:$0xff]  }
 0x263   :  { %6979 = vmatpush2.bf16.msra.mxu0 %v10416_v16  ;;  %v10500_v16 = vld [vmem:[#allocation9 + $0x488] ss:$48 sps:$4 sm:$0xff]  }
 0x264   :  { %6980 = vmatprep.subr.bf16.mxu0 %v10421_v17  ;;  %v10508_v17 = vld [vmem:[#allocation9 + $0x42c] ss:$48 sps:$4 sm:$0xff]  }
 0x265   :  { %7016 = vmatpush2.bf16.msra.mxu1 %v10485_v18  ;;  %v10506_v18 = vld [vmem:[#allocation9 + $0x428] ss:$48 sps:$4 sm:$0xff]  }
 0x266   :  { %7017 = vmatprep.subr.bf16.mxu1 %v10493_v19  ;;  %v10514_v19 = vld [vmem:[#allocation9 + $0x3cc] ss:$48 sps:$4 sm:$0xff]  }
 0x267   :  { %6981 = vmatpush2.bf16.msra.mxu0 %v10419_v20  ;;  %v10512_v20 = vld [vmem:[#allocation9 + $0x3c8] ss:$48 sps:$4 sm:$0xff]  }
 0x268   :  { %6982 = vmatprep.subr.bf16.mxu0 %v10424_v21  ;;  %v10520_v21 = vld [vmem:[#allocation9 + $0x36c] ss:$48 sps:$4 sm:$0xff]  }
 0x269   :  { %7018 = vmatpush2.bf16.msra.mxu1 %v10491_v22 }
 0x26a   :  { %7019 = vmatprep.subr.bf16.mxu1 %v10499_v23  ;;  %v10518_v23 = vld [vmem:[#allocation9 + $0x368] ss:$48 sps:$4 sm:$0xff]  }
 0x26b   :  { %6983 = vmatpush2.bf16.msra.mxu0 %v10422_v24 }
 0x26c   :  { %6984 = vmatprep.subr.bf16.mxu0 %v10427_v14  ;;  %v10526_v14 = vld [vmem:[#allocation9 + $0x30c] ss:$48 sps:$4 sm:$0xff]  }
 0x26d   :  { %7020 = vmatpush2.bf16.msra.mxu1 %v10497_v15 }
 0x26e   :  { %7021 = vmatprep.subr.bf16.mxu1 %v10505_v25 }
 0x26f   :  { %6985 = vmatpush2.bf16.msra.mxu0 %v10425_v26 }
 0x270   :  { %6986 = vmatprep.subr.bf16.mxu0 %v10430_v27 }
 0x271   :  { %7022 = vmatpush2.bf16.msra.mxu1 %v10503_v28 }
 0x272   :  { %7023 = vmatprep.subr.bf16.mxu1 %v10511_v60  ;;  %v10524_v60 = vld [vmem:[#allocation9 + $0x308] ss:$48 sps:$4 sm:$0xff]  }
 0x273   :  { %6987 = vmatpush2.bf16.msra.mxu0 %v10428_v30 }
 0x274   :  { %7038 = vmatprep.subr.bf16.mxu0 %v10436_v31 }
 0x275   :  { %7024 = vmatpush2.bf16.msra.mxu1 %v10509_v32  ;;  %v10532_v32 = vld [vmem:[#allocation9 + $0xeac] ss:$48 sps:$4 sm:$0xff]  }
 0x276   :  { %v2120_v57 = vpop.f32.mrf.mxu0  ;;  %7025 = vmatprep.subr.bf16.mxu1 %v10517_v33 }
 0x277   :  { %v2161_v36 = vpop.f32.mrf.mxu1 }
 0x278   :  { %v2162_v58 = vadd.f32 %v2161_v36, %v2120_v57  ;;  %v2122_v37 = vpop.f32.mrf.mxu0  ;;  %v10527_v36 = vld [vmem:[#allocation9 + $0x8a8] ss:$48 sps:$4 sm:$0xff]  }
 0x279   :  { %v2163_v39 = vpop.f32.mrf.mxu1  ;;  %7026 = vmatpush2.bf16.msra.mxu1 %v10515_v34 }
 0x27a   :  { %v2164_v42 = vadd.f32 %v2163_v39, %v2122_v37  ;;  %v2124_v43 = vpop.f32.mrf.mxu0  ;;  %7027 = vmatprep.subr.bf16.mxu1 %v10523_v35  ;;  %v2254_v45 = vmax.f32 %v2162_v58, 0.0  ;;  %v10530_v58 = vld [vmem:[#allocation9 + $0xea8] ss:$48 sps:$4 sm:$0xff]   ;;  %v10535_v39 = vld [vmem:[#allocation9 + $0x84c] ss:$48 sps:$4 sm:$0xff]  }
 0x27b   :  { %v2165_v46 = vpop.f32.mrf.mxu1  ;;  %v10536_v43 = vld [vmem:[#allocation9 + $0xe48] ss:$48 sps:$4 sm:$0xff]  }
 0x27c   :  { %v2255_v47 = vmax.f32 %v2164_v42, 0.0  ;;  %v2125_v48 = vpop.f32.mrf.mxu0  ;;  %v11784_v52 = vpack.c.bf16 %v2254_v45, %v2254_v45  ;;  %v10533_v42 = vld [vmem:[#allocation9 + $0x848] ss:$48 sps:$4 sm:$0xff]   ;;  %v10544_v45 = vld [vmem:[#allocation9 + $0xdec] ss:$48 sps:$4 sm:$0xff]  }
 0x27d   :  { %v2166_v49 = vpop.f32.mrf.mxu1  ;;  %7028 = vmatpush2.bf16.msra.mxu1 %v10521_v41  ;;  %v10538_v41 = vld [vmem:[#allocation9 + $0xe4c] ss:$48 sps:$4 sm:$0xff]   ;;  %v10539_v46 = vld [vmem:[#allocation9 + $0x7e8] ss:$48 sps:$4 sm:$0xff]  }
 0x27e   :  { %v11782_v50 = vpack.c.bf16 %v2255_v47, %v2255_v47  ;;  %7079 = vmatprep.subr.bf16.mxu1 %v10529_v44  ;;  %v10541_v44 = vld [vmem:[#allocation9 + $0x7ec] ss:$48 sps:$4 sm:$0xff]   ;;  %v10542_v47 = vld [vmem:[#allocation9 + $0xde8] ss:$48 sps:$4 sm:$0xff]  }
 0x27f   :  { %v10547_v48 = vld [vmem:[#allocation9 + $0x78c] ss:$48 sps:$4 sm:$0xff]  }
 0x280   :  { %6988 = vmatprep.mubr.bf16.mxu0 %v11782_v50  ;;  %v10550_v49 = vld [vmem:[#allocation9 + $0xd8c] ss:$48 sps:$4 sm:$0xff]  }
 0x281   :  { %6989 = vmatmul.mubr.bf16.vlgmr.msra.gmra.mxu0 %v11784_v52 }
 0x282   :  { %7039 = vmatpush1.bf16.msra.mxu0 %v10434_v51  ;;  %7070 = vmatprep.mubr.bf16.mxu0 %v11768_v29  ;;  %v10545_v51 = vld [vmem:[#allocation9 + $0x788] ss:$48 sps:$4 sm:$0xff]  }
 0x283   :  { %7040 = vmatprep.subr.bf16.mxu0 %v10442_v53  ;;  %v10548_v53 = vld [vmem:[#allocation9 + $0xd88] ss:$48 sps:$4 sm:$0xff]  }
 0x286   :  { %7041 = vmatpush1.bf16.msra.mxu0 %v10440_v54  ;;  %v10553_v54 = vld [vmem:[#allocation9 + $0x72c] ss:$48 sps:$4 sm:$0xff]  }
 0x287   :  { %7042 = vmatprep.subr.bf16.mxu0 %v10448_v55  ;;  %v10556_v55 = vld [vmem:[#allocation9 + $0xd2c] ss:$48 sps:$4 sm:$0xff]  }
 0x28a   :  { %7043 = vmatpush1.bf16.msra.mxu0 %v10446_v56  ;;  %v10551_v56 = vld [vmem:[#allocation9 + $0x728] ss:$48 sps:$4 sm:$0xff]  }
 0x28b   :  { %7044 = vmatprep.subr.bf16.mxu0 %v10454_v61  ;;  %v10554_v61 = vld [vmem:[#allocation9 + $0xd28] ss:$48 sps:$4 sm:$0xff]  }
 0x28e   :  { %7045 = vmatpush1.bf16.msra.mxu0 %v10452_v62  ;;  %v10559_v62 = vld [vmem:[#allocation9 + $0x6cc] ss:$48 sps:$4 sm:$0xff]  }
 0x28f   :  { %7046 = vmatprep.subr.bf16.mxu0 %v10460_v63  ;;  %v10562_v63 = vld [vmem:[#allocation9 + $0xccc] ss:$48 sps:$4 sm:$0xff]  }
 0x292   :  { %7047 = vmatpush1.bf16.msra.mxu0 %v10458_v0  ;;  %v10557_v0 = vld [vmem:[#allocation9 + $0x6c8] ss:$48 sps:$4 sm:$0xff]  }
 0x293   :  { %7048 = vmatprep.subr.bf16.mxu0 %v10466_v1  ;;  %v10560_v1 = vld [vmem:[#allocation9 + $0xcc8] ss:$48 sps:$4 sm:$0xff]  }
 0x296   :  { %7049 = vmatpush1.bf16.msra.mxu0 %v10464_v2  ;;  %v10565_v2 = vld [vmem:[#allocation9 + $0x66c] ss:$48 sps:$4 sm:$0xff]  }
 0x297   :  { %7050 = vmatprep.subr.bf16.mxu0 %v10472_v3  ;;  %v10568_v3 = vld [vmem:[#allocation9 + $0xc6c] ss:$48 sps:$4 sm:$0xff]  }
 0x29a   :  { %7051 = vmatpush1.bf16.msra.mxu0 %v10470_v4  ;;  %v10563_v4 = vld [vmem:[#allocation9 + $0x668] ss:$48 sps:$4 sm:$0xff]  }
 0x29b   :  { %7052 = vmatprep.subr.bf16.mxu0 %v10478_v5  ;;  %v10566_v5 = vld [vmem:[#allocation9 + $0xc68] ss:$48 sps:$4 sm:$0xff]  }
 0x29e   :  { %7053 = vmatpush1.bf16.msra.mxu0 %v10476_v6  ;;  %v10571_v6 = vld [vmem:[#allocation9 + $0x60c] ss:$48 sps:$4 sm:$0xff]  }
 0x29f   :  { %7054 = vmatprep.subr.bf16.mxu0 %v10484_v7  ;;  %v10574_v7 = vld [vmem:[#allocation9 + $0xc0c] ss:$48 sps:$4 sm:$0xff]  }
 0x2a2   :  { %7055 = vmatpush2.bf16.msra.mxu0 %v10482_v8  ;;  %v10569_v8 = vld [vmem:[#allocation9 + $0x608] ss:$48 sps:$4 sm:$0xff]  }
 0x2a3   :  { %7056 = vmatprep.subr.bf16.mxu0 %v10490_v9  ;;  %v10572_v9 = vld [vmem:[#allocation9 + $0xc08] ss:$48 sps:$4 sm:$0xff]  }
 0x2a6   :  { %7057 = vmatpush2.bf16.msra.mxu0 %v10488_v10  ;;  %v10577_v10 = vld [vmem:[#allocation9 + $0xbac] ss:$48 sps:$4 sm:$0xff]  }
 0x2a7   :  { %7058 = vmatprep.subr.bf16.mxu0 %v10496_v11  ;;  %v10580_v11 = vld [vmem:[#allocation9 + $0x11ac] ss:$48 sps:$4 sm:$0xff]  }
 0x2aa   :  { %7059 = vmatpush2.bf16.msra.mxu0 %v10494_v12  ;;  %v10575_v12 = vld [vmem:[#allocation9 + $0xba8] ss:$48 sps:$4 sm:$0xff]  }
 0x2ab   :  { %7060 = vmatprep.subr.bf16.mxu0 %v10502_v13  ;;  %v10578_v13 = vld [vmem:[#allocation9 + $0x11a8] ss:$48 sps:$4 sm:$0xff]  }
 0x2ae   :  { %7061 = vmatpush2.bf16.msra.mxu0 %v10500_v16  ;;  %v10583_v16 = vld [vmem:[#allocation9 + $0xb4c] ss:$48 sps:$4 sm:$0xff]  }
 0x2af   :  { %7062 = vmatprep.subr.bf16.mxu0 %v10508_v17  ;;  %v10586_v17 = vld [vmem:[#allocation9 + $0x114c] ss:$48 sps:$4 sm:$0xff]  }
 0x2b2   :  { %7063 = vmatpush2.bf16.msra.mxu0 %v10506_v18  ;;  %v10581_v18 = vld [vmem:[#allocation9 + $0xb48] ss:$48 sps:$4 sm:$0xff]  }
 0x2b3   :  { %7064 = vmatprep.subr.bf16.mxu0 %v10514_v19  ;;  %v10584_v19 = vld [vmem:[#allocation9 + $0x1148] ss:$48 sps:$4 sm:$0xff]  }
 0x2b6   :  { %7065 = vmatpush2.bf16.msra.mxu0 %v10512_v20  ;;  %v2202_v22 = vpop.f32.mrf.mxu0  ;;  %v10589_v20 = vld [vmem:[#allocation9 + $0xaec] ss:$48 sps:$4 sm:$0xff]  }
 0x2b7   :  { %v2243_v24 = vpop.f32.mrf.mxu1  ;;  %7066 = vmatprep.subr.bf16.mxu0 %v10520_v21  ;;  %v10592_v21 = vld [vmem:[#allocation9 + $0x10ec] ss:$48 sps:$4 sm:$0xff]  }
 0x2b8   :  { %v2244_v15 = vadd.f32 %v2243_v24, %v2202_v22  ;;  %v2204_v25 = vpop.f32.mrf.mxu0  ;;  %v10587_v22 = vld [vmem:[#allocation9 + $0xae8] ss:$48 sps:$4 sm:$0xff]   ;;  %v10595_v24 = vld [vmem:[#allocation9 + $0xa8c] ss:$48 sps:$4 sm:$0xff]  }
 0x2b9   :  { %v2245_v26 = vpop.f32.mrf.mxu1 }
 0x2ba   :  { %v2246_v27 = vadd.f32 %v2245_v26, %v2204_v25  ;;  %7067 = vmatpush2.bf16.msra.mxu0 %v10518_v23  ;;  %v2206_v28 = vpop.f32.mrf.mxu0  ;;  %v2256_v30 = vmax.f32 %v2244_v15, 0.0  ;;  %v10590_v23 = vld [vmem:[#allocation9 + $0x10e8] ss:$48 sps:$4 sm:$0xff]   ;;  %v10601_v26 = vld [vmem:[#allocation9 + $0xa2c] ss:$48 sps:$4 sm:$0xff]  }
 0x2bb   :  { %v2247_v31 = vpop.f32.mrf.mxu1  ;;  %7068 = vmatprep.subr.bf16.mxu0 %v10526_v14  ;;  %v10598_v14 = vld [vmem:[#allocation9 + $0x108c] ss:$48 sps:$4 sm:$0xff]   ;;  %v10593_v15 = vld [vmem:[#allocation9 + $0xa88] ss:$48 sps:$4 sm:$0xff]  }
 0x2bc   :  { %v2257_v33 = vmax.f32 %v2246_v27, 0.0  ;;  %v2207_v34 = vpop.f32.mrf.mxu0  ;;  %v11791_v37 = vpack.c.bf16 %v2256_v30, %v2256_v30  ;;  %v10596_v25 = vld [vmem:[#allocation9 + $0x1088] ss:$48 sps:$4 sm:$0xff]   ;;  %v10604_v27 = vld [vmem:[#allocation9 + $0x102c] ss:$48 sps:$4 sm:$0xff]  }
 0x2bd   :  { %v2248_v57 = vpop.f32.mrf.mxu1  ;;  %v10599_v28 = vld [vmem:[#allocation9 + $0xa28] ss:$48 sps:$4 sm:$0xff]   ;;  %v10607_v30 = vld [vmem:[#allocation9 + $0x9cc] ss:$48 sps:$4 sm:$0xff]  }
 0x2be   :  { %v11789_v35 = vpack.c.bf16 %v2257_v33, %v2257_v33  ;;  %7069 = vmatpush2.bf16.msra.mxu0 %v10524_v60  ;;  %v10602_v60 = vld [vmem:[#allocation9 + $0x1028] ss:$48 sps:$4 sm:$0xff]   ;;  %v10610_v31 = vld [vmem:[#allocation9 + $0xfcc] ss:$48 sps:$4 sm:$0xff]  }
 0x2bf   :  { %7120 = vmatprep.subr.bf16.mxu0 %v10532_v32  ;;  %v10605_v32 = vld [vmem:[#allocation9 + $0x9c8] ss:$48 sps:$4 sm:$0xff]   ;;  %v10613_v34 = vld [vmem:[#allocation9 + $0x96c] ss:$48 sps:$4 sm:$0xff]  }
 0x2c0   :  { %7029 = vmatprep.mubr.bf16.mxu1 %v11789_v35  ;;  %v10608_v33 = vld [vmem:[#allocation9 + $0xfc8] ss:$48 sps:$4 sm:$0xff]   ;;  %v10616_v57 = vld [vmem:[#allocation9 + $0xf6c] ss:$48 sps:$4 sm:$0xff]  }
 0x2c1   :  { %7071 = vmatmul.mubr.bf16.vlgmr.msra.gmra.mxu0 %v11773_v59  ;;  %7030 = vmatmul.mubr.bf16.vlgmr.msra.gmra.mxu1 %v11791_v37 }
 0x2c2   :  { %7080 = vmatpush1.bf16.msra.mxu1 %v10527_v36  ;;  %7121 = vmatpush1.bf16.msra.mxu0 %v10530_v58  ;;  %v10611_v58 = vld [vmem:[#allocation9 + $0x968] ss:$48 sps:$4 sm:$0xff]  }
 0x2c3   :  { %7152 = vmatprep.mubr.bf16.mxu0 %v11782_v50  ;;  %7111 = vmatprep.mubr.bf16.mxu1 %v11776_v38 }
 0x2c4   :  { %7081 = vmatprep.subr.bf16.mxu1 %v10535_v39  ;;  %7122 = vmatprep.subr.bf16.mxu0 %v10538_v41  ;;  %v10614_v39 = vld [vmem:[#allocation9 + $0xf68] ss:$48 sps:$4 sm:$0xff]   ;;  %v10619_v41 = vld [vmem:[#allocation9 + $0x90c] ss:$48 sps:$4 sm:$0xff]  }
 0x2c6   :  { %7082 = vmatpush1.bf16.msra.mxu1 %v10533_v42  ;;  %7123 = vmatpush1.bf16.msra.mxu0 %v10536_v43  ;;  %v10622_v42 = vld [vmem:[#allocation9 + $0xf0c] ss:$48 sps:$4 sm:$0xff]  }
 0x2c7   :  { %7083 = vmatprep.subr.bf16.mxu1 %v10541_v44  ;;  %7124 = vmatprep.subr.bf16.mxu0 %v10544_v45  ;;  %v10617_v45 = vld [vmem:[#allocation9 + $0x908] ss:$48 sps:$4 sm:$0xff]  }
 0x2ca   :  { %7084 = vmatpush1.bf16.msra.mxu1 %v10539_v46  ;;  %7125 = vmatpush1.bf16.msra.mxu0 %v10542_v47  ;;  %v10620_v46 = vld [vmem:[#allocation9 + $0xf08] ss:$48 sps:$4 sm:$0xff]   ;;  %v10625_v47 = vld [vmem:[#allocation9 + $0x14ac] ss:$48 sps:$4 sm:$0xff]  }
 0x2cb   :  { %7085 = vmatprep.subr.bf16.mxu1 %v10547_v48  ;;  %7126 = vmatprep.subr.bf16.mxu0 %v10550_v49  ;;  %v10628_v48 = vld [vmem:[#allocation9 + $0x2b4] ss:$48 sps:$4 sm:$0xff]  }
 0x2ce   :  { %7086 = vmatpush1.bf16.msra.mxu1 %v10545_v51  ;;  %7127 = vmatpush1.bf16.msra.mxu0 %v10548_v53  ;;  %v10623_v51 = vld [vmem:[#allocation9 + $0x14a8] ss:$48 sps:$4 sm:$0xff]   ;;  %v10626_v53 = vld [vmem:[#allocation9 + $0x2b0] ss:$48 sps:$4 sm:$0xff]  }
 0x2cf   :  { %7087 = vmatprep.subr.bf16.mxu1 %v10553_v54  ;;  %7128 = vmatprep.subr.bf16.mxu0 %v10556_v55  ;;  %v10631_v55 = vld [vmem:[#allocation9 + $0x144c] ss:$48 sps:$4 sm:$0xff]  }
 0x2d2   :  { %7088 = vmatpush1.bf16.msra.mxu1 %v10551_v56  ;;  %7129 = vmatpush1.bf16.msra.mxu0 %v10554_v61  ;;  %v10634_v56 = vld [vmem:[#allocation9 + $0x254] ss:$48 sps:$4 sm:$0xff]  }
 0x2d3   :  { %7089 = vmatprep.subr.bf16.mxu1 %v10559_v62  ;;  %7130 = vmatprep.subr.bf16.mxu0 %v10562_v63  ;;  %v10629_v63 = vld [vmem:[#allocation9 + $0x1448] ss:$48 sps:$4 sm:$0xff]  }
 0x2d6   :  { %7090 = vmatpush1.bf16.msra.mxu1 %v10557_v0  ;;  %7131 = vmatpush1.bf16.msra.mxu0 %v10560_v1  ;;  %v10632_v1 = vld [vmem:[#allocation9 + $0x250] ss:$48 sps:$4 sm:$0xff]  }
 0x2d7   :  { %7091 = vmatprep.subr.bf16.mxu1 %v10565_v2  ;;  %7132 = vmatprep.subr.bf16.mxu0 %v10568_v3  ;;  %v10637_v2 = vld [vmem:[#allocation9 + $0x13ec] ss:$48 sps:$4 sm:$0xff]  }
 0x2da   :  { %7092 = vmatpush1.bf16.msra.mxu1 %v10563_v4  ;;  %7133 = vmatpush1.bf16.msra.mxu0 %v10566_v5  ;;  %v10640_v4 = vld [vmem:[#allocation9 + $0x1f4] ss:$48 sps:$4 sm:$0xff]  }
 0x2db   :  { %7093 = vmatprep.subr.bf16.mxu1 %v10571_v6  ;;  %7134 = vmatprep.subr.bf16.mxu0 %v10574_v7  ;;  %v10635_v6 = vld [vmem:[#allocation9 + $0x13e8] ss:$48 sps:$4 sm:$0xff]   ;;  %v10638_v7 = vld [vmem:[#allocation9 + $0x1f0] ss:$48 sps:$4 sm:$0xff]  }
 0x2de   :  { %7094 = vmatpush1.bf16.msra.mxu1 %v10569_v8  ;;  %7135 = vmatpush1.bf16.msra.mxu0 %v10572_v9  ;;  %v10643_v8 = vld [vmem:[#allocation9 + $0x138c] ss:$48 sps:$4 sm:$0xff]   ;;  %v10646_v9 = vld [vmem:[#allocation9 + $0x194] ss:$48 sps:$4 sm:$0xff]  }
 0x2df   :  { %7095 = vmatprep.subr.bf16.mxu1 %v10577_v10  ;;  %7136 = vmatprep.subr.bf16.mxu0 %v10580_v11  ;;  %v10641_v10 = vld [vmem:[#allocation9 + $0x1388] ss:$48 sps:$4 sm:$0xff]   ;;  %v10644_v11 = vld [vmem:[#allocation9 + $0x190] ss:$48 sps:$4 sm:$0xff]  }
 0x2e2   :  { %7096 = vmatpush2.bf16.msra.mxu1 %v10575_v12  ;;  %7137 = vmatpush2.bf16.msra.mxu0 %v10578_v13  ;;  %v10649_v12 = vld [vmem:[#allocation9 + $0x132c] ss:$48 sps:$4 sm:$0xff]   ;;  %v10652_v13 = vld [vmem:[#allocation9 + $0x134] ss:$48 sps:$4 sm:$0xff]  }
 0x2e3   :  { %7097 = vmatprep.subr.bf16.mxu1 %v10583_v16  ;;  %7138 = vmatprep.subr.bf16.mxu0 %v10586_v17  ;;  %v10647_v16 = vld [vmem:[#allocation9 + $0x1328] ss:$48 sps:$4 sm:$0xff]   ;;  %v10650_v17 = vld [vmem:[#allocation9 + $0x130] ss:$48 sps:$4 sm:$0xff]  }
 0x2e6   :  { %7098 = vmatpush2.bf16.msra.mxu1 %v10581_v18  ;;  %7139 = vmatpush2.bf16.msra.mxu0 %v10584_v19  ;;  %v10655_v18 = vld [vmem:[#allocation9 + $0x12cc] ss:$48 sps:$4 sm:$0xff]   ;;  %v10658_v19 = vld [vmem:[#allocation9 + $0xd4] ss:$48 sps:$4 sm:$0xff]  }
 0x2e7   :  { %7099 = vmatprep.subr.bf16.mxu1 %v10589_v20  ;;  %7140 = vmatprep.subr.bf16.mxu0 %v10592_v21  ;;  %v10653_v20 = vld [vmem:[#allocation9 + $0x12c8] ss:$48 sps:$4 sm:$0xff]   ;;  %v10656_v21 = vld [vmem:[#allocation9 + $0xd0] ss:$48 sps:$4 sm:$0xff]  }
 0x2ea   :  { %7100 = vmatpush2.bf16.msra.mxu1 %v10587_v22  ;;  %7141 = vmatpush2.bf16.msra.mxu0 %v10590_v23  ;;  %v10661_v22 = vld [vmem:[#allocation9 + $0x126c] ss:$48 sps:$4 sm:$0xff]   ;;  %v10664_v23 = vld [vmem:[#allocation9 + $0x74] ss:$48 sps:$4 sm:$0xff]  }
 0x2eb   :  { %7101 = vmatprep.subr.bf16.mxu1 %v10595_v24  ;;  %7142 = vmatprep.subr.bf16.mxu0 %v10598_v14  ;;  %v10659_v24 = vld [vmem:[#allocation9 + $0x1268] ss:$48 sps:$4 sm:$0xff]   ;;  %v10662_v14 = vld [vmem:[#allocation9 + $0x70] ss:$48 sps:$4 sm:$0xff]  }
 0x2ee   :  { %7102 = vmatpush2.bf16.msra.mxu1 %v10593_v15  ;;  %7143 = vmatpush2.bf16.msra.mxu0 %v10596_v25  ;;  %v10667_v15 = vld [vmem:[#allocation9 + $0x120c] ss:$48 sps:$4 sm:$0xff]   ;;  %v10670_v25 = vld [vmem:[#allocation9 + $0x14] ss:$48 sps:$4 sm:$0xff]  }
 0x2ef   :  { %7103 = vmatprep.subr.bf16.mxu1 %v10601_v26  ;;  %7144 = vmatprep.subr.bf16.mxu0 %v10604_v27  ;;  %v10665_v26 = vld [vmem:[#allocation9 + $0x1208] ss:$48 sps:$4 sm:$0xff]   ;;  %v10668_v27 = vld [vmem:[#allocation9 + $0x10] ss:$48 sps:$4 sm:$0xff]  }
 0x2f2   :  { %7104 = vmatpush2.bf16.msra.mxu1 %v10599_v28  ;;  %7145 = vmatpush2.bf16.msra.mxu0 %v10602_v60  ;;  %v10673_v28 = vld [vmem:[#allocation9 + $0x17ac] ss:$48 sps:$4 sm:$0xff]   ;;  %v10676_v60 = vld [vmem:[#allocation9 + $0x5b4] ss:$48 sps:$4 sm:$0xff]  }
 0x2f3   :  { %7105 = vmatprep.subr.bf16.mxu1 %v10607_v30  ;;  %7146 = vmatprep.subr.bf16.mxu0 %v10610_v31  ;;  %v10671_v30 = vld [vmem:[#allocation9 + $0x17a8] ss:$48 sps:$4 sm:$0xff]   ;;  %v10674_v31 = vld [vmem:[#allocation9 + $0x5b0] ss:$48 sps:$4 sm:$0xff]  }
 0x2f6   :  { %7106 = vmatpush2.bf16.msra.mxu1 %v10605_v32  ;;  %7147 = vmatpush2.bf16.msra.mxu0 %v10608_v33  ;;  %v6908_v36 = vpop.f32.mrf.mxu0  ;;  %v10679_v32 = vld [vmem:[#allocation9 + $0x174c] ss:$48 sps:$4 sm:$0xff]   ;;  %v10682_v33 = vld [vmem:[#allocation9 + $0x554] ss:$48 sps:$4 sm:$0xff]  }
 0x2f7   :  { %7107 = vmatprep.subr.bf16.mxu1 %v10613_v34  ;;  %7148 = vmatprep.subr.bf16.mxu0 %v10616_v57  ;;  %v10677_v34 = vld [vmem:[#allocation9 + $0x1748] ss:$48 sps:$4 sm:$0xff]   ;;  %v10680_v57 = vld [vmem:[#allocation9 + $0x550] ss:$48 sps:$4 sm:$0xff]  }
 0x2f8   :  { %v6910_v43 = vpop.f32.mrf.mxu0 }
 0x2fa   :  { %7108 = vmatpush2.bf16.msra.mxu1 %v10611_v58  ;;  %7149 = vmatpush2.bf16.msra.mxu0 %v10614_v39  ;;  %v6912_v44 = vpop.f32.mrf.mxu0  ;;  %v10688_v58 = vld [vmem:[#allocation9 + $0x4f4] ss:$48 sps:$4 sm:$0xff]   ;;  %v10683_v39 = vld [vmem:[#allocation9 + $0x16e8] ss:$48 sps:$4 sm:$0xff]  }
 0x2fb   :  { %7109 = vmatprep.subr.bf16.mxu1 %v10619_v41  ;;  %7150 = vmatprep.subr.bf16.mxu0 %v10622_v42  ;;  %v10686_v41 = vld [vmem:[#allocation9 + $0x4f0] ss:$48 sps:$4 sm:$0xff]   ;;  %v10691_v42 = vld [vmem:[#allocation9 + $0x168c] ss:$48 sps:$4 sm:$0xff]   ;;  %v10689_v44 = vld [vmem:[#allocation9 + $0x1688] ss:$48 sps:$4 sm:$0xff]  }
 0x2fc   :  { %v6913_v49 = vpop.f32.mrf.mxu0 }
 0x2fd   :  { %v10698_v49 = vld [vmem:[#allocation9 + $0x430] ss:$48 sps:$4 sm:$0xff]  }
 0x2fe   :  { %7110 = vmatpush2.bf16.msra.mxu1 %v10617_v45  ;;  %7151 = vmatpush2.bf16.msra.mxu0 %v10620_v46  ;;  %v10692_v45 = vld [vmem:[#allocation9 + $0x490] ss:$48 sps:$4 sm:$0xff]   ;;  %v10697_v46 = vld [vmem:[#allocation9 + $0x162c] ss:$48 sps:$4 sm:$0xff]  }
 0x2ff   :  { %7161 = vmatprep.subr.bf16.mxu1 %v10625_v47  ;;  %7202 = vmatprep.subr.bf16.mxu0 %v10628_v48  ;;  %v10700_v47 = vld [vmem:[#allocation9 + $0x434] ss:$48 sps:$4 sm:$0xff]   ;;  %v10695_v48 = vld [vmem:[#allocation9 + $0x1628] ss:$48 sps:$4 sm:$0xff]  }
 0x300   :  { %v6949_v54 = vpop.f32.mrf.mxu1 }
 0x301   :  { %7112 = vmatmul.mubr.bf16.vlgmr.msra.gmra.mxu1 %v11778_v40  ;;  %7153 = vmatmul.mubr.bf16.vlgmr.msra.gmra.mxu0 %v11784_v52  ;;  %v11800_v61 = vadd.f32 %v6949_v54, %v6908_v36  ;;  %v10685_v36 = vld [vmem:[#allocation9 + $0x16ec] ss:$48 sps:$4 sm:$0xff]   ;;  %v10701_v54 = vld [vmem:[#allocation9 + $0x15c8] ss:$48 sps:$4 sm:$0xff]  }
 0x302   :  { %7162 = vmatpush1.bf16.msra.mxu1 %v10623_v51  ;;  %7193 = vmatprep.mubr.bf16.mxu1 %v11789_v35  ;;  %v6951_v62 = vpop.f32.mrf.mxu1  ;;  %v10703_v51 = vld [vmem:[#allocation9 + $0x15cc] ss:$48 sps:$4 sm:$0xff]  }
 0x303   :  { %7203 = vmatpush1.bf16.msra.mxu0 %v10626_v53  ;;  %7234 = vmatprep.mubr.bf16.mxu0 %v11768_v29  ;;  %v11804_v0 = vadd.f32 %v6951_v62, %v6910_v43  ;;  %v10694_v43 = vld [vmem:[#allocation9 + $0x494] ss:$48 sps:$4 sm:$0xff]  }
 0x304   :  { %7163 = vmatprep.subr.bf16.mxu1 %v10631_v55  ;;  %7204 = vmatprep.subr.bf16.mxu0 %v10634_v56  ;;  %v6953_v3 = vpop.f32.mrf.mxu1  ;;  %v10706_v53 = vld [vmem:[#allocation9 + $0x3d4] ss:$48 sps:$4 sm:$0xff]   ;;  %v10704_v55 = vld [vmem:[#allocation9 + $0x3d0] ss:$48 sps:$4 sm:$0xff]   ;;  %v10709_v56 = vld [vmem:[#allocation9 + $0x156c] ss:$48 sps:$4 sm:$0xff]  }
 0x305   :  { %v10712_v62 = vld [vmem:[#allocation9 + $0x374] ss:$48 sps:$4 sm:$0xff]  }
 0x306   :  { %7164 = vmatpush1.bf16.msra.mxu1 %v10629_v63  ;;  %v6954_v5 = vpop.f32.mrf.mxu1  ;;  %v10707_v63 = vld [vmem:[#allocation9 + $0x1568] ss:$48 sps:$4 sm:$0xff]   ;;  %v10718_v3 = vld [vmem:[#allocation9 + $0x314] ss:$48 sps:$4 sm:$0xff]  }
 0x307   :  { %7205 = vmatpush1.bf16.msra.mxu0 %v10632_v1  ;;  %7165 = vmatprep.subr.bf16.mxu1 %v10637_v2  ;;  %v10710_v1 = vld [vmem:[#allocation9 + $0x370] ss:$48 sps:$4 sm:$0xff]   ;;  %v10715_v2 = vld [vmem:[#allocation9 + $0x150c] ss:$48 sps:$4 sm:$0xff]  }
 0x308   :  { %7206 = vmatprep.subr.bf16.mxu0 %v10640_v4  ;;  %v10713_v4 = vld [vmem:[#allocation9 + $0x1508] ss:$48 sps:$4 sm:$0xff]   ;;  %v10716_v5 = vld [vmem:[#allocation9 + $0x310] ss:$48 sps:$4 sm:$0xff]  }
 0x30a   :  { %7166 = vmatpush1.bf16.msra.mxu1 %v10635_v6  ;;  %v10721_v6 = vld [vmem:[#allocation9 + $0x8b4] ss:$48 sps:$4 sm:$0xff]  }
 0x30b   :  { %7207 = vmatpush1.bf16.msra.mxu0 %v10638_v7  ;;  %7167 = vmatprep.subr.bf16.mxu1 %v10643_v8  ;;  %v10724_v7 = vld [vmem:[#allocation9 + $0xeb4] ss:$48 sps:$4 sm:$0xff]   ;;  %v10719_v8 = vld [vmem:[#allocation9 + $0x8b0] ss:$48 sps:$4 sm:$0xff]  }
 0x30c   :  { %7208 = vmatprep.subr.bf16.mxu0 %v10646_v9  ;;  %v10722_v9 = vld [vmem:[#allocation9 + $0xeb0] ss:$48 sps:$4 sm:$0xff]  }
 0x30e   :  { %7168 = vmatpush1.bf16.msra.mxu1 %v10641_v10  ;;  %v10727_v10 = vld [vmem:[#allocation9 + $0x854] ss:$48 sps:$4 sm:$0xff]  }
 0x30f   :  { %7209 = vmatpush1.bf16.msra.mxu0 %v10644_v11  ;;  %7169 = vmatprep.subr.bf16.mxu1 %v10649_v12  ;;  %v10730_v12 = vld [vmem:[#allocation9 + $0xe54] ss:$48 sps:$4 sm:$0xff]  }
 0x310   :  { %7210 = vmatprep.subr.bf16.mxu0 %v10652_v13 }
 0x312   :  { %7170 = vmatpush1.bf16.msra.mxu1 %v10647_v16  ;;  %v10725_v16 = vld [vmem:[#allocation9 + $0x850] ss:$48 sps:$4 sm:$0xff]  }
 0x313   :  { %7211 = vmatpush1.bf16.msra.mxu0 %v10650_v17  ;;  %7171 = vmatprep.subr.bf16.mxu1 %v10655_v18  ;;  %v10728_v18 = vld [vmem:[#allocation9 + $0xe50] ss:$48 sps:$4 sm:$0xff]  }
 0x314   :  { %7212 = vmatprep.subr.bf16.mxu0 %v10658_v19  ;;  %v10733_v19 = vld [vmem:[#allocation9 + $0x7f4] ss:$48 sps:$4 sm:$0xff]  }
 0x316   :  { %7172 = vmatpush1.bf16.msra.mxu1 %v10653_v20 }
 0x317   :  { %7213 = vmatpush1.bf16.msra.mxu0 %v10656_v21  ;;  %7173 = vmatprep.subr.bf16.mxu1 %v10661_v22  ;;  %v10736_v21 = vld [vmem:[#allocation9 + $0xdf4] ss:$48 sps:$4 sm:$0xff]  }
 0x318   :  { %7214 = vmatprep.subr.bf16.mxu0 %v10664_v23 }
 0x31a   :  { %7174 = vmatpush1.bf16.msra.mxu1 %v10659_v24  ;;  %v10734_v24 = vld [vmem:[#allocation9 + $0xdf0] ss:$48 sps:$4 sm:$0xff]  }
 0x31b   :  { %7215 = vmatpush1.bf16.msra.mxu0 %v10662_v14  ;;  %7175 = vmatprep.subr.bf16.mxu1 %v10667_v15  ;;  %v10739_v14 = vld [vmem:[#allocation9 + $0x794] ss:$48 sps:$4 sm:$0xff]  }
 0x31c   :  { %7216 = vmatprep.subr.bf16.mxu0 %v10670_v25  ;;  %v10742_v15 = vld [vmem:[#allocation9 + $0xd94] ss:$48 sps:$4 sm:$0xff]   ;;  %v10737_v25 = vld [vmem:[#allocation9 + $0x790] ss:$48 sps:$4 sm:$0xff]  }
 0x31e   :  { %7176 = vmatpush1.bf16.msra.mxu1 %v10665_v26  ;;  %v10740_v26 = vld [vmem:[#allocation9 + $0xd90] ss:$48 sps:$4 sm:$0xff]  }
 0x31f   :  { %7217 = vmatpush1.bf16.msra.mxu0 %v10668_v27  ;;  %7177 = vmatprep.subr.bf16.mxu1 %v10673_v28  ;;  %v10748_v27 = vld [vmem:[#allocation9 + $0xd34] ss:$48 sps:$4 sm:$0xff]   ;;  %v10743_v28 = vld [vmem:[#allocation9 + $0x730] ss:$48 sps:$4 sm:$0xff]  }
 0x320   :  { %7218 = vmatprep.subr.bf16.mxu0 %v10676_v60  ;;  %v10746_v60 = vld [vmem:[#allocation9 + $0xd30] ss:$48 sps:$4 sm:$0xff]  }
 0x322   :  { %7178 = vmatpush2.bf16.msra.mxu1 %v10671_v30  ;;  %v10751_v30 = vld [vmem:[#allocation9 + $0x6d4] ss:$48 sps:$4 sm:$0xff]  }
 0x323   :  { %7219 = vmatpush2.bf16.msra.mxu0 %v10674_v31  ;;  %7179 = vmatprep.subr.bf16.mxu1 %v10679_v32  ;;  %v10754_v31 = vld [vmem:[#allocation9 + $0xcd4] ss:$48 sps:$4 sm:$0xff]   ;;  %v10749_v32 = vld [vmem:[#allocation9 + $0x6d0] ss:$48 sps:$4 sm:$0xff]  }
 0x324   :  { %7220 = vmatprep.subr.bf16.mxu0 %v10682_v33  ;;  %v10752_v33 = vld [vmem:[#allocation9 + $0xcd0] ss:$48 sps:$4 sm:$0xff]  }
 0x326   :  { %7180 = vmatpush2.bf16.msra.mxu1 %v10677_v34  ;;  %v10757_v34 = vld [vmem:[#allocation9 + $0x674] ss:$48 sps:$4 sm:$0xff]  }
 0x327   :  { %7221 = vmatpush2.bf16.msra.mxu0 %v10680_v57  ;;  %7181 = vmatprep.subr.bf16.mxu1 %v10685_v36  ;;  %v10760_v57 = vld [vmem:[#allocation9 + $0xc74] ss:$48 sps:$4 sm:$0xff]   ;;  %v10755_v36 = vld [vmem:[#allocation9 + $0x670] ss:$48 sps:$4 sm:$0xff]  }
 0x328   :  { %7222 = vmatprep.subr.bf16.mxu0 %v10688_v58  ;;  %v10758_v58 = vld [vmem:[#allocation9 + $0xc70] ss:$48 sps:$4 sm:$0xff]  }
 0x32a   :  { %7182 = vmatpush2.bf16.msra.mxu1 %v10683_v39  ;;  %v10763_v39 = vld [vmem:[#allocation9 + $0x614] ss:$48 sps:$4 sm:$0xff]  }
 0x32b   :  { %7223 = vmatpush2.bf16.msra.mxu0 %v10686_v41  ;;  %7183 = vmatprep.subr.bf16.mxu1 %v10691_v42  ;;  %v10766_v41 = vld [vmem:[#allocation9 + $0xc14] ss:$48 sps:$4 sm:$0xff]   ;;  %v10761_v42 = vld [vmem:[#allocation9 + $0x610] ss:$48 sps:$4 sm:$0xff]  }
 0x32c   :  { %7224 = vmatprep.subr.bf16.mxu0 %v10694_v43  ;;  %v10764_v43 = vld [vmem:[#allocation9 + $0xc10] ss:$48 sps:$4 sm:$0xff]  }
 0x32e   :  { %7184 = vmatpush2.bf16.msra.mxu1 %v10689_v44  ;;  %v10769_v44 = vld [vmem:[#allocation9 + $0xbb4] ss:$48 sps:$4 sm:$0xff]  }
 0x32f   :  { %7225 = vmatpush2.bf16.msra.mxu0 %v10692_v45  ;;  %7185 = vmatprep.subr.bf16.mxu1 %v10697_v46  ;;  %v10772_v45 = vld [vmem:[#allocation9 + $0x11b4] ss:$48 sps:$4 sm:$0xff]   ;;  %v10767_v46 = vld [vmem:[#allocation9 + $0xbb0] ss:$48 sps:$4 sm:$0xff]  }
 0x330   :  { %7226 = vmatprep.subr.bf16.mxu0 %v10700_v47  ;;  %v10770_v47 = vld [vmem:[#allocation9 + $0x11b0] ss:$48 sps:$4 sm:$0xff]  }
 0x332   :  { %7186 = vmatpush2.bf16.msra.mxu1 %v10695_v48  ;;  %v10775_v48 = vld [vmem:[#allocation9 + $0xb54] ss:$48 sps:$4 sm:$0xff]  }
 0x333   :  { %7227 = vmatpush2.bf16.msra.mxu0 %v10698_v49  ;;  %7187 = vmatprep.subr.bf16.mxu1 %v10703_v51  ;;  %v10778_v49 = vld [vmem:[#allocation9 + $0x1154] ss:$48 sps:$4 sm:$0xff]   ;;  %v10773_v51 = vld [vmem:[#allocation9 + $0xb50] ss:$48 sps:$4 sm:$0xff]  }
 0x334   :  { %7228 = vmatprep.subr.bf16.mxu0 %v10706_v53  ;;  %v10776_v53 = vld [vmem:[#allocation9 + $0x1150] ss:$48 sps:$4 sm:$0xff]  }
 0x336   :  { %7188 = vmatpush2.bf16.msra.mxu1 %v10701_v54  ;;  %v10781_v54 = vld [vmem:[#allocation9 + $0xaf4] ss:$48 sps:$4 sm:$0xff]  }
 0x337   :  { %7229 = vmatpush2.bf16.msra.mxu0 %v10704_v55  ;;  %7189 = vmatprep.subr.bf16.mxu1 %v10709_v56  ;;  %v10784_v55 = vld [vmem:[#allocation9 + $0x10f4] ss:$48 sps:$4 sm:$0xff]   ;;  %v10779_v56 = vld [vmem:[#allocation9 + $0xaf0] ss:$48 sps:$4 sm:$0xff]  }
 0x338   :  { %7230 = vmatprep.subr.bf16.mxu0 %v10712_v62  ;;  %v10782_v62 = vld [vmem:[#allocation9 + $0x10f0] ss:$48 sps:$4 sm:$0xff]  }
 0x33a   :  { %7190 = vmatpush2.bf16.msra.mxu1 %v10707_v63  ;;  %v10787_v63 = vld [vmem:[#allocation9 + $0xa94] ss:$48 sps:$4 sm:$0xff]  }
 0x33b   :  { %7231 = vmatpush2.bf16.msra.mxu0 %v10710_v1  ;;  %7191 = vmatprep.subr.bf16.mxu1 %v10715_v2  ;;  %v10790_v1 = vld [vmem:[#allocation9 + $0x1094] ss:$48 sps:$4 sm:$0xff]   ;;  %v10785_v2 = vld [vmem:[#allocation9 + $0xa90] ss:$48 sps:$4 sm:$0xff]  }
 0x33c   :  { %7232 = vmatprep.subr.bf16.mxu0 %v10718_v3  ;;  %v10788_v3 = vld [vmem:[#allocation9 + $0x1090] ss:$48 sps:$4 sm:$0xff]  }
 0x33e   :  { %7192 = vmatpush2.bf16.msra.mxu1 %v10713_v4  ;;  %v10793_v4 = vld [vmem:[#allocation9 + $0xa34] ss:$48 sps:$4 sm:$0xff]  }
 0x33f   :  { %7233 = vmatpush2.bf16.msra.mxu0 %v10716_v5  ;;  %7243 = vmatprep.subr.bf16.mxu1 %v10721_v6  ;;  %v10796_v5 = vld [vmem:[#allocation9 + $0x1034] ss:$48 sps:$4 sm:$0xff]   ;;  %v10791_v6 = vld [vmem:[#allocation9 + $0xa30] ss:$48 sps:$4 sm:$0xff]  }
 0x340   :  { %7284 = vmatprep.subr.bf16.mxu0 %v10724_v7  ;;  %v10794_v7 = vld [vmem:[#allocation9 + $0x1030] ss:$48 sps:$4 sm:$0xff]  }
 0x341   :  { %7194 = vmatmul.mubr.bf16.vlgmr.msra.gmra.mxu1 %v11791_v37  ;;  %v6990_v11 = vpop.f32.mrf.mxu0 }
 0x342   :  { %7235 = vmatmul.mubr.bf16.vlgmr.msra.gmra.mxu0 %v11773_v59  ;;  %v11809_v13 = vadd.f32 %v6990_v11, %v11800_v61  ;;  %7244 = vmatpush1.bf16.msra.mxu1 %v10719_v8  ;;  %v10731_v61 = vld [vmem:[#allocation9 + $0x7f0] ss:$48 sps:$4 sm:$0xff]   ;;  %v10799_v8 = vld [vmem:[#allocation9 + $0x9d4] ss:$48 sps:$4 sm:$0xff]  }
 0x343   :  { %7275 = vmatprep.mubr.bf16.mxu1 %v11776_v38  ;;  %7285 = vmatpush1.bf16.msra.mxu0 %v10722_v9  ;;  %v6992_v17 = vpop.f32.mrf.mxu0  ;;  %v10802_v9 = vld [vmem:[#allocation9 + $0xfd4] ss:$48 sps:$4 sm:$0xff]   ;;  %v10800_v11 = vld [vmem:[#allocation9 + $0xfd0] ss:$48 sps:$4 sm:$0xff]  }
 0x344   :  { %7316 = vmatprep.mubr.bf16.mxu0 %v11782_v50  ;;  %v11814_v20 = vadd.f32 %v6992_v17, %v11804_v0  ;;  %7245 = vmatprep.subr.bf16.mxu1 %v10727_v10  ;;  %v10745_v0 = vld [vmem:[#allocation9 + $0x734] ss:$48 sps:$4 sm:$0xff]   ;;  %v10797_v10 = vld [vmem:[#allocation9 + $0x9d0] ss:$48 sps:$4 sm:$0xff]  }
 0x345   :  { %7286 = vmatprep.subr.bf16.mxu0 %v10730_v12  ;;  %v6994_v22 = vpop.f32.mrf.mxu0  ;;  %v10805_v12 = vld [vmem:[#allocation9 + $0x974] ss:$48 sps:$4 sm:$0xff]   ;;  %v10803_v17 = vld [vmem:[#allocation9 + $0x970] ss:$48 sps:$4 sm:$0xff]  }
 0x346   :  { %7246 = vmatpush1.bf16.msra.mxu1 %v10725_v16  ;;  %v10808_v16 = vld [vmem:[#allocation9 + $0xf74] ss:$48 sps:$4 sm:$0xff]   ;;  %v10809_v22 = vld [vmem:[#allocation9 + $0x910] ss:$48 sps:$4 sm:$0xff]  }
 0x347   :  { %7287 = vmatpush1.bf16.msra.mxu0 %v10728_v18  ;;  %v6995_v23 = vpop.f32.mrf.mxu0  ;;  %7247 = vmatprep.subr.bf16.mxu1 %v10733_v19  ;;  %v10806_v18 = vld [vmem:[#allocation9 + $0xf70] ss:$48 sps:$4 sm:$0xff]   ;;  %v10811_v19 = vld [vmem:[#allocation9 + $0x914] ss:$48 sps:$4 sm:$0xff]  }
 0x348   :  { %7288 = vmatprep.subr.bf16.mxu0 %v10736_v21  ;;  %v10814_v21 = vld [vmem:[#allocation9 + $0xf14] ss:$48 sps:$4 sm:$0xff]  }
 0x349   :  { %v10817_v23 = vld [vmem:[#allocation9 + $0x14b4] ss:$48 sps:$4 sm:$0xff]  }
 0x34a   :  { %7248 = vmatpush1.bf16.msra.mxu1 %v10731_v61  ;;  %v10812_v61 = vld [vmem:[#allocation9 + $0xf10] ss:$48 sps:$4 sm:$0xff]  }
 0x34b   :  { %7289 = vmatpush1.bf16.msra.mxu0 %v10734_v24  ;;  %7249 = vmatprep.subr.bf16.mxu1 %v10739_v14  ;;  %v10820_v24 = vld [vmem:[#allocation9 + $0x2bc] ss:$48 sps:$4 sm:$0xff]   ;;  %v10815_v14 = vld [vmem:[#allocation9 + $0x14b0] ss:$48 sps:$4 sm:$0xff]  }
 0x34c   :  { %7290 = vmatprep.subr.bf16.mxu0 %v10742_v15  ;;  %v10818_v15 = vld [vmem:[#allocation9 + $0x2b8] ss:$48 sps:$4 sm:$0xff]  }
 0x34e   :  { %7250 = vmatpush1.bf16.msra.mxu1 %v10737_v25  ;;  %v10823_v25 = vld [vmem:[#allocation9 + $0x1454] ss:$48 sps:$4 sm:$0xff]  }
 0x34f   :  { %7291 = vmatpush1.bf16.msra.mxu0 %v10740_v26  ;;  %7251 = vmatprep.subr.bf16.mxu1 %v10745_v0 }
 0x350   :  { %7292 = vmatprep.subr.bf16.mxu0 %v10748_v27  ;;  %v10826_v27 = vld [vmem:[#allocation9 + $0x25c] ss:$48 sps:$4 sm:$0xff]  }
 0x352   :  { %7252 = vmatpush1.bf16.msra.mxu1 %v10743_v28 }
 0x353   :  { %7293 = vmatpush1.bf16.msra.mxu0 %v10746_v60  ;;  %7253 = vmatprep.subr.bf16.mxu1 %v10751_v30  ;;  %v10821_v60 = vld [vmem:[#allocation9 + $0x1450] ss:$48 sps:$4 sm:$0xff]  }
 0x354   :  { %7294 = vmatprep.subr.bf16.mxu0 %v10754_v31 }
 0x356   :  { %7254 = vmatpush1.bf16.msra.mxu1 %v10749_v32  ;;  %v10824_v32 = vld [vmem:[#allocation9 + $0x258] ss:$48 sps:$4 sm:$0xff]  }
 0x357   :  { %7295 = vmatpush1.bf16.msra.mxu0 %v10752_v33  ;;  %7255 = vmatprep.subr.bf16.mxu1 %v10757_v34  ;;  %v10829_v33 = vld [vmem:[#allocation9 + $0x13f4] ss:$48 sps:$4 sm:$0xff]  }
 0x358   :  { %7296 = vmatprep.subr.bf16.mxu0 %v10760_v57  ;;  %v10832_v57 = vld [vmem:[#allocation9 + $0x1fc] ss:$48 sps:$4 sm:$0xff]  }
 0x35a   :  { %7256 = vmatpush1.bf16.msra.mxu1 %v10755_v36 }
 0x35b   :  { %7297 = vmatpush1.bf16.msra.mxu0 %v10758_v58  ;;  %7257 = vmatprep.subr.bf16.mxu1 %v10763_v39  ;;  %v10827_v58 = vld [vmem:[#allocation9 + $0x13f0] ss:$48 sps:$4 sm:$0xff]  }
 0x35c   :  { %7298 = vmatprep.subr.bf16.mxu0 %v10766_v41 }
 0x35e   :  { %7258 = vmatpush1.bf16.msra.mxu1 %v10761_v42  ;;  %v10830_v42 = vld [vmem:[#allocation9 + $0x1f8] ss:$48 sps:$4 sm:$0xff]  }
 0x35f   :  { %7299 = vmatpush1.bf16.msra.mxu0 %v10764_v43  ;;  %7259 = vmatprep.subr.bf16.mxu1 %v10769_v44  ;;  %v10835_v43 = vld [vmem:[#allocation9 + $0x1394] ss:$48 sps:$4 sm:$0xff]   ;;  %v10838_v44 = vld [vmem:[#allocation9 + $0x19c] ss:$48 sps:$4 sm:$0xff]  }
 0x360   :  { %7300 = vmatprep.subr.bf16.mxu0 %v10772_v45  ;;  %v10833_v45 = vld [vmem:[#allocation9 + $0x1390] ss:$48 sps:$4 sm:$0xff]  }
 0x362   :  { %7260 = vmatpush2.bf16.msra.mxu1 %v10767_v46  ;;  %v10841_v46 = vld [vmem:[#allocation9 + $0x1334] ss:$48 sps:$4 sm:$0xff]  }
 0x363   :  { %7301 = vmatpush2.bf16.msra.mxu0 %v10770_v47  ;;  %7261 = vmatprep.subr.bf16.mxu1 %v10775_v48  ;;  %v10844_v47 = vld [vmem:[#allocation9 + $0x13c] ss:$48 sps:$4 sm:$0xff]   ;;  %v10839_v48 = vld [vmem:[#allocation9 + $0x1330] ss:$48 sps:$4 sm:$0xff]  }
 0x364   :  { %7302 = vmatprep.subr.bf16.mxu0 %v10778_v49  ;;  %v10842_v49 = vld [vmem:[#allocation9 + $0x138] ss:$48 sps:$4 sm:$0xff]  }
 0x366   :  { %7262 = vmatpush2.bf16.msra.mxu1 %v10773_v51  ;;  %v10847_v51 = vld [vmem:[#allocation9 + $0x12d4] ss:$48 sps:$4 sm:$0xff]  }
 0x367   :  { %7303 = vmatpush2.bf16.msra.mxu0 %v10776_v53  ;;  %7263 = vmatprep.subr.bf16.mxu1 %v10781_v54  ;;  %v10850_v53 = vld [vmem:[#allocation9 + $0xdc] ss:$48 sps:$4 sm:$0xff]   ;;  %v10845_v54 = vld [vmem:[#allocation9 + $0x12d0] ss:$48 sps:$4 sm:$0xff]  }
 0x368   :  { %7304 = vmatprep.subr.bf16.mxu0 %v10784_v55  ;;  %v10848_v55 = vld [vmem:[#allocation9 + $0xd8] ss:$48 sps:$4 sm:$0xff]  }
 0x36a   :  { %7264 = vmatpush2.bf16.msra.mxu1 %v10779_v56  ;;  %v10853_v56 = vld [vmem:[#allocation9 + $0x1274] ss:$48 sps:$4 sm:$0xff]  }
 0x36b   :  { %7305 = vmatpush2.bf16.msra.mxu0 %v10782_v62  ;;  %7265 = vmatprep.subr.bf16.mxu1 %v10787_v63  ;;  %v10856_v62 = vld [vmem:[#allocation9 + $0x7c] ss:$48 sps:$4 sm:$0xff]   ;;  %v10851_v63 = vld [vmem:[#allocation9 + $0x1270] ss:$48 sps:$4 sm:$0xff]  }
 0x36c   :  { %7306 = vmatprep.subr.bf16.mxu0 %v10790_v1  ;;  %v10854_v1 = vld [vmem:[#allocation9 + $0x78] ss:$48 sps:$4 sm:$0xff]  }
 0x36e   :  { %7266 = vmatpush2.bf16.msra.mxu1 %v10785_v2  ;;  %v10859_v2 = vld [vmem:[#allocation9 + $0x1214] ss:$48 sps:$4 sm:$0xff]  }
 0x36f   :  { %7307 = vmatpush2.bf16.msra.mxu0 %v10788_v3  ;;  %7267 = vmatprep.subr.bf16.mxu1 %v10793_v4  ;;  %v10862_v3 = vld [vmem:[#allocation9 + $0x1c] ss:$48 sps:$4 sm:$0xff]   ;;  %v10857_v4 = vld [vmem:[#allocation9 + $0x1210] ss:$48 sps:$4 sm:$0xff]  }
 0x370   :  { %7308 = vmatprep.subr.bf16.mxu0 %v10796_v5  ;;  %v10860_v5 = vld [vmem:[#allocation9 + $0x18] ss:$48 sps:$4 sm:$0xff]  }
 0x372   :  { %7268 = vmatpush2.bf16.msra.mxu1 %v10791_v6  ;;  %v10865_v6 = vld [vmem:[#allocation9 + $0x17b4] ss:$48 sps:$4 sm:$0xff]  }
 0x373   :  { %7309 = vmatpush2.bf16.msra.mxu0 %v10794_v7  ;;  %7269 = vmatprep.subr.bf16.mxu1 %v10799_v8  ;;  %v10868_v7 = vld [vmem:[#allocation9 + $0x5bc] ss:$48 sps:$4 sm:$0xff]   ;;  %v10863_v8 = vld [vmem:[#allocation9 + $0x17b0] ss:$48 sps:$4 sm:$0xff]  }
 0x374   :  { %7310 = vmatprep.subr.bf16.mxu0 %v10802_v9  ;;  %v10866_v9 = vld [vmem:[#allocation9 + $0x5b8] ss:$48 sps:$4 sm:$0xff]  }
 0x376   :  { %7270 = vmatpush2.bf16.msra.mxu1 %v10797_v10  ;;  %v10871_v10 = vld [vmem:[#allocation9 + $0x1754] ss:$48 sps:$4 sm:$0xff]  }
 0x377   :  { %7311 = vmatpush2.bf16.msra.mxu0 %v10800_v11  ;;  %7271 = vmatprep.subr.bf16.mxu1 %v10805_v12  ;;  %v10874_v11 = vld [vmem:[#allocation9 + $0x55c] ss:$48 sps:$4 sm:$0xff]   ;;  %v10869_v12 = vld [vmem:[#allocation9 + $0x1750] ss:$48 sps:$4 sm:$0xff]  }
 0x378   :  { %7312 = vmatprep.subr.bf16.mxu0 %v10808_v16  ;;  %v10872_v16 = vld [vmem:[#allocation9 + $0x558] ss:$48 sps:$4 sm:$0xff]  }
 0x37a   :  { %7272 = vmatpush2.bf16.msra.mxu1 %v10803_v17  ;;  %v10877_v17 = vld [vmem:[#allocation9 + $0x16f4] ss:$48 sps:$4 sm:$0xff]  }
 0x37b   :  { %7313 = vmatpush2.bf16.msra.mxu0 %v10806_v18  ;;  %7273 = vmatprep.subr.bf16.mxu1 %v10811_v19  ;;  %v10880_v18 = vld [vmem:[#allocation9 + $0x4fc] ss:$48 sps:$4 sm:$0xff]   ;;  %v10875_v19 = vld [vmem:[#allocation9 + $0x16f0] ss:$48 sps:$4 sm:$0xff]  }
 0x37c   :  { %7314 = vmatprep.subr.bf16.mxu0 %v10814_v21  ;;  %v10878_v21 = vld [vmem:[#allocation9 + $0x4f8] ss:$48 sps:$4 sm:$0xff]  }
 0x37e   :  { %7274 = vmatpush2.bf16.msra.mxu1 %v10809_v22  ;;  %v10883_v22 = vld [vmem:[#allocation9 + $0x1694] ss:$48 sps:$4 sm:$0xff]  }
 0x37f   :  { %7315 = vmatpush2.bf16.msra.mxu0 %v10812_v61  ;;  %7325 = vmatprep.subr.bf16.mxu1 %v10817_v23  ;;  %v10886_v61 = vld [vmem:[#allocation9 + $0x49c] ss:$48 sps:$4 sm:$0xff]   ;;  %v10881_v23 = vld [vmem:[#allocation9 + $0x1690] ss:$48 sps:$4 sm:$0xff]  }
 0x380   :  { %7366 = vmatprep.subr.bf16.mxu0 %v10820_v24  ;;  %v10884_v24 = vld [vmem:[#allocation9 + $0x498] ss:$48 sps:$4 sm:$0xff]  }
 0x381   :  { %v11816_v26 = vpop.f32.mrf.mxu0  ;;  %7276 = vmatmul.mubr.bf16.vlgmr.msra.gmra.mxu1 %v11778_v40  ;;  %v7031_v0 = vpop.f32.mrf.mxu1 }
 0x382   :  { %7317 = vmatmul.mubr.bf16.vlgmr.msra.gmra.mxu0 %v11784_v52  ;;  %v11821_v28 = vadd.f32 %v7031_v0, %v11809_v13  ;;  %7326 = vmatpush1.bf16.msra.mxu1 %v10815_v14  ;;  %v10889_v14 = vld [vmem:[#allocation9 + $0x1634] ss:$48 sps:$4 sm:$0xff]   ;;  %v10890_v0 = vld [vmem:[#allocation9 + $0x438] ss:$48 sps:$4 sm:$0xff]  }
 0x383   :  { %7357 = vmatprep.mubr.bf16.mxu1 %v11789_v35  ;;  %7367 = vmatpush1.bf16.msra.mxu0 %v10818_v15  ;;  %v11824_v30 = vpop.f32.mrf.mxu0  ;;  %v7033_v31 = vpop.f32.mrf.mxu1  ;;  %v10892_v15 = vld [vmem:[#allocation9 + $0x43c] ss:$48 sps:$4 sm:$0xff]  }
 0x384   :  { %7398 = vmatprep.mubr.bf16.mxu0 %v11768_v29  ;;  %v11828_v34 = vadd.f32 %v7033_v31, %v11814_v20  ;;  %7327 = vmatprep.subr.bf16.mxu1 %v10823_v25  ;;  %v10836_v20 = vld [vmem:[#allocation9 + $0x198] ss:$48 sps:$4 sm:$0xff]   ;;  %v10887_v25 = vld [vmem:[#allocation9 + $0x1630] ss:$48 sps:$4 sm:$0xff]  }
 0x385   :  { %v7076_v36 = vpop.f32.mrf.mxu0  ;;  %7368 = vmatprep.subr.bf16.mxu0 %v10826_v27  ;;  %v7035_v13 = vpop.f32.mrf.mxu1  ;;  %v10895_v27 = vld [vmem:[#allocation9 + $0x15d4] ss:$48 sps:$4 sm:$0xff]   ;;  %v10893_v31 = vld [vmem:[#allocation9 + $0x15d0] ss:$48 sps:$4 sm:$0xff]  }
 0x386   :  { %7328 = vmatpush1.bf16.msra.mxu1 %v10821_v60  ;;  %v10898_v60 = vld [vmem:[#allocation9 + $0x3dc] ss:$48 sps:$4 sm:$0xff]   ;;  %v10899_v36 = vld [vmem:[#allocation9 + $0x1570] ss:$48 sps:$4 sm:$0xff]   ;;  %v10902_v13 = vld [vmem:[#allocation9 + $0x378] ss:$48 sps:$4 sm:$0xff]  }
 0x387   :  { %7369 = vmatpush1.bf16.msra.mxu0 %v10824_v32  ;;  %v7077_v39 = vpop.f32.mrf.mxu0  ;;  %v7036_v41 = vpop.f32.mrf.mxu1  ;;  %7329 = vmatprep.subr.bf16.mxu1 %v10829_v33  ;;  %v10896_v32 = vld [vmem:[#allocation9 + $0x3d8] ss:$48 sps:$4 sm:$0xff]   ;;  %v10901_v33 = vld [vmem:[#allocation9 + $0x1574] ss:$48 sps:$4 sm:$0xff]  }
 0x388   :  { %7370 = vmatprep.subr.bf16.mxu0 %v10832_v57  ;;  %v10904_v57 = vld [vmem:[#allocation9 + $0x37c] ss:$48 sps:$4 sm:$0xff]   ;;  %v10905_v41 = vld [vmem:[#allocation9 + $0x1510] ss:$48 sps:$4 sm:$0xff]  }
 0x389   :  { %v10910_v39 = vld [vmem:[#allocation9 + $0x31c] ss:$48 sps:$4 sm:$0xff]  }
 0x38a   :  { %7330 = vmatpush1.bf16.msra.mxu1 %v10827_v58  ;;  %v10907_v58 = vld [vmem:[#allocation9 + $0x1514] ss:$48 sps:$4 sm:$0xff]  }
 0x38b   :  { %7371 = vmatpush1.bf16.msra.mxu0 %v10830_v42  ;;  %7331 = vmatprep.subr.bf16.mxu1 %v10835_v43  ;;  %v10908_v42 = vld [vmem:[#allocation9 + $0x318] ss:$48 sps:$4 sm:$0xff]   ;;  %v10913_v43 = vld [vmem:[#allocation9 + $0x8bc] ss:$48 sps:$4 sm:$0xff]  }
 0x38c   :  { %7372 = vmatprep.subr.bf16.mxu0 %v10838_v44  ;;  %v10916_v44 = vld [vmem:[#allocation9 + $0xebc] ss:$48 sps:$4 sm:$0xff]  }
 0x38e   :  { %7332 = vmatpush1.bf16.msra.mxu1 %v10833_v45  ;;  %v10911_v45 = vld [vmem:[#allocation9 + $0x8b8] ss:$48 sps:$4 sm:$0xff]  }
 0x38f   :  { %7373 = vmatpush1.bf16.msra.mxu0 %v10836_v20  ;;  %7333 = vmatprep.subr.bf16.mxu1 %v10841_v46  ;;  %v10914_v20 = vld [vmem:[#allocation9 + $0xeb8] ss:$48 sps:$4 sm:$0xff]   ;;  %v10919_v46 = vld [vmem:[#allocation9 + $0x85c] ss:$48 sps:$4 sm:$0xff]  }
 0x390   :  { %7374 = vmatprep.subr.bf16.mxu0 %v10844_v47 }
 0x392   :  { %7334 = vmatpush1.bf16.msra.mxu1 %v10839_v48 }
 0x393   :  { %7375 = vmatpush1.bf16.msra.mxu0 %v10842_v49  ;;  %7335 = vmatprep.subr.bf16.mxu1 %v10847_v51  ;;  %v10922_v49 = vld [vmem:[#allocation9 + $0xe5c] ss:$48 sps:$4 sm:$0xff]  }
 0x394   :  { %7376 = vmatprep.subr.bf16.mxu0 %v10850_v53  ;;  %v10917_v53 = vld [vmem:[#allocation9 + $0x858] ss:$48 sps:$4 sm:$0xff]  }
 0x396   :  { %7336 = vmatpush1.bf16.msra.mxu1 %v10845_v54 }
 0x397   :  { %7377 = vmatpush1.bf16.msra.mxu0 %v10848_v55  ;;  %7337 = vmatprep.subr.bf16.mxu1 %v10853_v56  ;;  %v10920_v56 = vld [vmem:[#allocation9 + $0xe58] ss:$48 sps:$4 sm:$0xff]  }
 0x398   :  { %7378 = vmatprep.subr.bf16.mxu0 %v10856_v62  ;;  %v10925_v62 = vld [vmem:[#allocation9 + $0x7fc] ss:$48 sps:$4 sm:$0xff]  }
 0x39a   :  { %7338 = vmatpush1.bf16.msra.mxu1 %v10851_v63 }
 0x39b   :  { %7379 = vmatpush1.bf16.msra.mxu0 %v10854_v1  ;;  %7339 = vmatprep.subr.bf16.mxu1 %v10859_v2  ;;  %v10928_v2 = vld [vmem:[#allocation9 + $0xdfc] ss:$48 sps:$4 sm:$0xff]  }
 0x39c   :  { %7380 = vmatprep.subr.bf16.mxu0 %v10862_v3 }
 0x39e   :  { %7340 = vmatpush1.bf16.msra.mxu1 %v10857_v4 }
 0x39f   :  { %7381 = vmatpush1.bf16.msra.mxu0 %v10860_v5  ;;  %7341 = vmatprep.subr.bf16.mxu1 %v10865_v6  ;;  %v10923_v5 = vld [vmem:[#allocation9 + $0x7f8] ss:$48 sps:$4 sm:$0xff]  }
 0x3a0   :  { %7382 = vmatprep.subr.bf16.mxu0 %v10868_v7 }
 0x3a2   :  { %7342 = vmatpush2.bf16.msra.mxu1 %v10863_v8  ;;  %v10926_v8 = vld [vmem:[#allocation9 + $0xdf8] ss:$48 sps:$4 sm:$0xff]  }
 0x3a3   :  { %7383 = vmatpush2.bf16.msra.mxu0 %v10866_v9  ;;  %7343 = vmatprep.subr.bf16.mxu1 %v10871_v10  ;;  %v10931_v9 = vld [vmem:[#allocation9 + $0x79c] ss:$48 sps:$4 sm:$0xff]  }
 0x3a4   :  { %7384 = vmatprep.subr.bf16.mxu0 %v10874_v11  ;;  %v10934_v10 = vld [vmem:[#allocation9 + $0xd9c] ss:$48 sps:$4 sm:$0xff]   ;;  %v10929_v11 = vld [vmem:[#allocation9 + $0x798] ss:$48 sps:$4 sm:$0xff]  }
 0x3a6   :  { %7344 = vmatpush2.bf16.msra.mxu1 %v10869_v12  ;;  %v10937_v12 = vld [vmem:[#allocation9 + $0x73c] ss:$48 sps:$4 sm:$0xff]  }
 0x3a7   :  { %7385 = vmatpush2.bf16.msra.mxu0 %v10872_v16  ;;  %7345 = vmatprep.subr.bf16.mxu1 %v10877_v17  ;;  %v10940_v16 = vld [vmem:[#allocation9 + $0xd3c] ss:$48 sps:$4 sm:$0xff]   ;;  %v10935_v17 = vld [vmem:[#allocation9 + $0x738] ss:$48 sps:$4 sm:$0xff]  }
 0x3a8   :  { %7386 = vmatprep.subr.bf16.mxu0 %v10880_v18  ;;  %v10938_v18 = vld [vmem:[#allocation9 + $0xd38] ss:$48 sps:$4 sm:$0xff]  }
 0x3aa   :  { %7346 = vmatpush2.bf16.msra.mxu1 %v10875_v19  ;;  %v10943_v19 = vld [vmem:[#allocation9 + $0x6dc] ss:$48 sps:$4 sm:$0xff]  }
 0x3ab   :  { %7387 = vmatpush2.bf16.msra.mxu0 %v10878_v21  ;;  %7347 = vmatprep.subr.bf16.mxu1 %v10883_v22  ;;  %v10946_v21 = vld [vmem:[#allocation9 + $0xcdc] ss:$48 sps:$4 sm:$0xff]   ;;  %v10941_v22 = vld [vmem:[#allocation9 + $0x6d8] ss:$48 sps:$4 sm:$0xff]  }
 0x3ac   :  { %7388 = vmatprep.subr.bf16.mxu0 %v10886_v61  ;;  %v10944_v61 = vld [vmem:[#allocation9 + $0xcd8] ss:$48 sps:$4 sm:$0xff]  }
 0x3ae   :  { %7348 = vmatpush2.bf16.msra.mxu1 %v10881_v23  ;;  %v10949_v23 = vld [vmem:[#allocation9 + $0x67c] ss:$48 sps:$4 sm:$0xff]  }
 0x3af   :  { %7389 = vmatpush2.bf16.msra.mxu0 %v10884_v24  ;;  %7349 = vmatprep.subr.bf16.mxu1 %v10889_v14  ;;  %v10952_v24 = vld [vmem:[#allocation9 + $0xc7c] ss:$48 sps:$4 sm:$0xff]   ;;  %v10947_v14 = vld [vmem:[#allocation9 + $0x678] ss:$48 sps:$4 sm:$0xff]  }
 0x3b0   :  { %7390 = vmatprep.subr.bf16.mxu0 %v10892_v15  ;;  %v10950_v15 = vld [vmem:[#allocation9 + $0xc78] ss:$48 sps:$4 sm:$0xff]  }
 0x3b2   :  { %7350 = vmatpush2.bf16.msra.mxu1 %v10887_v25  ;;  %v10955_v25 = vld [vmem:[#allocation9 + $0x61c] ss:$48 sps:$4 sm:$0xff]  }
 0x3b3   :  { %7391 = vmatpush2.bf16.msra.mxu0 %v10890_v0  ;;  %7351 = vmatprep.subr.bf16.mxu1 %v10895_v27  ;;  %v10958_v0 = vld [vmem:[#allocation9 + $0xc1c] ss:$48 sps:$4 sm:$0xff]   ;;  %v10953_v27 = vld [vmem:[#allocation9 + $0x618] ss:$48 sps:$4 sm:$0xff]  }
 0x3b4   :  { %7392 = vmatprep.subr.bf16.mxu0 %v10898_v60  ;;  %v10956_v60 = vld [vmem:[#allocation9 + $0xc18] ss:$48 sps:$4 sm:$0xff]  }
 0x3b6   :  { %7352 = vmatpush2.bf16.msra.mxu1 %v10893_v31  ;;  %v10961_v31 = vld [vmem:[#allocation9 + $0xbbc] ss:$48 sps:$4 sm:$0xff]  }
 0x3b7   :  { %7393 = vmatpush2.bf16.msra.mxu0 %v10896_v32  ;;  %7353 = vmatprep.subr.bf16.mxu1 %v10901_v33  ;;  %v10964_v32 = vld [vmem:[#allocation9 + $0x11bc] ss:$48 sps:$4 sm:$0xff]   ;;  %v10959_v33 = vld [vmem:[#allocation9 + $0xbb8] ss:$48 sps:$4 sm:$0xff]  }
 0x3b8   :  { %7394 = vmatprep.subr.bf16.mxu0 %v10904_v57  ;;  %v10962_v57 = vld [vmem:[#allocation9 + $0x11b8] ss:$48 sps:$4 sm:$0xff]  }
 0x3ba   :  { %7354 = vmatpush2.bf16.msra.mxu1 %v10899_v36  ;;  %v10967_v36 = vld [vmem:[#allocation9 + $0xb5c] ss:$48 sps:$4 sm:$0xff]  }
 0x3bb   :  { %7395 = vmatpush2.bf16.msra.mxu0 %v10902_v13  ;;  %7355 = vmatprep.subr.bf16.mxu1 %v10907_v58  ;;  %v10970_v13 = vld [vmem:[#allocation9 + $0x115c] ss:$48 sps:$4 sm:$0xff]   ;;  %v10965_v58 = vld [vmem:[#allocation9 + $0xb58] ss:$48 sps:$4 sm:$0xff]  }
 0x3bc   :  { %7396 = vmatprep.subr.bf16.mxu0 %v10910_v39  ;;  %v10968_v39 = vld [vmem:[#allocation9 + $0x1158] ss:$48 sps:$4 sm:$0xff]  }
 0x3be   :  { %7356 = vmatpush2.bf16.msra.mxu1 %v10905_v41  ;;  %v10973_v41 = vld [vmem:[#allocation9 + $0xafc] ss:$48 sps:$4 sm:$0xff]  }
 0x3bf   :  { %7397 = vmatpush2.bf16.msra.mxu0 %v10908_v42  ;;  %7407 = vmatprep.subr.bf16.mxu1 %v10913_v43  ;;  %v10976_v42 = vld [vmem:[#allocation9 + $0x10fc] ss:$48 sps:$4 sm:$0xff]   ;;  %v10971_v43 = vld [vmem:[#allocation9 + $0xaf8] ss:$48 sps:$4 sm:$0xff]  }
 0x3c0   :  { %7448 = vmatprep.subr.bf16.mxu0 %v10916_v44  ;;  %v10974_v44 = vld [vmem:[#allocation9 + $0x10f8] ss:$48 sps:$4 sm:$0xff]  }
 0x3c1   :  { %v7113_v47 = vpop.f32.mrf.mxu1  ;;  %v7154_v48 = vpop.f32.mrf.mxu0  ;;  %7358 = vmatmul.mubr.bf16.vlgmr.msra.gmra.mxu1 %v11791_v37 }
 0x3c2   :  { %v7114_v51 = vadd.f32 %v7113_v47, %v11816_v26  ;;  %7399 = vmatmul.mubr.bf16.vlgmr.msra.gmra.mxu0 %v11773_v59  ;;  %7408 = vmatpush1.bf16.msra.mxu1 %v10911_v45  ;;  %v10979_v45 = vld [vmem:[#allocation9 + $0xa9c] ss:$48 sps:$4 sm:$0xff]   ;;  %v10980_v47 = vld [vmem:[#allocation9 + $0x1098] ss:$48 sps:$4 sm:$0xff]  }
 0x3c3   :  { %7439 = vmatprep.mubr.bf16.mxu1 %v11776_v38  ;;  %7449 = vmatpush1.bf16.msra.mxu0 %v10914_v20  ;;  %v7115_v54 = vpop.f32.mrf.mxu1  ;;  %v7156_v55 = vpop.f32.mrf.mxu0  ;;  %v10982_v20 = vld [vmem:[#allocation9 + $0x109c] ss:$48 sps:$4 sm:$0xff]  }
 0x3c4   :  { %v11834_v63 = vadd.f32 %v7154_v48, %v7114_v51  ;;  %7480 = vmatprep.mubr.bf16.mxu0 %v11782_v50  ;;  %v7116_v1 = vadd.f32 %v7115_v54, %v11824_v30  ;;  %7409 = vmatprep.subr.bf16.mxu1 %v10919_v46  ;;  %v10932_v30 = vld [vmem:[#allocation9 + $0xd98] ss:$48 sps:$4 sm:$0xff]   ;;  %v10985_v48 = vld [vmem:[#allocation9 + $0xa3c] ss:$48 sps:$4 sm:$0xff]  }
 0x3c5   :  { %v7117_v26 = vpop.f32.mrf.mxu1  ;;  %v7158_v3 = vpop.f32.mrf.mxu0  ;;  %7450 = vmatprep.subr.bf16.mxu0 %v10922_v49  ;;  %v10977_v46 = vld [vmem:[#allocation9 + $0xa98] ss:$48 sps:$4 sm:$0xff]   ;;  %v10988_v49 = vld [vmem:[#allocation9 + $0x103c] ss:$48 sps:$4 sm:$0xff]  }
 0x3c6   :  { %v11838_v4 = vadd.f32 %v7156_v55, %v7116_v1  ;;  %7410 = vmatpush1.bf16.msra.mxu1 %v10917_v53  ;;  %v10983_v51 = vld [vmem:[#allocation9 + $0xa38] ss:$48 sps:$4 sm:$0xff]   ;;  %v10991_v54 = vld [vmem:[#allocation9 + $0x9dc] ss:$48 sps:$4 sm:$0xff]  }
 0x3c7   :  { %7451 = vmatpush1.bf16.msra.mxu0 %v10920_v56  ;;  %v7118_v6 = vpop.f32.mrf.mxu1  ;;  %v7159_v7 = vpop.f32.mrf.mxu0  ;;  %7411 = vmatprep.subr.bf16.mxu1 %v10925_v62  ;;  %v10986_v53 = vld [vmem:[#allocation9 + $0x1038] ss:$48 sps:$4 sm:$0xff]   ;;  %v10994_v55 = vld [vmem:[#allocation9 + $0xfdc] ss:$48 sps:$4 sm:$0xff]  }
 0x3c8   :  { %7452 = vmatprep.subr.bf16.mxu0 %v10928_v2  ;;  %v10989_v56 = vld [vmem:[#allocation9 + $0x9d8] ss:$48 sps:$4 sm:$0xff]   ;;  %v10997_v1 = vld [vmem:[#allocation9 + $0x97c] ss:$48 sps:$4 sm:$0xff]  }
 0x3c9   :  { %v10992_v62 = vld [vmem:[#allocation9 + $0xfd8] ss:$48 sps:$4 sm:$0xff]   ;;  %v11000_v2 = vld [vmem:[#allocation9 + $0xf7c] ss:$48 sps:$4 sm:$0xff]  }
 0x3ca   :  { %7412 = vmatpush1.bf16.msra.mxu1 %v10923_v5  ;;  %v10995_v26 = vld [vmem:[#allocation9 + $0x978] ss:$48 sps:$4 sm:$0xff]   ;;  %v11003_v5 = vld [vmem:[#allocation9 + $0x91c] ss:$48 sps:$4 sm:$0xff]  }
 0x3cb   :  { %7453 = vmatpush1.bf16.msra.mxu0 %v10926_v8  ;;  %7413 = vmatprep.subr.bf16.mxu1 %v10931_v9  ;;  %v10998_v3 = vld [vmem:[#allocation9 + $0xf78] ss:$48 sps:$4 sm:$0xff]   ;;  %v11006_v6 = vld [vmem:[#allocation9 + $0xf1c] ss:$48 sps:$4 sm:$0xff]  }
 0x3cc   :  { %7454 = vmatprep.subr.bf16.mxu0 %v10934_v10  ;;  %v11001_v7 = vld [vmem:[#allocation9 + $0x918] ss:$48 sps:$4 sm:$0xff]   ;;  %v11009_v9 = vld [vmem:[#allocation9 + $0x14bc] ss:$48 sps:$4 sm:$0xff]   ;;  %v11012_v10 = vld [vmem:[#allocation9 + $0x2c4] ss:$48 sps:$4 sm:$0xff]  }
 0x3cd   :  { %v11004_v8 = vld [vmem:[#allocation9 + $0xf18] ss:$48 sps:$4 sm:$0xff]  }
 0x3ce   :  { %7414 = vmatpush1.bf16.msra.mxu1 %v10929_v11  ;;  %v11007_v11 = vld [vmem:[#allocation9 + $0x14b8] ss:$48 sps:$4 sm:$0xff]  }
 0x3cf   :  { %7455 = vmatpush1.bf16.msra.mxu0 %v10932_v30  ;;  %7415 = vmatprep.subr.bf16.mxu1 %v10937_v12  ;;  %v11010_v30 = vld [vmem:[#allocation9 + $0x2c0] ss:$48 sps:$4 sm:$0xff]   ;;  %v11015_v12 = vld [vmem:[#allocation9 + $0x145c] ss:$48 sps:$4 sm:$0xff]  }
 0x3d0   :  { %7456 = vmatprep.subr.bf16.mxu0 %v10940_v16 }
 0x3d2   :  { %7416 = vmatpush1.bf16.msra.mxu1 %v10935_v17  ;;  %v11018_v17 = vld [vmem:[#allocation9 + $0x264] ss:$48 sps:$4 sm:$0xff]  }
 0x3d3   :  { %7457 = vmatpush1.bf16.msra.mxu0 %v10938_v18  ;;  %7417 = vmatprep.subr.bf16.mxu1 %v10943_v19 }
 0x3d4   :  { %7458 = vmatprep.subr.bf16.mxu0 %v10946_v21  ;;  %v11013_v21 = vld [vmem:[#allocation9 + $0x1458] ss:$48 sps:$4 sm:$0xff]  }
 0x3d6   :  { %7418 = vmatpush1.bf16.msra.mxu1 %v10941_v22 }
 0x3d7   :  { %7459 = vmatpush1.bf16.msra.mxu0 %v10944_v61  ;;  %7419 = vmatprep.subr.bf16.mxu1 %v10949_v23  ;;  %v11016_v61 = vld [vmem:[#allocation9 + $0x260] ss:$48 sps:$4 sm:$0xff]   ;;  %v11021_v23 = vld [vmem:[#allocation9 + $0x13fc] ss:$48 sps:$4 sm:$0xff]  }
 0x3d8   :  { %7460 = vmatprep.subr.bf16.mxu0 %v10952_v24 }
 0x3da   :  { %7420 = vmatpush1.bf16.msra.mxu1 %v10947_v14 }
 0x3db   :  { %7461 = vmatpush1.bf16.msra.mxu0 %v10950_v15  ;;  %7421 = vmatprep.subr.bf16.mxu1 %v10955_v25 }
 0x3dc   :  { %7462 = vmatprep.subr.bf16.mxu0 %v10958_v0  ;;  %v11019_v0 = vld [vmem:[#allocation9 + $0x13f8] ss:$48 sps:$4 sm:$0xff]  }
 0x3de   :  { %7422 = vmatpush1.bf16.msra.mxu1 %v10953_v27 }
 0x3df   :  { %7463 = vmatpush1.bf16.msra.mxu0 %v10956_v60  ;;  %7423 = vmatprep.subr.bf16.mxu1 %v10961_v31  ;;  %v11022_v60 = vld [vmem:[#allocation9 + $0x200] ss:$48 sps:$4 sm:$0xff]   ;;  %v11027_v31 = vld [vmem:[#allocation9 + $0x139c] ss:$48 sps:$4 sm:$0xff]  }
 0x3e0   :  { %7464 = vmatprep.subr.bf16.mxu0 %v10964_v32 }
 0x3e2   :  { %7424 = vmatpush2.bf16.msra.mxu1 %v10959_v33  ;;  %v11030_v33 = vld [vmem:[#allocation9 + $0x1a4] ss:$48 sps:$4 sm:$0xff]  }
 0x3e3   :  { %7465 = vmatpush2.bf16.msra.mxu0 %v10962_v57  ;;  %7425 = vmatprep.subr.bf16.mxu1 %v10967_v36  ;;  %v11028_v57 = vld [vmem:[#allocation9 + $0x1a0] ss:$48 sps:$4 sm:$0xff]   ;;  %v11033_v36 = vld [vmem:[#allocation9 + $0x133c] ss:$48 sps:$4 sm:$0xff]  }
 0x3e4   :  { %7466 = vmatprep.subr.bf16.mxu0 %v10970_v13  ;;  %v11036_v13 = vld [vmem:[#allocation9 + $0x144] ss:$48 sps:$4 sm:$0xff]  }
 0x3e6   :  { %7426 = vmatpush2.bf16.msra.mxu1 %v10965_v58  ;;  %v11031_v58 = vld [vmem:[#allocation9 + $0x1338] ss:$48 sps:$4 sm:$0xff]  }
 0x3e7   :  { %7467 = vmatpush2.bf16.msra.mxu0 %v10968_v39  ;;  %7427 = vmatprep.subr.bf16.mxu1 %v10973_v41  ;;  %v11034_v39 = vld [vmem:[#allocation9 + $0x140] ss:$48 sps:$4 sm:$0xff]   ;;  %v11039_v41 = vld [vmem:[#allocation9 + $0x12dc] ss:$48 sps:$4 sm:$0xff]  }
 0x3e8   :  { %7468 = vmatprep.subr.bf16.mxu0 %v10976_v42  ;;  %v11042_v42 = vld [vmem:[#allocation9 + $0xe4] ss:$48 sps:$4 sm:$0xff]  }
 0x3ea   :  { %7428 = vmatpush2.bf16.msra.mxu1 %v10971_v43  ;;  %v11037_v43 = vld [vmem:[#allocation9 + $0x12d8] ss:$48 sps:$4 sm:$0xff]  }
 0x3eb   :  { %7469 = vmatpush2.bf16.msra.mxu0 %v10974_v44  ;;  %7429 = vmatprep.subr.bf16.mxu1 %v10979_v45  ;;  %v11040_v44 = vld [vmem:[#allocation9 + $0xe0] ss:$48 sps:$4 sm:$0xff]   ;;  %v11045_v45 = vld [vmem:[#allocation9 + $0x127c] ss:$48 sps:$4 sm:$0xff]  }
 0x3ec   :  { %7470 = vmatprep.subr.bf16.mxu0 %v10982_v20  ;;  %v11048_v20 = vld [vmem:[#allocation9 + $0x84] ss:$48 sps:$4 sm:$0xff]  }
 0x3ee   :  { %7430 = vmatpush2.bf16.msra.mxu1 %v10977_v46  ;;  %v11043_v46 = vld [vmem:[#allocation9 + $0x1278] ss:$48 sps:$4 sm:$0xff]  }
 0x3ef   :  { %7471 = vmatpush2.bf16.msra.mxu0 %v10980_v47  ;;  %7431 = vmatprep.subr.bf16.mxu1 %v10985_v48  ;;  %v11046_v47 = vld [vmem:[#allocation9 + $0x80] ss:$48 sps:$4 sm:$0xff]   ;;  %v11051_v48 = vld [vmem:[#allocation9 + $0x121c] ss:$48 sps:$4 sm:$0xff]  }
 0x3f0   :  { %7472 = vmatprep.subr.bf16.mxu0 %v10988_v49  ;;  %v11054_v49 = vld [vmem:[#allocation9 + $0x24] ss:$48 sps:$4 sm:$0xff]  }
 0x3f2   :  { %7432 = vmatpush2.bf16.msra.mxu1 %v10983_v51  ;;  %v11049_v51 = vld [vmem:[#allocation9 + $0x1218] ss:$48 sps:$4 sm:$0xff]  }
 0x3f3   :  { %7473 = vmatpush2.bf16.msra.mxu0 %v10986_v53  ;;  %7433 = vmatprep.subr.bf16.mxu1 %v10991_v54  ;;  %v11052_v53 = vld [vmem:[#allocation9 + $0x20] ss:$48 sps:$4 sm:$0xff]   ;;  %v11057_v54 = vld [vmem:[#allocation9 + $0x17bc] ss:$48 sps:$4 sm:$0xff]  }
 0x3f4   :  { %7474 = vmatprep.subr.bf16.mxu0 %v10994_v55  ;;  %v11060_v55 = vld [vmem:[#allocation9 + $0x5c4] ss:$48 sps:$4 sm:$0xff]  }
 0x3f6   :  { %7434 = vmatpush2.bf16.msra.mxu1 %v10989_v56  ;;  %v11055_v56 = vld [vmem:[#allocation9 + $0x17b8] ss:$48 sps:$4 sm:$0xff]  }
 0x3f7   :  { %7475 = vmatpush2.bf16.msra.mxu0 %v10992_v62  ;;  %7435 = vmatprep.subr.bf16.mxu1 %v10997_v1  ;;  %v11058_v62 = vld [vmem:[#allocation9 + $0x5c0] ss:$48 sps:$4 sm:$0xff]   ;;  %v11063_v1 = vld [vmem:[#allocation9 + $0x175c] ss:$48 sps:$4 sm:$0xff]  }
 0x3f8   :  { %7476 = vmatprep.subr.bf16.mxu0 %v11000_v2  ;;  %v11066_v2 = vld [vmem:[#allocation9 + $0x564] ss:$48 sps:$4 sm:$0xff]  }
 0x3fa   :  { %7436 = vmatpush2.bf16.msra.mxu1 %v10995_v26  ;;  %v11061_v26 = vld [vmem:[#allocation9 + $0x1758] ss:$48 sps:$4 sm:$0xff]  }
 0x3fb   :  { %7477 = vmatpush2.bf16.msra.mxu0 %v10998_v3  ;;  %7437 = vmatprep.subr.bf16.mxu1 %v11003_v5  ;;  %v11064_v3 = vld [vmem:[#allocation9 + $0x560] ss:$48 sps:$4 sm:$0xff]   ;;  %v11069_v5 = vld [vmem:[#allocation9 + $0x16fc] ss:$48 sps:$4 sm:$0xff]  }
 0x3fc   :  { %7478 = vmatprep.subr.bf16.mxu0 %v11006_v6  ;;  %v11072_v6 = vld [vmem:[#allocation9 + $0x504] ss:$48 sps:$4 sm:$0xff]  }
 0x3fe   :  { %7438 = vmatpush2.bf16.msra.mxu1 %v11001_v7  ;;  %v11067_v7 = vld [vmem:[#allocation9 + $0x16f8] ss:$48 sps:$4 sm:$0xff]  }
 0x3ff   :  { %7479 = vmatpush2.bf16.msra.mxu0 %v11004_v8  ;;  %7489 = vmatprep.subr.bf16.mxu1 %v11009_v9  ;;  %v11070_v8 = vld [vmem:[#allocation9 + $0x500] ss:$48 sps:$4 sm:$0xff]   ;;  %v11075_v9 = vld [vmem:[#allocation9 + $0x169c] ss:$48 sps:$4 sm:$0xff]  }
 0x400   :  { %7530 = vmatprep.subr.bf16.mxu0 %v11012_v10  ;;  %v11078_v10 = vld [vmem:[#allocation9 + $0x4a4] ss:$48 sps:$4 sm:$0xff]  }
 0x401   :  { %v7195_v16 = vpop.f32.mrf.mxu1  ;;  %7440 = vmatmul.mubr.bf16.vlgmr.msra.gmra.mxu1 %v11778_v40 }
 0x402   :  { %v11842_v18 = vadd.f32 %v7195_v16, %v11834_v63  ;;  %v11844_v19 = vpop.f32.mrf.mxu0  ;;  %7481 = vmatmul.mubr.bf16.vlgmr.msra.gmra.mxu0 %v11784_v52  ;;  %7490 = vmatpush1.bf16.msra.mxu1 %v11007_v11  ;;  %v11024_v63 = vld [vmem:[#allocation9 + $0x204] ss:$48 sps:$4 sm:$0xff]   ;;  %v11073_v11 = vld [vmem:[#allocation9 + $0x1698] ss:$48 sps:$4 sm:$0xff]  }
 0x403   :  { %7521 = vmatprep.mubr.bf16.mxu1 %v11789_v35  ;;  %7531 = vmatpush1.bf16.msra.mxu0 %v11010_v30  ;;  %v7197_v22 = vpop.f32.mrf.mxu1  ;;  %v11076_v30 = vld [vmem:[#allocation9 + $0x4a0] ss:$48 sps:$4 sm:$0xff]   ;;  %v11084_v16 = vld [vmem:[#allocation9 + $0x444] ss:$48 sps:$4 sm:$0xff]  }
 0x404   :  { %7562 = vmatprep.mubr.bf16.mxu0 %v11768_v29  ;;  %v11850_v24 = vadd.f32 %v7197_v22, %v11838_v4  ;;  %v11852_v14 = vpop.f32.mrf.mxu0  ;;  %7491 = vmatprep.subr.bf16.mxu1 %v11015_v12  ;;  %v11025_v4 = vld [vmem:[#allocation9 + $0x1398] ss:$48 sps:$4 sm:$0xff]   ;;  %v11081_v12 = vld [vmem:[#allocation9 + $0x163c] ss:$48 sps:$4 sm:$0xff]  }
 0x405   :  { %v7199_v15 = vpop.f32.mrf.mxu1  ;;  %7532 = vmatprep.subr.bf16.mxu0 %v11018_v17  ;;  %v11079_v17 = vld [vmem:[#allocation9 + $0x1638] ss:$48 sps:$4 sm:$0xff]   ;;  %v11087_v22 = vld [vmem:[#allocation9 + $0x15dc] ss:$48 sps:$4 sm:$0xff]  }
 0x406   :  { %v7240_v25 = vpop.f32.mrf.mxu0  ;;  %7492 = vmatpush1.bf16.msra.mxu1 %v11013_v21  ;;  %v11082_v21 = vld [vmem:[#allocation9 + $0x440] ss:$48 sps:$4 sm:$0xff]   ;;  %v11093_v15 = vld [vmem:[#allocation9 + $0x157c] ss:$48 sps:$4 sm:$0xff]  }
 0x407   :  { %7533 = vmatpush1.bf16.msra.mxu0 %v11016_v61  ;;  %v7200_v27 = vpop.f32.mrf.mxu1  ;;  %7493 = vmatprep.subr.bf16.mxu1 %v11021_v23  ;;  %v11090_v61 = vld [vmem:[#allocation9 + $0x3e4] ss:$48 sps:$4 sm:$0xff]   ;;  %v11085_v23 = vld [vmem:[#allocation9 + $0x15d8] ss:$48 sps:$4 sm:$0xff]  }
 0x408   :  { %v7241_v32 = vpop.f32.mrf.mxu0  ;;  %7534 = vmatprep.subr.bf16.mxu0 %v11024_v63  ;;  %v11088_v63 = vld [vmem:[#allocation9 + $0x3e0] ss:$48 sps:$4 sm:$0xff]   ;;  %v11096_v25 = vld [vmem:[#allocation9 + $0x384] ss:$48 sps:$4 sm:$0xff]  }
 0x409   :  { %v11094_v27 = vld [vmem:[#allocation9 + $0x380] ss:$48 sps:$4 sm:$0xff]   ;;  %v11097_v32 = vld [vmem:[#allocation9 + $0x1518] ss:$48 sps:$4 sm:$0xff]  }
 0x40a   :  { %7494 = vmatpush1.bf16.msra.mxu1 %v11019_v0  ;;  %v11091_v0 = vld [vmem:[#allocation9 + $0x1578] ss:$48 sps:$4 sm:$0xff]  }
 0x40b   :  { %7535 = vmatpush1.bf16.msra.mxu0 %v11022_v60  ;;  %7495 = vmatprep.subr.bf16.mxu1 %v11027_v31  ;;  %v11099_v60 = vld [vmem:[#allocation9 + $0x151c] ss:$48 sps:$4 sm:$0xff]   ;;  %v11102_v31 = vld [vmem:[#allocation9 + $0x324] ss:$48 sps:$4 sm:$0xff]  }
 0x40c   :  { %7536 = vmatprep.subr.bf16.mxu0 %v11030_v33  ;;  %v11100_v33 = vld [vmem:[#allocation9 + $0x320] ss:$48 sps:$4 sm:$0xff]  }
 0x40e   :  { %7496 = vmatpush1.bf16.msra.mxu1 %v11025_v4  ;;  %v11105_v4 = vld [vmem:[#allocation9 + $0x8c4] ss:$48 sps:$4 sm:$0xff]  }
 0x40f   :  { %7537 = vmatpush1.bf16.msra.mxu0 %v11028_v57  ;;  %7497 = vmatprep.subr.bf16.mxu1 %v11033_v36  ;;  %v11108_v57 = vld [vmem:[#allocation9 + $0xec4] ss:$48 sps:$4 sm:$0xff]   ;;  %v11103_v36 = vld [vmem:[#allocation9 + $0x8c0] ss:$48 sps:$4 sm:$0xff]  }
 0x410   :  { %7538 = vmatprep.subr.bf16.mxu0 %v11036_v13  ;;  %v11106_v13 = vld [vmem:[#allocation9 + $0xec0] ss:$48 sps:$4 sm:$0xff]  }
 0x412   :  { %7498 = vmatpush1.bf16.msra.mxu1 %v11031_v58  ;;  %v11111_v58 = vld [vmem:[#allocation9 + $0x864] ss:$48 sps:$4 sm:$0xff]  }
 0x413   :  { %7539 = vmatpush1.bf16.msra.mxu0 %v11034_v39  ;;  %7499 = vmatprep.subr.bf16.mxu1 %v11039_v41  ;;  %v11114_v41 = vld [vmem:[#allocation9 + $0xe64] ss:$48 sps:$4 sm:$0xff]  }
 0x414   :  { %7540 = vmatprep.subr.bf16.mxu0 %v11042_v42 }
 0x416   :  { %7500 = vmatpush1.bf16.msra.mxu1 %v11037_v43 }
 0x417   :  { %7541 = vmatpush1.bf16.msra.mxu0 %v11040_v44  ;;  %7501 = vmatprep.subr.bf16.mxu1 %v11045_v45  ;;  %v11109_v44 = vld [vmem:[#allocation9 + $0x860] ss:$48 sps:$4 sm:$0xff]  }
 0x418   :  { %7542 = vmatprep.subr.bf16.mxu0 %v11048_v20  ;;  %v11112_v20 = vld [vmem:[#allocation9 + $0xe60] ss:$48 sps:$4 sm:$0xff]  }
 0x41a   :  { %7502 = vmatpush1.bf16.msra.mxu1 %v11043_v46  ;;  %v11117_v46 = vld [vmem:[#allocation9 + $0x804] ss:$48 sps:$4 sm:$0xff]  }
 0x41b   :  { %7543 = vmatpush1.bf16.msra.mxu0 %v11046_v47  ;;  %7503 = vmatprep.subr.bf16.mxu1 %v11051_v48 }
 0x41c   :  { %7544 = vmatprep.subr.bf16.mxu0 %v11054_v49 }
 0x41e   :  { %7504 = vmatpush1.bf16.msra.mxu1 %v11049_v51 }
 0x41f   :  { %7545 = vmatpush1.bf16.msra.mxu0 %v11052_v53  ;;  %7505 = vmatprep.subr.bf16.mxu1 %v11057_v54 }
 0x420   :  { %7546 = vmatprep.subr.bf16.mxu0 %v11060_v55  ;;  %v11115_v55 = vld [vmem:[#allocation9 + $0x800] ss:$48 sps:$4 sm:$0xff]  }
 0x422   :  { %7506 = vmatpush2.bf16.msra.mxu1 %v11055_v56 }
 0x423   :  { %7547 = vmatpush2.bf16.msra.mxu0 %v11058_v62  ;;  %7507 = vmatprep.subr.bf16.mxu1 %v11063_v1  ;;  %v11118_v62 = vld [vmem:[#allocation9 + $0xe00] ss:$48 sps:$4 sm:$0xff]   ;;  %v11123_v1 = vld [vmem:[#allocation9 + $0x7a4] ss:$48 sps:$4 sm:$0xff]  }
 0x424   :  { %7548 = vmatprep.subr.bf16.mxu0 %v11066_v2 }
 0x426   :  { %7508 = vmatpush2.bf16.msra.mxu1 %v11061_v26  ;;  %v11126_v26 = vld [vmem:[#allocation9 + $0xda4] ss:$48 sps:$4 sm:$0xff]  }
 0x427   :  { %7549 = vmatpush2.bf16.msra.mxu0 %v11064_v3  ;;  %7509 = vmatprep.subr.bf16.mxu1 %v11069_v5  ;;  %v11124_v3 = vld [vmem:[#allocation9 + $0xda0] ss:$48 sps:$4 sm:$0xff]   ;;  %v11129_v5 = vld [vmem:[#allocation9 + $0x744] ss:$48 sps:$4 sm:$0xff]  }
 0x428   :  { %7550 = vmatprep.subr.bf16.mxu0 %v11072_v6  ;;  %v11132_v6 = vld [vmem:[#allocation9 + $0xd44] ss:$48 sps:$4 sm:$0xff]  }
 0x42a   :  { %7510 = vmatpush2.bf16.msra.mxu1 %v11067_v7  ;;  %v11127_v7 = vld [vmem:[#allocation9 + $0x740] ss:$48 sps:$4 sm:$0xff]  }
 0x42b   :  { %7551 = vmatpush2.bf16.msra.mxu0 %v11070_v8  ;;  %7511 = vmatprep.subr.bf16.mxu1 %v11075_v9  ;;  %v11130_v8 = vld [vmem:[#allocation9 + $0xd40] ss:$48 sps:$4 sm:$0xff]   ;;  %v11135_v9 = vld [vmem:[#allocation9 + $0x6e4] ss:$48 sps:$4 sm:$0xff]  }
 0x42c   :  { %7552 = vmatprep.subr.bf16.mxu0 %v11078_v10  ;;  %v11138_v10 = vld [vmem:[#allocation9 + $0xce4] ss:$48 sps:$4 sm:$0xff]  }
 0x42e   :  { %7512 = vmatpush2.bf16.msra.mxu1 %v11073_v11  ;;  %v11133_v11 = vld [vmem:[#allocation9 + $0x6e0] ss:$48 sps:$4 sm:$0xff]  }
 0x42f   :  { %7553 = vmatpush2.bf16.msra.mxu0 %v11076_v30  ;;  %7513 = vmatprep.subr.bf16.mxu1 %v11081_v12  ;;  %v11136_v30 = vld [vmem:[#allocation9 + $0xce0] ss:$48 sps:$4 sm:$0xff]   ;;  %v11141_v12 = vld [vmem:[#allocation9 + $0x684] ss:$48 sps:$4 sm:$0xff]  }
 0x430   :  { %7554 = vmatprep.subr.bf16.mxu0 %v11084_v16  ;;  %v11144_v16 = vld [vmem:[#allocation9 + $0xc84] ss:$48 sps:$4 sm:$0xff]  }
 0x432   :  { %7514 = vmatpush2.bf16.msra.mxu1 %v11079_v17  ;;  %v11139_v17 = vld [vmem:[#allocation9 + $0x680] ss:$48 sps:$4 sm:$0xff]  }
 0x433   :  { %7555 = vmatpush2.bf16.msra.mxu0 %v11082_v21  ;;  %7515 = vmatprep.subr.bf16.mxu1 %v11087_v22  ;;  %v11142_v21 = vld [vmem:[#allocation9 + $0xc80] ss:$48 sps:$4 sm:$0xff]   ;;  %v11147_v22 = vld [vmem:[#allocation9 + $0x624] ss:$48 sps:$4 sm:$0xff]  }
 0x434   :  { %7556 = vmatprep.subr.bf16.mxu0 %v11090_v61  ;;  %v11150_v61 = vld [vmem:[#allocation9 + $0xc24] ss:$48 sps:$4 sm:$0xff]  }
 0x436   :  { %7516 = vmatpush2.bf16.msra.mxu1 %v11085_v23  ;;  %v11145_v23 = vld [vmem:[#allocation9 + $0x620] ss:$48 sps:$4 sm:$0xff]  }
 0x437   :  { %7557 = vmatpush2.bf16.msra.mxu0 %v11088_v63  ;;  %7517 = vmatprep.subr.bf16.mxu1 %v11093_v15  ;;  %v11148_v63 = vld [vmem:[#allocation9 + $0xc20] ss:$48 sps:$4 sm:$0xff]   ;;  %v11153_v15 = vld [vmem:[#allocation9 + $0xbc4] ss:$48 sps:$4 sm:$0xff]  }
 0x438   :  { %7558 = vmatprep.subr.bf16.mxu0 %v11096_v25  ;;  %v11156_v25 = vld [vmem:[#allocation9 + $0x11c4] ss:$48 sps:$4 sm:$0xff]  }
 0x43a   :  { %7518 = vmatpush2.bf16.msra.mxu1 %v11091_v0  ;;  %v11151_v0 = vld [vmem:[#allocation9 + $0xbc0] ss:$48 sps:$4 sm:$0xff]  }
 0x43b   :  { %7559 = vmatpush2.bf16.msra.mxu0 %v11094_v27  ;;  %7519 = vmatprep.subr.bf16.mxu1 %v11099_v60  ;;  %v11154_v27 = vld [vmem:[#allocation9 + $0x11c0] ss:$48 sps:$4 sm:$0xff]   ;;  %v11159_v60 = vld [vmem:[#allocation9 + $0xb64] ss:$48 sps:$4 sm:$0xff]  }
 0x43c   :  { %7560 = vmatprep.subr.bf16.mxu0 %v11102_v31  ;;  %v11162_v31 = vld [vmem:[#allocation9 + $0x1164] ss:$48 sps:$4 sm:$0xff]  }
 0x43e   :  { %7520 = vmatpush2.bf16.msra.mxu1 %v11097_v32  ;;  %v11157_v32 = vld [vmem:[#allocation9 + $0xb60] ss:$48 sps:$4 sm:$0xff]  }
 0x43f   :  { %7561 = vmatpush2.bf16.msra.mxu0 %v11100_v33  ;;  %7571 = vmatprep.subr.bf16.mxu1 %v11105_v4  ;;  %v11160_v33 = vld [vmem:[#allocation9 + $0x1160] ss:$48 sps:$4 sm:$0xff]   ;;  %v11165_v4 = vld [vmem:[#allocation9 + $0xb04] ss:$48 sps:$4 sm:$0xff]  }
 0x440   :  { %7612 = vmatprep.subr.bf16.mxu0 %v11108_v57  ;;  %v11168_v57 = vld [vmem:[#allocation9 + $0x1104] ss:$48 sps:$4 sm:$0xff]  }
 0x441   :  { %v7277_v39 = vpop.f32.mrf.mxu1  ;;  %7522 = vmatmul.mubr.bf16.vlgmr.msra.gmra.mxu1 %v11791_v37 }
 0x442   :  { %v7278_v42 = vadd.f32 %v7277_v39, %v11844_v19  ;;  %v7318_v43 = vpop.f32.mrf.mxu0  ;;  %7563 = vmatmul.mubr.bf16.vlgmr.msra.gmra.mxu0 %v11773_v59  ;;  %7572 = vmatpush1.bf16.msra.mxu1 %v11103_v36  ;;  %v11120_v19 = vld [vmem:[#allocation9 + $0xe04] ss:$48 sps:$4 sm:$0xff]   ;;  %v11163_v36 = vld [vmem:[#allocation9 + $0xb00] ss:$48 sps:$4 sm:$0xff]  }
 0x443   :  { %7603 = vmatprep.mubr.bf16.mxu1 %v11776_v38  ;;  %7613 = vmatpush1.bf16.msra.mxu0 %v11106_v13  ;;  %v7279_v45 = vpop.f32.mrf.mxu1  ;;  %v11166_v13 = vld [vmem:[#allocation9 + $0x1100] ss:$48 sps:$4 sm:$0xff]   ;;  %v11174_v39 = vld [vmem:[#allocation9 + $0x10a4] ss:$48 sps:$4 sm:$0xff]  }
 0x444   :  { %v11858_v47 = vadd.f32 %v7318_v43, %v7278_v42  ;;  %7644 = vmatprep.mubr.bf16.mxu0 %v11782_v50  ;;  %v7280_v48 = vadd.f32 %v7279_v45, %v11852_v14  ;;  %v7320_v49 = vpop.f32.mrf.mxu0  ;;  %7573 = vmatprep.subr.bf16.mxu1 %v11111_v58  ;;  %v11121_v14 = vld [vmem:[#allocation9 + $0x7a0] ss:$48 sps:$4 sm:$0xff]   ;;  %v11171_v58 = vld [vmem:[#allocation9 + $0xaa4] ss:$48 sps:$4 sm:$0xff]  }
 0x445   :  { %v7281_v51 = vpop.f32.mrf.mxu1  ;;  %7614 = vmatprep.subr.bf16.mxu0 %v11114_v41  ;;  %v11169_v41 = vld [vmem:[#allocation9 + $0xaa0] ss:$48 sps:$4 sm:$0xff]   ;;  %v11177_v43 = vld [vmem:[#allocation9 + $0xa44] ss:$48 sps:$4 sm:$0xff]  }
 0x446   :  { %v11862_v53 = vadd.f32 %v7320_v49, %v7280_v48  ;;  %v7322_v54 = vpop.f32.mrf.mxu0  ;;  %7574 = vmatpush1.bf16.msra.mxu1 %v11109_v44  ;;  %v11172_v42 = vld [vmem:[#allocation9 + $0x10a0] ss:$48 sps:$4 sm:$0xff]   ;;  %v11180_v44 = vld [vmem:[#allocation9 + $0x1044] ss:$48 sps:$4 sm:$0xff]  }
 0x447   :  { %7615 = vmatpush1.bf16.msra.mxu0 %v11112_v20  ;;  %v7282_v56 = vpop.f32.mrf.mxu1  ;;  %7575 = vmatprep.subr.bf16.mxu1 %v11117_v46  ;;  %v11175_v45 = vld [vmem:[#allocation9 + $0xa40] ss:$48 sps:$4 sm:$0xff]   ;;  %v11183_v46 = vld [vmem:[#allocation9 + $0x9e4] ss:$48 sps:$4 sm:$0xff]  }
 0x448   :  { %v7323_v2 = vpop.f32.mrf.mxu0  ;;  %7616 = vmatprep.subr.bf16.mxu0 %v11120_v19  ;;  %v11178_v20 = vld [vmem:[#allocation9 + $0x1040] ss:$48 sps:$4 sm:$0xff]   ;;  %v11186_v48 = vld [vmem:[#allocation9 + $0xfe4] ss:$48 sps:$4 sm:$0xff]  }
 0x449   :  { %v11181_v49 = vld [vmem:[#allocation9 + $0x9e0] ss:$48 sps:$4 sm:$0xff]   ;;  %v11189_v51 = vld [vmem:[#allocation9 + $0x984] ss:$48 sps:$4 sm:$0xff]  }
 0x44a   :  { %7576 = vmatpush1.bf16.msra.mxu1 %v11115_v55  ;;  %v11184_v19 = vld [vmem:[#allocation9 + $0xfe0] ss:$48 sps:$4 sm:$0xff]   ;;  %v11192_v54 = vld [vmem:[#allocation9 + $0xf84] ss:$48 sps:$4 sm:$0xff]  }
 0x44b   :  { %7617 = vmatpush1.bf16.msra.mxu0 %v11118_v62  ;;  %7577 = vmatprep.subr.bf16.mxu1 %v11123_v1  ;;  %v11187_v55 = vld [vmem:[#allocation9 + $0x980] ss:$48 sps:$4 sm:$0xff]   ;;  %v11195_v62 = vld [vmem:[#allocation9 + $0x924] ss:$48 sps:$4 sm:$0xff]  }
 0x44c   :  { %7618 = vmatprep.subr.bf16.mxu0 %v11126_v26  ;;  %v11190_v56 = vld [vmem:[#allocation9 + $0xf80] ss:$48 sps:$4 sm:$0xff]   ;;  %v11198_v1 = vld [vmem:[#allocation9 + $0xf24] ss:$48 sps:$4 sm:$0xff]  }
 0x44d   :  { %v11193_v2 = vld [vmem:[#allocation9 + $0x920] ss:$48 sps:$4 sm:$0xff]  }
 0x44e   :  { %7578 = vmatpush1.bf16.msra.mxu1 %v11121_v14  ;;  %v11196_v26 = vld [vmem:[#allocation9 + $0xf20] ss:$48 sps:$4 sm:$0xff]   ;;  %v11201_v14 = vld [vmem:[#allocation9 + $0x14c4] ss:$48 sps:$4 sm:$0xff]  }
 0x44f   :  { %7619 = vmatpush1.bf16.msra.mxu0 %v11124_v3  ;;  %7579 = vmatprep.subr.bf16.mxu1 %v11129_v5  ;;  %v11204_v3 = vld [vmem:[#allocation9 + $0x2cc] ss:$48 sps:$4 sm:$0xff]   ;;  %v11199_v5 = vld [vmem:[#allocation9 + $0x14c0] ss:$48 sps:$4 sm:$0xff]  }
 0x450   :  { %7620 = vmatprep.subr.bf16.mxu0 %v11132_v6  ;;  %v11202_v6 = vld [vmem:[#allocation9 + $0x2c8] ss:$48 sps:$4 sm:$0xff]  }
 0x452   :  { %7580 = vmatpush1.bf16.msra.mxu1 %v11127_v7  ;;  %v11207_v7 = vld [vmem:[#allocation9 + $0x1464] ss:$48 sps:$4 sm:$0xff]  }
 0x453   :  { %7621 = vmatpush1.bf16.msra.mxu0 %v11130_v8  ;;  %7581 = vmatprep.subr.bf16.mxu1 %v11135_v9  ;;  %v11210_v9 = vld [vmem:[#allocation9 + $0x26c] ss:$48 sps:$4 sm:$0xff]  }
 0x454   :  { %7622 = vmatprep.subr.bf16.mxu0 %v11138_v10 }
 0x456   :  { %7582 = vmatpush1.bf16.msra.mxu1 %v11133_v11 }
 0x457   :  { %7623 = vmatpush1.bf16.msra.mxu0 %v11136_v30  ;;  %7583 = vmatprep.subr.bf16.mxu1 %v11141_v12  ;;  %v11205_v30 = vld [vmem:[#allocation9 + $0x1460] ss:$48 sps:$4 sm:$0xff]  }
 0x458   :  { %7624 = vmatprep.subr.bf16.mxu0 %v11144_v16  ;;  %v11208_v16 = vld [vmem:[#allocation9 + $0x268] ss:$48 sps:$4 sm:$0xff]  }
 0x45a   :  { %7584 = vmatpush1.bf16.msra.mxu1 %v11139_v17  ;;  %v11213_v17 = vld [vmem:[#allocation9 + $0x1404] ss:$48 sps:$4 sm:$0xff]  }
 0x45b   :  { %7625 = vmatpush1.bf16.msra.mxu0 %v11142_v21  ;;  %7585 = vmatprep.subr.bf16.mxu1 %v11147_v22 }
 0x45c   :  { %7626 = vmatprep.subr.bf16.mxu0 %v11150_v61 }
 0x45e   :  { %7586 = vmatpush1.bf16.msra.mxu1 %v11145_v23 }
 0x45f   :  { %7627 = vmatpush1.bf16.msra.mxu0 %v11148_v63  ;;  %7587 = vmatprep.subr.bf16.mxu1 %v11153_v15  ;;  %v11211_v63 = vld [vmem:[#allocation9 + $0x1400] ss:$48 sps:$4 sm:$0xff]  }
 0x460   :  { %7628 = vmatprep.subr.bf16.mxu0 %v11156_v25  ;;  %v11214_v25 = vld [vmem:[#allocation9 + $0x208] ss:$48 sps:$4 sm:$0xff]  }
 0x462   :  { %7588 = vmatpush2.bf16.msra.mxu1 %v11151_v0  ;;  %v11219_v0 = vld [vmem:[#allocation9 + $0x13a4] ss:$48 sps:$4 sm:$0xff]  }
 0x463   :  { %7629 = vmatpush2.bf16.msra.mxu0 %v11154_v27  ;;  %7589 = vmatprep.subr.bf16.mxu1 %v11159_v60  ;;  %v11220_v60 = vld [vmem:[#allocation9 + $0x1a8] ss:$48 sps:$4 sm:$0xff]  }
 0x464   :  { %7630 = vmatprep.subr.bf16.mxu0 %v11162_v31  ;;  %v11225_v31 = vld [vmem:[#allocation9 + $0x1344] ss:$48 sps:$4 sm:$0xff]  }
 0x466   :  { %7590 = vmatpush2.bf16.msra.mxu1 %v11157_v32  ;;  %v11228_v32 = vld [vmem:[#allocation9 + $0x14c] ss:$48 sps:$4 sm:$0xff]  }
 0x467   :  { %7631 = vmatpush2.bf16.msra.mxu0 %v11160_v33  ;;  %7591 = vmatprep.subr.bf16.mxu1 %v11165_v4  ;;  %v11223_v33 = vld [vmem:[#allocation9 + $0x1340] ss:$48 sps:$4 sm:$0xff]   ;;  %v11226_v4 = vld [vmem:[#allocation9 + $0x148] ss:$48 sps:$4 sm:$0xff]  }
 0x468   :  { %7632 = vmatprep.subr.bf16.mxu0 %v11168_v57  ;;  %v11231_v57 = vld [vmem:[#allocation9 + $0x12e4] ss:$48 sps:$4 sm:$0xff]  }
 0x46a   :  { %7592 = vmatpush2.bf16.msra.mxu1 %v11163_v36  ;;  %v11234_v36 = vld [vmem:[#allocation9 + $0xec] ss:$48 sps:$4 sm:$0xff]  }
 0x46b   :  { %7633 = vmatpush2.bf16.msra.mxu0 %v11166_v13  ;;  %7593 = vmatprep.subr.bf16.mxu1 %v11171_v58  ;;  %v11229_v13 = vld [vmem:[#allocation9 + $0x12e0] ss:$48 sps:$4 sm:$0xff]   ;;  %v11232_v58 = vld [vmem:[#allocation9 + $0xe8] ss:$48 sps:$4 sm:$0xff]  }
 0x46c   :  { %7634 = vmatprep.subr.bf16.mxu0 %v11174_v39  ;;  %v11237_v39 = vld [vmem:[#allocation9 + $0x1284] ss:$48 sps:$4 sm:$0xff]  }
 0x46e   :  { %7594 = vmatpush2.bf16.msra.mxu1 %v11169_v41  ;;  %v11240_v41 = vld [vmem:[#allocation9 + $0x8c] ss:$48 sps:$4 sm:$0xff]  }
 0x46f   :  { %7635 = vmatpush2.bf16.msra.mxu0 %v11172_v42  ;;  %7595 = vmatprep.subr.bf16.mxu1 %v11177_v43  ;;  %v11235_v42 = vld [vmem:[#allocation9 + $0x1280] ss:$48 sps:$4 sm:$0xff]   ;;  %v11238_v43 = vld [vmem:[#allocation9 + $0x88] ss:$48 sps:$4 sm:$0xff]  }
 0x470   :  { %7636 = vmatprep.subr.bf16.mxu0 %v11180_v44  ;;  %v11243_v44 = vld [vmem:[#allocation9 + $0x1224] ss:$48 sps:$4 sm:$0xff]  }
 0x472   :  { %7596 = vmatpush2.bf16.msra.mxu1 %v11175_v45  ;;  %v11246_v45 = vld [vmem:[#allocation9 + $0x2c] ss:$48 sps:$4 sm:$0xff]  }
 0x473   :  { %7637 = vmatpush2.bf16.msra.mxu0 %v11178_v20  ;;  %7597 = vmatprep.subr.bf16.mxu1 %v11183_v46  ;;  %v11241_v20 = vld [vmem:[#allocation9 + $0x1220] ss:$48 sps:$4 sm:$0xff]   ;;  %v11244_v46 = vld [vmem:[#allocation9 + $0x28] ss:$48 sps:$4 sm:$0xff]  }
 0x474   :  { %7638 = vmatprep.subr.bf16.mxu0 %v11186_v48  ;;  %v11249_v48 = vld [vmem:[#allocation9 + $0x17c4] ss:$48 sps:$4 sm:$0xff]  }
 0x476   :  { %7598 = vmatpush2.bf16.msra.mxu1 %v11181_v49  ;;  %v11252_v49 = vld [vmem:[#allocation9 + $0x5cc] ss:$48 sps:$4 sm:$0xff]  }
 0x477   :  { %7639 = vmatpush2.bf16.msra.mxu0 %v11184_v19  ;;  %7599 = vmatprep.subr.bf16.mxu1 %v11189_v51  ;;  %v11247_v19 = vld [vmem:[#allocation9 + $0x17c0] ss:$48 sps:$4 sm:$0xff]   ;;  %v11250_v51 = vld [vmem:[#allocation9 + $0x5c8] ss:$48 sps:$4 sm:$0xff]  }
 0x478   :  { %7640 = vmatprep.subr.bf16.mxu0 %v11192_v54  ;;  %v11255_v54 = vld [vmem:[#allocation9 + $0x1764] ss:$48 sps:$4 sm:$0xff]  }
 0x47a   :  { %7600 = vmatpush2.bf16.msra.mxu1 %v11187_v55  ;;  %v11258_v55 = vld [vmem:[#allocation9 + $0x56c] ss:$48 sps:$4 sm:$0xff]  }
 0x47b   :  { %7641 = vmatpush2.bf16.msra.mxu0 %v11190_v56  ;;  %7601 = vmatprep.subr.bf16.mxu1 %v11195_v62  ;;  %v11253_v56 = vld [vmem:[#allocation9 + $0x1760] ss:$48 sps:$4 sm:$0xff]   ;;  %v11256_v62 = vld [vmem:[#allocation9 + $0x568] ss:$48 sps:$4 sm:$0xff]  }
 0x47c   :  { %7642 = vmatprep.subr.bf16.mxu0 %v11198_v1  ;;  %v11261_v1 = vld [vmem:[#allocation9 + $0x1704] ss:$48 sps:$4 sm:$0xff]  }
 0x47e   :  { %7602 = vmatpush2.bf16.msra.mxu1 %v11193_v2  ;;  %v11264_v2 = vld [vmem:[#allocation9 + $0x50c] ss:$48 sps:$4 sm:$0xff]  }
 0x47f   :  { %7643 = vmatpush2.bf16.msra.mxu0 %v11196_v26  ;;  %7653 = vmatprep.subr.bf16.mxu1 %v11201_v14  ;;  %v11259_v26 = vld [vmem:[#allocation9 + $0x1700] ss:$48 sps:$4 sm:$0xff]   ;;  %v11262_v14 = vld [vmem:[#allocation9 + $0x508] ss:$48 sps:$4 sm:$0xff]  }
 0x480   :  { %7694 = vmatprep.subr.bf16.mxu0 %v11204_v3  ;;  %v11267_v3 = vld [vmem:[#allocation9 + $0x16a4] ss:$48 sps:$4 sm:$0xff]  }
 0x481   :  { %v7359_v8 = vpop.f32.mrf.mxu1  ;;  %7604 = vmatmul.mubr.bf16.vlgmr.msra.gmra.mxu1 %v11778_v40 }
 0x482   :  { %v11866_v10 = vadd.f32 %v7359_v8, %v11858_v47  ;;  %v11868_v11 = vpop.f32.mrf.mxu0  ;;  %7645 = vmatmul.mubr.bf16.vlgmr.msra.gmra.mxu0 %v11784_v52  ;;  %7654 = vmatpush1.bf16.msra.mxu1 %v11199_v5  ;;  %v11216_v47 = vld [vmem:[#allocation9 + $0x20c] ss:$48 sps:$4 sm:$0xff]   ;;  %v11273_v8 = vld [vmem:[#allocation9 + $0x1644] ss:$48 sps:$4 sm:$0xff]  }
 0x483   :  { %7685 = vmatprep.mubr.bf16.mxu1 %v11789_v35  ;;  %7695 = vmatpush1.bf16.msra.mxu0 %v11202_v6  ;;  %v7361_v12 = vpop.f32.mrf.mxu1  ;;  %v11270_v5 = vld [vmem:[#allocation9 + $0x4ac] ss:$48 sps:$4 sm:$0xff]   ;;  %v11265_v6 = vld [vmem:[#allocation9 + $0x16a0] ss:$48 sps:$4 sm:$0xff]  }
 0x484   :  { %7726 = vmatprep.mubr.bf16.mxu0 %v11768_v29  ;;  %v11874_v21 = vadd.f32 %v7361_v12, %v11862_v53  ;;  %v11876_v22 = vpop.f32.mrf.mxu0  ;;  %7655 = vmatprep.subr.bf16.mxu1 %v11207_v7  ;;  %v11222_v29 = vld [vmem:[#allocation9 + $0x1ac] ss:$48 sps:$4 sm:$0xff]   ;;  %v11217_v53 = vld [vmem:[#allocation9 + $0x13a0] ss:$48 sps:$4 sm:$0xff]   ;;  %v11268_v7 = vld [vmem:[#allocation9 + $0x4a8] ss:$48 sps:$4 sm:$0xff]  }
 0x485   :  { %v7363_v61 = vpop.f32.mrf.mxu1  ;;  %7696 = vmatprep.subr.bf16.mxu0 %v11210_v9  ;;  %v11276_v9 = vld [vmem:[#allocation9 + $0x44c] ss:$48 sps:$4 sm:$0xff]   ;;  %v11274_v12 = vld [vmem:[#allocation9 + $0x448] ss:$48 sps:$4 sm:$0xff]  }
 0x486   :  { %v7404_v23 = vpop.f32.mrf.mxu0  ;;  %7656 = vmatpush1.bf16.msra.mxu1 %v11205_v30  ;;  %v11271_v30 = vld [vmem:[#allocation9 + $0x1640] ss:$48 sps:$4 sm:$0xff]   ;;  %v11280_v61 = vld [vmem:[#allocation9 + $0x3e8] ss:$48 sps:$4 sm:$0xff]  }
 0x487   :  { %7697 = vmatpush1.bf16.msra.mxu0 %v11208_v16  ;;  %v7364_v15 = vpop.f32.mrf.mxu1  ;;  %7657 = vmatprep.subr.bf16.mxu1 %v11213_v17  ;;  %v11279_v16 = vld [vmem:[#allocation9 + $0x15e4] ss:$48 sps:$4 sm:$0xff]   ;;  %v11282_v17 = vld [vmem:[#allocation9 + $0x3ec] ss:$48 sps:$4 sm:$0xff]  }
 0x488   :  { %v7405_v27 = vpop.f32.mrf.mxu0  ;;  %7698 = vmatprep.subr.bf16.mxu0 %v11216_v47  ;;  %v11277_v47 = vld [vmem:[#allocation9 + $0x15e0] ss:$48 sps:$4 sm:$0xff]   ;;  %v11285_v23 = vld [vmem:[#allocation9 + $0x1584] ss:$48 sps:$4 sm:$0xff]  }
 0x489   :  { %v11283_v15 = vld [vmem:[#allocation9 + $0x1580] ss:$48 sps:$4 sm:$0xff]   ;;  %v11294_v27 = vld [vmem:[#allocation9 + $0x32c] ss:$48 sps:$4 sm:$0xff]  }
 0x48a   :  { %7658 = vmatpush1.bf16.msra.mxu1 %v11211_v63  ;;  %v11288_v63 = vld [vmem:[#allocation9 + $0x38c] ss:$48 sps:$4 sm:$0xff]  }
 0x48b   :  { %7699 = vmatpush1.bf16.msra.mxu0 %v11214_v25  ;;  %7659 = vmatprep.subr.bf16.mxu1 %v11219_v0  ;;  %v11286_v25 = vld [vmem:[#allocation9 + $0x388] ss:$48 sps:$4 sm:$0xff]   ;;  %v11291_v0 = vld [vmem:[#allocation9 + $0x1524] ss:$48 sps:$4 sm:$0xff]  }
 0x48c   :  { %7700 = vmatprep.subr.bf16.mxu0 %v11222_v29  ;;  %v11289_v29 = vld [vmem:[#allocation9 + $0x1520] ss:$48 sps:$4 sm:$0xff]  }
 0x48e   :  { %7660 = vmatpush1.bf16.msra.mxu1 %v11217_v53  ;;  %v11292_v53 = vld [vmem:[#allocation9 + $0x328] ss:$48 sps:$4 sm:$0xff]  }
 0x48f   :  { %7701 = vmatpush1.bf16.msra.mxu0 %v11220_v60  ;;  %7661 = vmatprep.subr.bf16.mxu1 %v11225_v31  ;;  %v11297_v60 = vld [vmem:[#allocation9 + $0x8cc] ss:$48 sps:$4 sm:$0xff]  }
 0x490   :  { %7702 = vmatprep.subr.bf16.mxu0 %v11228_v32  ;;  %v11300_v31 = vld [vmem:[#allocation9 + $0xecc] ss:$48 sps:$4 sm:$0xff]   ;;  %v11295_v32 = vld [vmem:[#allocation9 + $0x8c8] ss:$48 sps:$4 sm:$0xff]  }
 0x492   :  { %7662 = vmatpush1.bf16.msra.mxu1 %v11223_v33  ;;  %v11298_v33 = vld [vmem:[#allocation9 + $0xec8] ss:$48 sps:$4 sm:$0xff]  }
 0x493   :  { %7703 = vmatpush1.bf16.msra.mxu0 %v11226_v4  ;;  %7663 = vmatprep.subr.bf16.mxu1 %v11231_v57  ;;  %v11303_v4 = vld [vmem:[#allocation9 + $0x86c] ss:$48 sps:$4 sm:$0xff]  }
 0x494   :  { %7704 = vmatprep.subr.bf16.mxu0 %v11234_v36  ;;  %v11306_v36 = vld [vmem:[#allocation9 + $0xe6c] ss:$48 sps:$4 sm:$0xff]  }
 0x496   :  { %7664 = vmatpush1.bf16.msra.mxu1 %v11229_v13 }
 0x497   :  { %7705 = vmatpush1.bf16.msra.mxu0 %v11232_v58  ;;  %7665 = vmatprep.subr.bf16.mxu1 %v11237_v39  ;;  %v11301_v39 = vld [vmem:[#allocation9 + $0x868] ss:$48 sps:$4 sm:$0xff]  }
 0x498   :  { %7706 = vmatprep.subr.bf16.mxu0 %v11240_v41 }
 0x49a   :  { %7666 = vmatpush1.bf16.msra.mxu1 %v11235_v42  ;;  %v11304_v42 = vld [vmem:[#allocation9 + $0xe68] ss:$48 sps:$4 sm:$0xff]  }
 0x49b   :  { %7707 = vmatpush1.bf16.msra.mxu0 %v11238_v43  ;;  %7667 = vmatprep.subr.bf16.mxu1 %v11243_v44  ;;  %v11309_v43 = vld [vmem:[#allocation9 + $0x80c] ss:$48 sps:$4 sm:$0xff]  }
 0x49c   :  { %7708 = vmatprep.subr.bf16.mxu0 %v11246_v45 }
 0x49e   :  { %7668 = vmatpush1.bf16.msra.mxu1 %v11241_v20 }
 0x49f   :  { %7709 = vmatpush1.bf16.msra.mxu0 %v11244_v46  ;;  %7669 = vmatprep.subr.bf16.mxu1 %v11249_v48 }
 0x4a0   :  { %7710 = vmatprep.subr.bf16.mxu0 %v11252_v49 }
 0x4a2   :  { %7670 = vmatpush2.bf16.msra.mxu1 %v11247_v19  ;;  %v11310_v19 = vld [vmem:[#allocation9 + $0xe08] ss:$48 sps:$4 sm:$0xff]  }
 0x4a3   :  { %7711 = vmatpush2.bf16.msra.mxu0 %v11250_v51  ;;  %7671 = vmatprep.subr.bf16.mxu1 %v11255_v54  ;;  %v11315_v51 = vld [vmem:[#allocation9 + $0x7ac] ss:$48 sps:$4 sm:$0xff]  }
 0x4a4   :  { %7712 = vmatprep.subr.bf16.mxu0 %v11258_v55  ;;  %v11316_v55 = vld [vmem:[#allocation9 + $0xda8] ss:$48 sps:$4 sm:$0xff]  }
 0x4a6   :  { %7672 = vmatpush2.bf16.msra.mxu1 %v11253_v56  ;;  %v11321_v56 = vld [vmem:[#allocation9 + $0x74c] ss:$48 sps:$4 sm:$0xff]  }
 0x4a7   :  { %7713 = vmatpush2.bf16.msra.mxu0 %v11256_v62  ;;  %7673 = vmatprep.subr.bf16.mxu1 %v11261_v1  ;;  %v11324_v62 = vld [vmem:[#allocation9 + $0xd4c] ss:$48 sps:$4 sm:$0xff]   ;;  %v11319_v1 = vld [vmem:[#allocation9 + $0x748] ss:$48 sps:$4 sm:$0xff]  }
 0x4a8   :  { %7714 = vmatprep.subr.bf16.mxu0 %v11264_v2  ;;  %v11322_v2 = vld [vmem:[#allocation9 + $0xd48] ss:$48 sps:$4 sm:$0xff]  }
 0x4aa   :  { %7674 = vmatpush2.bf16.msra.mxu1 %v11259_v26  ;;  %v11327_v26 = vld [vmem:[#allocation9 + $0x6ec] ss:$48 sps:$4 sm:$0xff]  }
 0x4ab   :  { %7715 = vmatpush2.bf16.msra.mxu0 %v11262_v14  ;;  %7675 = vmatprep.subr.bf16.mxu1 %v11267_v3  ;;  %v11330_v14 = vld [vmem:[#allocation9 + $0xcec] ss:$48 sps:$4 sm:$0xff]   ;;  %v11325_v3 = vld [vmem:[#allocation9 + $0x6e8] ss:$48 sps:$4 sm:$0xff]  }
 0x4ac   :  { %7716 = vmatprep.subr.bf16.mxu0 %v11270_v5  ;;  %v11328_v5 = vld [vmem:[#allocation9 + $0xce8] ss:$48 sps:$4 sm:$0xff]  }
 0x4ae   :  { %7676 = vmatpush2.bf16.msra.mxu1 %v11265_v6  ;;  %v11333_v6 = vld [vmem:[#allocation9 + $0x68c] ss:$48 sps:$4 sm:$0xff]  }
 0x4af   :  { %7717 = vmatpush2.bf16.msra.mxu0 %v11268_v7  ;;  %7677 = vmatprep.subr.bf16.mxu1 %v11273_v8  ;;  %v11336_v7 = vld [vmem:[#allocation9 + $0xc8c] ss:$48 sps:$4 sm:$0xff]   ;;  %v11331_v8 = vld [vmem:[#allocation9 + $0x688] ss:$48 sps:$4 sm:$0xff]  }
 0x4b0   :  { %7718 = vmatprep.subr.bf16.mxu0 %v11276_v9  ;;  %v11334_v9 = vld [vmem:[#allocation9 + $0xc88] ss:$48 sps:$4 sm:$0xff]  }
 0x4b2   :  { %7678 = vmatpush2.bf16.msra.mxu1 %v11271_v30  ;;  %v11339_v30 = vld [vmem:[#allocation9 + $0x62c] ss:$48 sps:$4 sm:$0xff]  }
 0x4b3   :  { %7719 = vmatpush2.bf16.msra.mxu0 %v11274_v12  ;;  %7679 = vmatprep.subr.bf16.mxu1 %v11279_v16  ;;  %v11342_v12 = vld [vmem:[#allocation9 + $0xc2c] ss:$48 sps:$4 sm:$0xff]   ;;  %v11337_v16 = vld [vmem:[#allocation9 + $0x628] ss:$48 sps:$4 sm:$0xff]  }
 0x4b4   :  { %7720 = vmatprep.subr.bf16.mxu0 %v11282_v17  ;;  %v11340_v17 = vld [vmem:[#allocation9 + $0xc28] ss:$48 sps:$4 sm:$0xff]  }
 0x4b6   :  { %7680 = vmatpush2.bf16.msra.mxu1 %v11277_v47  ;;  %v11345_v47 = vld [vmem:[#allocation9 + $0xbcc] ss:$48 sps:$4 sm:$0xff]  }
 0x4b7   :  { %7721 = vmatpush2.bf16.msra.mxu0 %v11280_v61  ;;  %7681 = vmatprep.subr.bf16.mxu1 %v11285_v23  ;;  %v11348_v61 = vld [vmem:[#allocation9 + $0x11cc] ss:$48 sps:$4 sm:$0xff]   ;;  %v11343_v23 = vld [vmem:[#allocation9 + $0xbc8] ss:$48 sps:$4 sm:$0xff]  }
 0x4b8   :  { %7722 = vmatprep.subr.bf16.mxu0 %v11288_v63  ;;  %v11346_v63 = vld [vmem:[#allocation9 + $0x11c8] ss:$48 sps:$4 sm:$0xff]  }
 0x4ba   :  { %7682 = vmatpush2.bf16.msra.mxu1 %v11283_v15  ;;  %v11351_v15 = vld [vmem:[#allocation9 + $0xb6c] ss:$48 sps:$4 sm:$0xff]  }
 0x4bb   :  { %7723 = vmatpush2.bf16.msra.mxu0 %v11286_v25  ;;  %7683 = vmatprep.subr.bf16.mxu1 %v11291_v0  ;;  %v11354_v25 = vld [vmem:[#allocation9 + $0x116c] ss:$48 sps:$4 sm:$0xff]   ;;  %v11349_v0 = vld [vmem:[#allocation9 + $0xb68] ss:$48 sps:$4 sm:$0xff]  }
 0x4bc   :  { %7724 = vmatprep.subr.bf16.mxu0 %v11294_v27  ;;  %v11352_v27 = vld [vmem:[#allocation9 + $0x1168] ss:$48 sps:$4 sm:$0xff]  }
 0x4be   :  { %7684 = vmatpush2.bf16.msra.mxu1 %v11289_v29  ;;  %v11357_v29 = vld [vmem:[#allocation9 + $0xb0c] ss:$48 sps:$4 sm:$0xff]  }
 0x4bf   :  { %7725 = vmatpush2.bf16.msra.mxu0 %v11292_v53  ;;  %7735 = vmatprep.subr.bf16.mxu1 %v11297_v60  ;;  %v11360_v53 = vld [vmem:[#allocation9 + $0x110c] ss:$48 sps:$4 sm:$0xff]   ;;  %v11355_v60 = vld [vmem:[#allocation9 + $0xb08] ss:$48 sps:$4 sm:$0xff]  }
 0x4c0   :  { %7776 = vmatprep.subr.bf16.mxu0 %v11300_v31  ;;  %v11358_v31 = vld [vmem:[#allocation9 + $0x1108] ss:$48 sps:$4 sm:$0xff]  }
 0x4c1   :  { %v7441_v57 = vpop.f32.mrf.mxu1  ;;  %7686 = vmatmul.mubr.bf16.vlgmr.msra.gmra.mxu1 %v11791_v37 }
 0x4c2   :  { %v7442_v13 = vadd.f32 %v7441_v57, %v11868_v11  ;;  %v7482_v58 = vpop.f32.mrf.mxu0  ;;  %7727 = vmatmul.mubr.bf16.vlgmr.msra.gmra.mxu0 %v11773_v59  ;;  %7736 = vmatpush1.bf16.msra.mxu1 %v11295_v32  ;;  %v11312_v11 = vld [vmem:[#allocation9 + $0xe0c] ss:$48 sps:$4 sm:$0xff]   ;;  %v11364_v57 = vld [vmem:[#allocation9 + $0x10a8] ss:$48 sps:$4 sm:$0xff]  }
 0x4c3   :  { %7767 = vmatprep.mubr.bf16.mxu1 %v11776_v38  ;;  %7777 = vmatpush1.bf16.msra.mxu0 %v11298_v33  ;;  %v7443_v41 = vpop.f32.mrf.mxu1  ;;  %v11307_v38 = vld [vmem:[#allocation9 + $0x808] ss:$48 sps:$4 sm:$0xff]   ;;  %v11363_v32 = vld [vmem:[#allocation9 + $0xaac] ss:$48 sps:$4 sm:$0xff]  }
 0x4c4   :  { %v11882_v44 = vadd.f32 %v7482_v58, %v7442_v13  ;;  %7808 = vmatprep.mubr.bf16.mxu0 %v11782_v50  ;;  %v7444_v45 = vadd.f32 %v7443_v41, %v11876_v22  ;;  %v7484_v20 = vpop.f32.mrf.mxu0  ;;  %7737 = vmatprep.subr.bf16.mxu1 %v11303_v4  ;;  %v11318_v50 = vld [vmem:[#allocation9 + $0xdac] ss:$48 sps:$4 sm:$0xff]   ;;  %v11313_v22 = vld [vmem:[#allocation9 + $0x7a8] ss:$48 sps:$4 sm:$0xff]  }
 0x4c5   :  { %v7445_v46 = vpop.f32.mrf.mxu1  ;;  %7778 = vmatprep.subr.bf16.mxu0 %v11306_v36  ;;  %v11366_v33 = vld [vmem:[#allocation9 + $0x10ac] ss:$48 sps:$4 sm:$0xff]   ;;  %v11361_v4 = vld [vmem:[#allocation9 + $0xaa8] ss:$48 sps:$4 sm:$0xff]  }
 0x4c6   :  { %v11886_v59 = vadd.f32 %v7484_v20, %v7444_v45  ;;  %v7486_v48 = vpop.f32.mrf.mxu0  ;;  %7738 = vmatpush1.bf16.msra.mxu1 %v11301_v39  ;;  %v11369_v36 = vld [vmem:[#allocation9 + $0xa4c] ss:$48 sps:$4 sm:$0xff]   ;;  %v11367_v58 = vld [vmem:[#allocation9 + $0xa48] ss:$48 sps:$4 sm:$0xff]  }
 0x4c7   :  { %7779 = vmatpush1.bf16.msra.mxu0 %v11304_v42  ;;  %v7446_v49 = vpop.f32.mrf.mxu1  ;;  %7739 = vmatprep.subr.bf16.mxu1 %v11309_v43  ;;  %v11372_v13 = vld [vmem:[#allocation9 + $0x104c] ss:$48 sps:$4 sm:$0xff]   ;;  %v11370_v39 = vld [vmem:[#allocation9 + $0x1048] ss:$48 sps:$4 sm:$0xff]  }
 0x4c8   :  { %v7487_v54 = vpop.f32.mrf.mxu0  ;;  %7780 = vmatprep.subr.bf16.mxu0 %v11312_v11  ;;  %v11375_v41 = vld [vmem:[#allocation9 + $0x9ec] ss:$48 sps:$4 sm:$0xff]   ;;  %v11373_v43 = vld [vmem:[#allocation9 + $0x9e8] ss:$48 sps:$4 sm:$0xff]  }
 0x4c9   :  { %v11378_v42 = vld [vmem:[#allocation9 + $0xfec] ss:$48 sps:$4 sm:$0xff]   ;;  %v11376_v45 = vld [vmem:[#allocation9 + $0xfe8] ss:$48 sps:$4 sm:$0xff]  }
 0x4ca   :  { %7740 = vmatpush1.bf16.msra.mxu1 %v11307_v38  ;;  %v11381_v20 = vld [vmem:[#allocation9 + $0x98c] ss:$48 sps:$4 sm:$0xff]   ;;  %v11379_v46 = vld [vmem:[#allocation9 + $0x988] ss:$48 sps:$4 sm:$0xff]  }
 0x4cb   :  { %7781 = vmatpush1.bf16.msra.mxu0 %v11310_v19  ;;  %7741 = vmatprep.subr.bf16.mxu1 %v11315_v51  ;;  %v11384_v11 = vld [vmem:[#allocation9 + $0xf8c] ss:$48 sps:$4 sm:$0xff]   ;;  %v11382_v48 = vld [vmem:[#allocation9 + $0xf88] ss:$48 sps:$4 sm:$0xff]  }
 0x4cc   :  { %7782 = vmatprep.subr.bf16.mxu0 %v11318_v50  ;;  %v11387_v38 = vld [vmem:[#allocation9 + $0x92c] ss:$48 sps:$4 sm:$0xff]   ;;  %v11385_v19 = vld [vmem:[#allocation9 + $0x928] ss:$48 sps:$4 sm:$0xff]  }
 0x4cd   :  { %v11390_v49 = vld [vmem:[#allocation9 + $0xf2c] ss:$48 sps:$4 sm:$0xff]   ;;  %v11388_v51 = vld [vmem:[#allocation9 + $0xf28] ss:$48 sps:$4 sm:$0xff]  }
 0x4ce   :  { %7742 = vmatpush1.bf16.msra.mxu1 %v11313_v22  ;;  %v11393_v54 = vld [vmem:[#allocation9 + $0x14cc] ss:$48 sps:$4 sm:$0xff]   ;;  %v7859_v22 = vmax.f32 %v11828_v34, 0.0  ;;  %v11396_v34 = vld [vmem:[#allocation9 + $0x1468] ss:$48 sps:$4 sm:$0xff]  }
 0x4cf   :  { %7783 = vmatpush1.bf16.msra.mxu0 %v11316_v55  ;;  %7743 = vmatprep.subr.bf16.mxu1 %v11321_v56  ;;  %v11394_v50 = vld [vmem:[#allocation10 + $0x78] sm:$0xff]  }
 0x4d0   :  { %7784 = vmatprep.subr.bf16.mxu0 %v11324_v62  ;;  %v11391_v55 = vld [vmem:[#allocation9 + $0x14c8] ss:$48 sps:$4 sm:$0xff]   ;;  %v11398_v62 = vld [vmem:[#allocation9 + $0x146c] ss:$48 sps:$4 sm:$0xff]  }
 0x4d1   :  { %v11395_v56 = vld [vmem:[#allocation10 + $0x38] sm:$0xff]  }
 0x4d2   :  { %7744 = vmatpush1.bf16.msra.mxu1 %v11319_v1 }
 0x4d3   :  { %7785 = vmatpush1.bf16.msra.mxu0 %v11322_v2  ;;  %7745 = vmatprep.subr.bf16.mxu1 %v11327_v26  ;;  %v11399_v2 = vld [vmem:[#allocation10 + $0x70] sm:$0xff]   ;;  %v7871_v26 = vpack.c.bf16 %v7859_v22, %v7859_v22  ;;  %v11446_v22 = vld [vmem:[#allocation9 + $0x16a8] ss:$48 sps:$4 sm:$0xff]  }
 0x4d4   :  { %7786 = vmatprep.subr.bf16.mxu0 %v11330_v14 }
 0x4d6   :  { %7746 = vmatpush1.bf16.msra.mxu1 %v11325_v3 }
 0x4d7   :  { %7787 = vmatpush1.bf16.msra.mxu0 %v11328_v5  ;;  %7747 = vmatprep.subr.bf16.mxu1 %v11333_v6  ;;  %v11400_v6 = vld [vmem:[#allocation10 + $0x30] sm:$0xff]  }
 0x4d8   :  { %7788 = vmatprep.subr.bf16.mxu0 %v11336_v7  ;;  %v11403_v7 = vld [vmem:[#allocation9 + $0x140c] ss:$48 sps:$4 sm:$0xff]  }
 0x4da   :  { %7748 = vmatpush1.bf16.msra.mxu1 %v11331_v8 }
 0x4db   :  { %7789 = vmatpush1.bf16.msra.mxu0 %v11334_v9  ;;  %7749 = vmatprep.subr.bf16.mxu1 %v11339_v30 }
 0x4dc   :  { %7790 = vmatprep.subr.bf16.mxu0 %v11342_v12 }
 0x4de   :  { %7750 = vmatpush1.bf16.msra.mxu1 %v11337_v16  ;;  %v11408_v16 = vld [vmem:[#allocation9 + $0x13ac] ss:$48 sps:$4 sm:$0xff]  }
 0x4df   :  { %7791 = vmatpush1.bf16.msra.mxu0 %v11340_v17  ;;  %7751 = vmatprep.subr.bf16.mxu1 %v11345_v47  ;;  %v11409_v47 = vld [vmem:[#allocation10 + $0x60] sm:$0xff]  }
 0x4e0   :  { %7792 = vmatprep.subr.bf16.mxu0 %v11348_v61  ;;  %v11410_v61 = vld [vmem:[#allocation10 + $0x20] sm:$0xff]  }
 0x4e2   :  { %7752 = vmatpush2.bf16.msra.mxu1 %v11343_v23  ;;  %v11413_v23 = vld [vmem:[#allocation9 + $0x134c] ss:$48 sps:$4 sm:$0xff]  }
 0x4e3   :  { %7793 = vmatpush2.bf16.msra.mxu0 %v11346_v63  ;;  %7753 = vmatprep.subr.bf16.mxu1 %v11351_v15  ;;  %v11414_v63 = vld [vmem:[#allocation10 + $0x58] sm:$0xff]  }
 0x4e4   :  { %7794 = vmatprep.subr.bf16.mxu0 %v11354_v25  ;;  %v11411_v15 = vld [vmem:[#allocation9 + $0x1348] ss:$48 sps:$4 sm:$0xff]  }
 0x4e5   :  { %v11415_v25 = vld [vmem:[#allocation10 + $0x18] sm:$0xff]  }
 0x4e6   :  { %7754 = vmatpush2.bf16.msra.mxu1 %v11349_v0  ;;  %v11418_v0 = vld [vmem:[#allocation9 + $0x12ec] ss:$48 sps:$4 sm:$0xff]  }
 0x4e7   :  { %7795 = vmatpush2.bf16.msra.mxu0 %v11352_v27  ;;  %7755 = vmatprep.subr.bf16.mxu1 %v11357_v29  ;;  %v11419_v27 = vld [vmem:[#allocation10 + $0x50] sm:$0xff]   ;;  %v11416_v29 = vld [vmem:[#allocation9 + $0x12e8] ss:$48 sps:$4 sm:$0xff]  }
 0x4e8   :  { %7796 = vmatprep.subr.bf16.mxu0 %v11360_v53  ;;  %v11420_v53 = vld [vmem:[#allocation10 + $0x10] sm:$0xff]  }
 0x4ea   :  { %7756 = vmatpush2.bf16.msra.mxu1 %v11355_v60  ;;  %v11423_v60 = vld [vmem:[#allocation9 + $0x128c] ss:$48 sps:$4 sm:$0xff]  }
 0x4eb   :  { %7797 = vmatpush2.bf16.msra.mxu0 %v11358_v31  ;;  %7757 = vmatprep.subr.bf16.mxu1 %v11363_v32  ;;  %v11424_v31 = vld [vmem:[#allocation10 + $0x48] sm:$0xff]  }
 0x4ec   :  { %7798 = vmatprep.subr.bf16.mxu0 %v11366_v33  ;;  %v11421_v32 = vld [vmem:[#allocation9 + $0x1288] ss:$48 sps:$4 sm:$0xff]  }
 0x4ed   :  { %v11425_v33 = vld [vmem:[#allocation10 + $0x8] sm:$0xff]  }
 0x4ee   :  { %7758 = vmatpush2.bf16.msra.mxu1 %v11361_v4  ;;  %v11428_v4 = vld [vmem:[#allocation9 + $0x122c] ss:$48 sps:$4 sm:$0xff]  }
 0x4ef   :  { %7799 = vmatpush2.bf16.msra.mxu0 %v11364_v57  ;;  %7759 = vmatprep.subr.bf16.mxu1 %v11369_v36  ;;  %v11429_v57 = vld [vmem:[#allocation10 + $0x40] sm:$0xff]   ;;  %v11426_v36 = vld [vmem:[#allocation9 + $0x1228] ss:$48 sps:$4 sm:$0xff]  }
 0x4f0   :  { %7800 = vmatprep.subr.bf16.mxu0 %v11372_v13  ;;  %v11430_v13 = vld [vmem:[#allocation10] sm:$0xff]  }
 0x4f2   :  { %7760 = vmatpush2.bf16.msra.mxu1 %v11367_v58  ;;  %v11433_v58 = vld [vmem:[#allocation9 + $0x17cc] ss:$48 sps:$4 sm:$0xff]  }
 0x4f3   :  { %7801 = vmatpush2.bf16.msra.mxu0 %v11370_v39  ;;  %7761 = vmatprep.subr.bf16.mxu1 %v11375_v41  ;;  %v7858_v39 = vmax.f32 %v11821_v28, 0.0  ;;  %v11434_v41 = vld [vmem:[#allocation10 + $0x178] sm:$0xff]   ;;  %v11440_v28 = vld [vmem:[#allocation10 + $0x130] sm:$0xff]  }
 0x4f4   :  { %7802 = vmatprep.subr.bf16.mxu0 %v11378_v42  ;;  %v7863_v42 = vmax.f32 %v11874_v21, 0.0  ;;  %v11444_v21 = vld [vmem:[#allocation10 + $0x168] sm:$0xff]  }
 0x4f6   :  { %7762 = vmatpush2.bf16.msra.mxu1 %v11373_v43  ;;  %v11431_v43 = vld [vmem:[#allocation9 + $0x17c8] ss:$48 sps:$4 sm:$0xff]  }
 0x4f7   :  { %7803 = vmatpush2.bf16.msra.mxu0 %v11376_v45  ;;  %7763 = vmatprep.subr.bf16.mxu1 %v11381_v20  ;;  %v11435_v45 = vld [vmem:[#allocation10 + $0x138] sm:$0xff]   ;;  %v7870_v20 = vpack.c.bf16 %v7858_v39, %v7858_v39 }
 0x4f8   :  { %7804 = vmatprep.subr.bf16.mxu0 %v11384_v11  ;;  %v11438_v11 = vld [vmem:[#allocation9 + $0x176c] ss:$48 sps:$4 sm:$0xff]  }
 0x4fa   :  { %7764 = vmatpush2.bf16.msra.mxu1 %v11379_v46  ;;  %v11439_v46 = vld [vmem:[#allocation10 + $0x170] sm:$0xff]  }
 0x4fb   :  { %7805 = vmatpush2.bf16.msra.mxu0 %v11382_v48  ;;  %7765 = vmatprep.subr.bf16.mxu1 %v11387_v38  ;;  %v7875_v48 = vpack.c.bf16 %v7863_v42, %v7863_v42  ;;  %v11436_v38 = vld [vmem:[#allocation9 + $0x1768] ss:$48 sps:$4 sm:$0xff]   ;;  %v11505_v42 = vld [vmem:[#allocation10 + $0x260] sm:$0xff]  }
 0x4fc   :  { %7806 = vmatprep.subr.bf16.mxu0 %v11390_v49  ;;  %v11443_v49 = vld [vmem:[#allocation9 + $0x170c] ss:$48 sps:$4 sm:$0xff]  }
 0x4fe   :  { %7766 = vmatpush2.bf16.msra.mxu1 %v11385_v19  ;;  %v11441_v19 = vld [vmem:[#allocation9 + $0x1708] ss:$48 sps:$4 sm:$0xff]  }
 0x4ff   :  { %7807 = vmatpush2.bf16.msra.mxu0 %v11388_v51  ;;  %7817 = vmatprep.subr.bf16.mxu1 %v11393_v54  ;;  %v11445_v51 = vld [vmem:[#allocation10 + $0x128] sm:$0xff]  }
 0x500   :  { %10092 = vmatprep.subr.bf16.mxu0 %v11394_v50  ;;  %v11448_v54 = vld [vmem:[#allocation9 + $0x16ac] ss:$48 sps:$4 sm:$0xff]   ;;  %v11449_v50 = vld [vmem:[#allocation10 + $0x160] sm:$0xff]  }
 0x501   :  { %v7523_v1 = vpop.f32.mrf.mxu1  ;;  %7768 = vmatmul.mubr.bf16.vlgmr.msra.gmra.mxu1 %v11778_v40 }
 0x502   :  { %v11891_v14 = vadd.f32 %v7523_v1, %v11882_v44  ;;  %v11893_v3 = vpop.f32.mrf.mxu0  ;;  %7809 = vmatmul.mubr.bf16.vlgmr.msra.gmra.mxu0 %v11784_v52  ;;  %7818 = vmatpush1.bf16.msra.mxu1 %v11391_v55  ;;  %v11404_v44 = vld [vmem:[#allocation10 + $0x68] sm:$0xff]   ;;  %v11450_v55 = vld [vmem:[#allocation10 + $0x120] sm:$0xff]  }
 0x503   :  { %7849 = vmatprep.mubr.bf16.mxu1 %v11789_v35  ;;  %10093 = vmatpush3.bf16.msra.mxu0 %v11395_v56  ;;  %v7525_v5 = vpop.f32.mrf.mxu1  ;;  %v11401_v52 = vld [vmem:[#allocation9 + $0x1408] ss:$48 sps:$4 sm:$0xff]   ;;  %v11453_v56 = vld [vmem:[#allocation9 + $0x164c] ss:$48 sps:$4 sm:$0xff]  }
 0x504   :  { %8682 = vmatprep.mubr.bf16.mxu0 %v7871_v26  ;;  %v11898_v40 = vadd.f32 %v7525_v5, %v11886_v59  ;;  %v11900_v8 = vpop.f32.mrf.mxu0  ;;  %7819 = vmatprep.subr.bf16.mxu1 %v11398_v62  ;;  %v11405_v35 = vld [vmem:[#allocation10 + $0x28] sm:$0xff]   ;;  %v11454_v62 = vld [vmem:[#allocation10 + $0x158] sm:$0xff]  }
 0x505   :  { %v7527_v9 = vpop.f32.mrf.mxu1  ;;  %10094 = vmatprep.subr.bf16.mxu0 %v11399_v2  ;;  %v11406_v59 = vld [vmem:[#allocation9 + $0x13a8] ss:$48 sps:$4 sm:$0xff]   ;;  %v11458_v26 = vld [vmem:[#allocation9 + $0x15ec] ss:$48 sps:$4 sm:$0xff]  }
 0x506   :  { %v7568_v30 = vpop.f32.mrf.mxu0  ;;  %7820 = vmatpush1.bf16.msra.mxu1 %v11396_v34  ;;  %v11451_v1 = vld [vmem:[#allocation9 + $0x1648] ss:$48 sps:$4 sm:$0xff]   ;;  %v11459_v34 = vld [vmem:[#allocation10 + $0x150] sm:$0xff]  }
 0x507   :  { %10095 = vmatpush3.bf16.msra.mxu0 %v11400_v6  ;;  %v7528_v12 = vpop.f32.mrf.mxu1  ;;  %7821 = vmatprep.subr.bf16.mxu1 %v11403_v7  ;;  %v11455_v2 = vld [vmem:[#allocation10 + $0x118] sm:$0xff]   ;;  %v11460_v6 = vld [vmem:[#allocation10 + $0x110] sm:$0xff]   ;;  %v11465_v30 = vld [vmem:[#allocation10 + $0x108] sm:$0xff]  }
 0x508   :  { %v7569_v17 = vpop.f32.mrf.mxu0  ;;  %10096 = vmatprep.subr.bf16.mxu0 %v11404_v44  ;;  %v11456_v5 = vld [vmem:[#allocation9 + $0x15e8] ss:$48 sps:$4 sm:$0xff]   ;;  %v11463_v7 = vld [vmem:[#allocation9 + $0x158c] ss:$48 sps:$4 sm:$0xff]   ;;  %v11469_v12 = vld [vmem:[#allocation10 + $0x140] sm:$0xff]  }
 0x509   :  { %v11464_v44 = vld [vmem:[#allocation10 + $0x148] sm:$0xff]   ;;  %v11471_v17 = vld [vmem:[#allocation10 + $0xf8] sm:$0xff]  }
 0x50a   :  { %7822 = vmatpush1.bf16.msra.mxu1 %v11401_v52  ;;  %v11461_v9 = vld [vmem:[#allocation9 + $0x1588] ss:$48 sps:$4 sm:$0xff]   ;;  %v11468_v52 = vld [vmem:[#allocation9 + $0x152c] ss:$48 sps:$4 sm:$0xff]  }
 0x50b   :  { %10097 = vmatpush3.bf16.msra.mxu0 %v11405_v35  ;;  %7823 = vmatprep.subr.bf16.mxu1 %v11408_v16  ;;  %v11466_v35 = vld [vmem:[#allocation9 + $0x1528] ss:$48 sps:$4 sm:$0xff]   ;;  %v11470_v16 = vld [vmem:[#allocation10 + $0x100] sm:$0xff]  }
 0x50c   :  { %10098 = vmatprep.subr.bf16.mxu0 %v11409_v47  ;;  %v7862_v47 = vmax.f32 %v11866_v10, 0.0 }
 0x50e   :  { %7824 = vmatpush1.bf16.msra.mxu1 %v11406_v59  ;;  %v11493_v59 = vld [vmem:[#allocation10 + $0x278] sm:$0xff]  }
 0x50f   :  { %10099 = vmatpush3.bf16.msra.mxu0 %v11410_v61  ;;  %7825 = vmatprep.subr.bf16.mxu1 %v11413_v23  ;;  %v7861_v61 = vmax.f32 %v11850_v24, 0.0  ;;  %v11472_v23 = vld [vmem:[#allocation10 + $0xb8] sm:$0xff]  }
 0x510   :  { %10100 = vmatprep.subr.bf16.mxu0 %v11414_v63  ;;  %v11473_v63 = vld [vmem:[#allocation10 + $0xf0] sm:$0xff]  }
 0x512   :  { %7826 = vmatpush1.bf16.msra.mxu1 %v11411_v15  ;;  %v7874_v15 = vpack.c.bf16 %v7862_v47, %v7862_v47  ;;  %v11508_v47 = vld [vmem:[#allocation10 + $0x188] sm:$0xff]  }
 0x513   :  { %10101 = vmatpush3.bf16.msra.mxu0 %v11415_v25  ;;  %7827 = vmatprep.subr.bf16.mxu1 %v11418_v0  ;;  %v11494_v25 = vld [vmem:[#allocation10 + $0x238] sm:$0xff]   ;;  %v7873_v0 = vpack.c.bf16 %v7861_v61, %v7861_v61  ;;  %v11512_v61 = vld [vmem:[#allocation10 + $0x180] sm:$0xff]  }
 0x514   :  { %10102 = vmatprep.subr.bf16.mxu0 %v11419_v27 }
 0x516   :  { %7828 = vmatpush1.bf16.msra.mxu1 %v11416_v29  ;;  %v11497_v29 = vld [vmem:[#allocation10 + $0x270] sm:$0xff]  }
 0x517   :  { %10103 = vmatpush3.bf16.msra.mxu0 %v11420_v53  ;;  %7829 = vmatprep.subr.bf16.mxu1 %v11423_v60  ;;  %v11474_v60 = vld [vmem:[#allocation10 + $0xb0] sm:$0xff]  }
 0x518   :  { %10104 = vmatprep.subr.bf16.mxu0 %v11424_v31  ;;  %v11475_v31 = vld [vmem:[#allocation10 + $0xe8] sm:$0xff]  }
 0x51a   :  { %7830 = vmatpush1.bf16.msra.mxu1 %v11421_v32 }
 0x51b   :  { %10105 = vmatpush3.bf16.msra.mxu0 %v11425_v33  ;;  %7831 = vmatprep.subr.bf16.mxu1 %v11428_v4  ;;  %v11498_v4 = vld [vmem:[#allocation10 + $0x230] sm:$0xff]  }
 0x51c   :  { %10106 = vmatprep.subr.bf16.mxu0 %v11429_v57 }
 0x51e   :  { %7832 = vmatpush1.bf16.msra.mxu1 %v11426_v36 }
 0x51f   :  { %10107 = vmatpush3.bf16.msra.mxu0 %v11430_v13  ;;  %7833 = vmatprep.subr.bf16.mxu1 %v11433_v58  ;;  %v11477_v58 = vld [vmem:[#allocation10 + $0xe0] sm:$0xff]  }
 0x520   :  { %10136 = vmatprep.subr.bf16.mxu0 %v11434_v41  ;;  %v11502_v41 = vld [vmem:[#allocation10 + $0x228] sm:$0xff]  }
 0x522   :  { %8683 = vmatmul.mubr.bf16.vlgmr.msra.gmra.mxu0 %v7870_v20  ;;  %7834 = vmatpush2.bf16.msra.mxu1 %v11431_v43  ;;  %v11478_v43 = vld [vmem:[#allocation10 + $0xa0] sm:$0xff]  }
 0x523   :  { %10137 = vmatpush3.bf16.msra.mxu0 %v11435_v45  ;;  %8762 = vmatprep.mubr.bf16.mxu0 %v7875_v48  ;;  %v11479_v45 = vld [vmem:[#allocation10 + $0xd8] sm:$0xff]   ;;  %v11506_v20 = vld [vmem:[#allocation10 + $0x220] sm:$0xff]   ;;  %v11481_v48 = vld [vmem:[#allocation10 + $0xd0] sm:$0xff]  }
 0x524   :  { %7835 = vmatprep.subr.bf16.mxu1 %v11438_v11  ;;  %10138 = vmatprep.subr.bf16.mxu0 %v11439_v46  ;;  %v11509_v11 = vld [vmem:[#allocation10 + $0x258] sm:$0xff]  }
 0x525   :  { %v11480_v46 = vld [vmem:[#allocation10 + $0x98] sm:$0xff]  }
 0x526   :  { %7836 = vmatpush2.bf16.msra.mxu1 %v11436_v38  ;;  %v11510_v38 = vld [vmem:[#allocation10 + $0x218] sm:$0xff]  }
 0x527   :  { %10139 = vmatpush3.bf16.msra.mxu0 %v11440_v28  ;;  %7837 = vmatprep.subr.bf16.mxu1 %v11443_v49  ;;  %v11513_v28 = vld [vmem:[#allocation10 + $0x250] sm:$0xff]  }
 0x528   :  { %10140 = vmatprep.subr.bf16.mxu0 %v11444_v21  ;;  %v11482_v49 = vld [vmem:[#allocation10 + $0x90] sm:$0xff]   ;;  %v11483_v21 = vld [vmem:[#allocation10 + $0xc8] sm:$0xff]  }
 0x52a   :  { %7838 = vmatpush2.bf16.msra.mxu1 %v11441_v19  ;;  %v11514_v19 = vld [vmem:[#allocation10 + $0x210] sm:$0xff]  }
 0x52b   :  { %10141 = vmatpush3.bf16.msra.mxu0 %v11445_v51  ;;  %7839 = vmatprep.subr.bf16.mxu1 %v11448_v54  ;;  %v11515_v51 = vld [vmem:[#allocation10 + $0x248] sm:$0xff]  }
 0x52c   :  { %10142 = vmatprep.subr.bf16.mxu0 %v11449_v50  ;;  %v11484_v54 = vld [vmem:[#allocation10 + $0x88] sm:$0xff]   ;;  %v11485_v50 = vld [vmem:[#allocation10 + $0xc0] sm:$0xff]  }
 0x52e   :  { %7840 = vmatpush2.bf16.msra.mxu1 %v11446_v22  ;;  %v11516_v22 = vld [vmem:[#allocation10 + $0x208] sm:$0xff]  }
 0x52f   :  { %10143 = vmatpush3.bf16.msra.mxu0 %v11450_v55  ;;  %7841 = vmatprep.subr.bf16.mxu1 %v11453_v56  ;;  %v11517_v55 = vld [vmem:[#allocation10 + $0x240] sm:$0xff]  }
 0x530   :  { %10144 = vmatprep.subr.bf16.mxu0 %v11454_v62  ;;  %v11486_v56 = vld [vmem:[#allocation10 + $0x80] sm:$0xff]   ;;  %v7860_v62 = vmax.f32 %v11842_v18, 0.0  ;;  %v11491_v18 = vld [vmem:[#allocation10 + $0x1e8] sm:$0xff]  }
 0x532   :  { %7842 = vmatpush2.bf16.msra.mxu1 %v11451_v1  ;;  %v11487_v1 = vld [vmem:[#allocation10 + $0x1f8] sm:$0xff]  }
 0x533   :  { %10145 = vmatpush3.bf16.msra.mxu0 %v11455_v2  ;;  %7843 = vmatprep.subr.bf16.mxu1 %v11458_v26  ;;  %v7865_v2 = vmax.f32 %v11898_v40, 0.0  ;;  %v11518_v26 = vld [vmem:[#allocation10 + $0x200] sm:$0xff]  }
 0x534   :  { %10146 = vmatprep.subr.bf16.mxu0 %v11459_v34  ;;  %v11488_v34 = vld [vmem:[#allocation10 + $0x1b8] sm:$0xff]   ;;  %v11495_v40 = vld [vmem:[#allocation10 + $0x1e0] sm:$0xff]  }
 0x536   :  { %7844 = vmatpush2.bf16.msra.mxu1 %v11456_v5  ;;  %v7872_v5 = vpack.c.bf16 %v7860_v62, %v7860_v62 }
 0x537   :  { %10147 = vmatpush3.bf16.msra.mxu0 %v11460_v6  ;;  %7845 = vmatprep.subr.bf16.mxu1 %v11463_v7  ;;  %v11489_v6 = vld [vmem:[#allocation10 + $0x1f0] sm:$0xff]   ;;  %v7877_v7 = vpack.c.bf16 %v7865_v2, %v7865_v2 }
 0x538   :  { %10148 = vmatprep.subr.bf16.mxu0 %v11464_v44  ;;  %v11490_v44 = vld [vmem:[#allocation10 + $0x1b0] sm:$0xff]  }
 0x53a   :  { %7846 = vmatpush2.bf16.msra.mxu1 %v11461_v9  ;;  %v11492_v9 = vld [vmem:[#allocation10 + $0x1a8] sm:$0xff]  }
 0x53b   :  { %10149 = vmatpush3.bf16.msra.mxu0 %v11465_v30  ;;  %7847 = vmatprep.subr.bf16.mxu1 %v11468_v52  ;;  %v11496_v30 = vld [vmem:[#allocation10 + $0x1a0] sm:$0xff]   ;;  %v11499_v52 = vld [vmem:[#allocation10 + $0x1d8] sm:$0xff]  }
 0x53c   :  { %10150 = vmatprep.subr.bf16.mxu0 %v11469_v12  ;;  %v11500_v12 = vld [vmem:[#allocation10 + $0x198] sm:$0xff]  }
 0x53e   :  { %7848 = vmatpush2.bf16.msra.mxu1 %v11466_v35  ;;  %v11503_v35 = vld [vmem:[#allocation10 + $0x1d0] sm:$0xff]  }
 0x53f   :  { %10151 = vmatpush3.bf16.msra.mxu0 %v11470_v16  ;;  %10114 = vmatprep.subr.bf16.mxu1 %v11471_v17  ;;  %v11504_v16 = vld [vmem:[#allocation10 + $0x190] sm:$0xff]   ;;  %v11507_v17 = vld [vmem:[#allocation10 + $0x1c8] sm:$0xff]  }
 0x540   :  { %10180 = vmatprep.subr.bf16.mxu0 %v11493_v59  ;;  %v11511_v59 = vld [vmem:[#allocation10 + $0x1c0] sm:$0xff]  }
 0x541   :  { %v7605_v27 = vpop.f32.mrf.mxu1  ;;  %7850 = vmatmul.mubr.bf16.vlgmr.msra.gmra.mxu1 %v11791_v37  ;;  %v11501_v37 = vld [vmem:[#allocation10 + $0x268] sm:$0xff]  }
 0x542   :  { %v7606_v53 = vadd.f32 %v7605_v27, %v11893_v3  ;;  %v7646_v10 = vpop.f32.mrf.mxu0  ;;  %8763 = vmatmul.mubr.bf16.vlgmr.msra.gmra.mxu0 %v7874_v15  ;;  %10115 = vmatpush3.bf16.msra.mxu1 %v11472_v23  ;;  %v11476_v3 = vld [vmem:[#allocation10 + $0xa8] sm:$0xff]   ;;  %v7864_v23 = vmax.f32 %v11891_v14, 0.0  ;;  %v11521_v27 = vld [vmem:[#allocation10 + $0x2f0] sm:$0xff]  }
 0x543   :  { %8722 = vmatprep.mubr.bf16.mxu1 %v7873_v0  ;;  %v11908_v24 = vpop.f32.mrf.mxu1  ;;  %10116 = vmatprep.subr.bf16.mxu1 %v11473_v63  ;;  %v11519_v63 = vld [vmem:[#allocation10 + $0x2f8] sm:$0xff]  }
 0x544   :  { %v11910_v32 = vadd.f32 %v7646_v10, %v7606_v53  ;;  %v11912_v33 = vpop.f32.mrf.mxu0  ;;  %10181 = vmatpush3.bf16.msra.mxu0 %v11494_v25  ;;  %v7608_v15 = vadd.f32 %v11908_v24, %v11900_v8  ;;  %v11520_v25 = vld [vmem:[#allocation10 + $0x2b8] sm:$0xff]   ;;  %v7876_v0 = vpack.c.bf16 %v7864_v23, %v7864_v23 }
 0x545   :  { %v7609_v57 = vpop.f32.mrf.mxu1  ;;  %10182 = vmatprep.subr.bf16.mxu0 %v11497_v29 }
 0x546   :  { %v7650_v36 = vpop.f32.mrf.mxu0  ;;  %10117 = vmatpush3.bf16.msra.mxu1 %v11474_v60  ;;  %v7649_v53 = vadd.f32 %v11912_v33, %v7608_v15 }
 0x547   :  { %v7610_v13 = vpop.f32.mrf.mxu1  ;;  %10118 = vmatprep.subr.bf16.mxu1 %v11475_v31  ;;  %v11522_v31 = vld [vmem:[#allocation10 + $0x2b0] sm:$0xff]  }
 0x548   :  { %v7651_v39 = vpop.f32.mrf.mxu0  ;;  %10183 = vmatpush3.bf16.msra.mxu0 %v11498_v4  ;;  %v11523_v4 = vld [vmem:[#allocation10 + $0x2e8] sm:$0xff]  }
 0x549   :  { %10184 = vmatprep.subr.bf16.mxu0 %v11501_v37  ;;  %v11524_v13 = vld [vmem:[#allocation10 + $0x2a8] sm:$0xff]   ;;  %v11525_v39 = vld [vmem:[#allocation10 + $0x2e0] sm:$0xff]  }
 0x54a   :  { %10119 = vmatpush3.bf16.msra.mxu1 %v11476_v3 }
 0x54b   :  { %10120 = vmatprep.subr.bf16.mxu1 %v11477_v58 }
 0x54c   :  { %10185 = vmatpush3.bf16.msra.mxu0 %v11502_v41 }
 0x54d   :  { %10186 = vmatprep.subr.bf16.mxu0 %v11505_v42  ;;  %v11526_v42 = vld [vmem:[#allocation10 + $0x2a0] sm:$0xff]  }
 0x54e   :  { %10121 = vmatpush3.bf16.msra.mxu1 %v11478_v43  ;;  %v11527_v43 = vld [vmem:[#allocation10 + $0x2d8] sm:$0xff]  }
 0x54f   :  { %10122 = vmatprep.subr.bf16.mxu1 %v11479_v45  ;;  %v11528_v45 = vld [vmem:[#allocation10 + $0x298] sm:$0xff]  }
 0x550   :  { %10187 = vmatpush3.bf16.msra.mxu0 %v11506_v20  ;;  %v11529_v20 = vld [vmem:[#allocation10 + $0x2d0] sm:$0xff]  }
 0x551   :  { %10188 = vmatprep.subr.bf16.mxu0 %v11509_v11  ;;  %v11530_v11 = vld [vmem:[#allocation10 + $0x290] sm:$0xff]  }
 0x552   :  { %10123 = vmatpush3.bf16.msra.mxu1 %v11480_v46  ;;  %v11531_v46 = vld [vmem:[#allocation10 + $0x2c8] sm:$0xff]  }
 0x553   :  { %10124 = vmatprep.subr.bf16.mxu1 %v11481_v48  ;;  %v11532_v48 = vld [vmem:[#allocation10 + $0x288] sm:$0xff]  }
 0x554   :  { %10189 = vmatpush3.bf16.msra.mxu0 %v11510_v38  ;;  %v11533_v38 = vld [vmem:[#allocation10 + $0x2c0] sm:$0xff]  }
 0x555   :  { %10190 = vmatprep.subr.bf16.mxu0 %v11513_v28  ;;  %v11534_v28 = vld [vmem:[#allocation10 + $0x280] sm:$0xff]  }
 0x556   :  { %10125 = vmatpush3.bf16.msra.mxu1 %v11482_v49 }
 0x557   :  { %10126 = vmatprep.subr.bf16.mxu1 %v11483_v21 }
 0x558   :  { %10191 = vmatpush3.bf16.msra.mxu0 %v11514_v19 }
 0x559   :  { %10192 = vmatprep.subr.bf16.mxu0 %v11515_v51 }
 0x55a   :  { %10127 = vmatpush3.bf16.msra.mxu1 %v11484_v54 }
 0x55b   :  { %10128 = vmatprep.subr.bf16.mxu1 %v11485_v50 }
 0x55c   :  { %10193 = vmatpush3.bf16.msra.mxu0 %v11516_v22 }
 0x55d   :  { %10194 = vmatprep.subr.bf16.mxu0 %v11517_v55 }
 0x55e   :  { %10129 = vmatpush3.bf16.msra.mxu1 %v11486_v56 }
 0x55f   :  { %10158 = vmatprep.subr.bf16.mxu1 %v11487_v1 }
 0x560   :  { %10195 = vmatpush3.bf16.msra.mxu0 %v11518_v26 }
 0x561   :  { %8723 = vmatmul.mubr.bf16.vlgmr.msra.gmra.mxu1 %v7872_v5 }
 0x562   :  { %10159 = vmatpush3.bf16.msra.mxu1 %v11488_v34  ;;  %8802 = vmatprep.mubr.bf16.mxu1 %v7877_v7 }
 0x563   :  { %10160 = vmatprep.subr.bf16.mxu1 %v11489_v6 }
 0x566   :  { %10161 = vmatpush3.bf16.msra.mxu1 %v11490_v44 }
 0x567   :  { %10162 = vmatprep.subr.bf16.mxu1 %v11491_v18 }
 0x56a   :  { %10163 = vmatpush3.bf16.msra.mxu1 %v11492_v9 }
 0x56b   :  { %10164 = vmatprep.subr.bf16.mxu1 %v11495_v40 }
 0x56e   :  { %10165 = vmatpush3.bf16.msra.mxu1 %v11496_v30 }
 0x56f   :  { %10166 = vmatprep.subr.bf16.mxu1 %v11499_v52 }
 0x572   :  { %10167 = vmatpush3.bf16.msra.mxu1 %v11500_v12 }
 0x573   :  { %10168 = vmatprep.subr.bf16.mxu1 %v11503_v35 }
 0x576   :  { %10169 = vmatpush3.bf16.msra.mxu1 %v11504_v16 }
 0x577   :  { %10170 = vmatprep.subr.bf16.mxu1 %v11507_v17 }
 0x57a   :  { %10171 = vmatpush3.bf16.msra.mxu1 %v11508_v47 }
 0x57b   :  { %10172 = vmatprep.subr.bf16.mxu1 %v11511_v59 }
 0x57e   :  { %10173 = vmatpush3.bf16.msra.mxu1 %v11512_v61 }
 0x57f   :  { %10202 = vmatprep.subr.bf16.mxu1 %v11519_v63 }
 0x581   :  { %v7687_v29 = vpop.f32.mrf.mxu1  ;;  %8803 = vmatmul.mubr.bf16.vlgmr.msra.gmra.mxu1 %v7876_v0 }
 0x582   :  { %v7688_v10 = vadd.f32 %v7687_v29, %v11910_v32  ;;  %v7728_v60 = vpop.f32.mrf.mxu0  ;;  %10203 = vmatpush3.bf16.msra.mxu1 %v11520_v25 }
 0x583   :  { %v7689_v14 = vpop.f32.mrf.mxu1  ;;  %10204 = vmatprep.subr.bf16.mxu1 %v11521_v27 }
 0x584   :  { %v7690_v57 = vadd.f32 %v7689_v14, %v7649_v53  ;;  %v7730_v37 = vpop.f32.mrf.mxu0  ;;  %v7866_v8 = vmax.f32 %v7688_v10, 0.0 }
 0x585   :  { %v7691_v24 = vpop.f32.mrf.mxu1 }
 0x586   :  { %v7867_v36 = vmax.f32 %v7690_v57, 0.0  ;;  %v7732_v3 = vpop.f32.mrf.mxu0  ;;  %10205 = vmatpush3.bf16.msra.mxu1 %v11522_v31  ;;  %v7878_v32 = vpack.c.bf16 %v7866_v8, %v7866_v8 }
 0x587   :  { %v7692_v58 = vpop.f32.mrf.mxu1  ;;  %10206 = vmatprep.subr.bf16.mxu1 %v11523_v4 }
 0x588   :  { %v7879_v33 = vpack.c.bf16 %v7867_v36, %v7867_v36  ;;  %v7733_v41 = vpop.f32.mrf.mxu0 }
 0x58a   :  { %8842 = vmatprep.mubr.bf16.mxu0 %v7879_v33  ;;  %10207 = vmatpush3.bf16.msra.mxu1 %v11524_v13 }
 0x58b   :  { %8843 = vmatmul.mubr.bf16.vlgmr.msra.gmra.mxu0 %v7878_v32  ;;  %10208 = vmatprep.subr.bf16.mxu1 %v11525_v39  ;;  %v8890_v39 = vlaneseq }
 0x58d   :  { %v8891_v32 = vand.u32 127, %v8890_v39 }
 0x58e   :  { %10209 = vmatpush3.bf16.msra.mxu1 %v11526_v42 }
 0x58f   :  { %10210 = vmatprep.subr.bf16.mxu1 %v11527_v43  ;;  %vm8892_vm0 = vcmp.lt.s32.totalorder %v8891_v32, 100 }
 0x592   :  { %10211 = vmatpush3.bf16.msra.mxu1 %v11528_v45 }
 0x593   :  { %10212 = vmatprep.subr.bf16.mxu1 %v11529_v20 }
 0x596   :  { %10213 = vmatpush3.bf16.msra.mxu1 %v11530_v11 }
 0x597   :  { %10214 = vmatprep.subr.bf16.mxu1 %v11531_v46 }
 0x59a   :  { %10215 = vmatpush3.bf16.msra.mxu1 %v11532_v48 }
 0x59b   :  { %10216 = vmatprep.subr.bf16.mxu1 %v11533_v38 }
 0x59e   :  { %10217 = vmatpush3.bf16.msra.mxu1 %v11534_v28 }
 0x5c1   :  { %v7769_v49 = vpop.f32.mrf.mxu1 }
 0x5c2   :  { %v7770_v21 = vadd.f32 %v7769_v49, %v7728_v60  ;;  %v7810_v19 = vpop.f32.mrf.mxu0 }
 0x5c3   :  { %v7771_v51 = vpop.f32.mrf.mxu1 }
 0x5c4   :  { %v7811_v54 = vadd.f32 %v7810_v19, %v7770_v21  ;;  %v7812_v50 = vpop.f32.mrf.mxu0  ;;  %v7772_v6 = vadd.f32 %v7771_v51, %v7730_v37  ;;  %v10090_v51 = vld [vmem:[#allocation4] ss:$0 sm:$0xff] }
 0x5c5   :  { %v7773_v22 = vpop.f32.mrf.mxu1 }
 0x5c6   :  { %v7814_v55 = vpop.f32.mrf.mxu0  ;;  %v7813_v44 = vadd.f32 %v7812_v50, %v7772_v6  ;;  %v10091_v22 = vld [vmem:[#allocation4 + $0x1] ss:$0 sm:$0xff] }
 0x5c7   :  { %v7774_v56 = vpop.f32.mrf.mxu1 }
 0x5c8   :  { %v7815_v62 = vpop.f32.mrf.mxu0 }
 0x5e2   :  { %v10108_v1 = vpop.f32.mrf.mxu0 }
 0x5e4   :  { %v10109_v2 = vpop.f32.mrf.mxu0 }
 0x5e5   :  { %v10110_v26 = vadd.f32 %v10109_v2, %v10108_v1 }
 0x5e6   :  { %v10111_v34 = vpop.f32.mrf.mxu0 }
 0x5e8   :  { %v10112_v5 = vpop.f32.mrf.mxu0 }
 0x601   :  { %v7851_v7 = vpop.f32.mrf.mxu1 }
 0x602   :  { %v7852_v18 = vadd.f32 %v7851_v7, %v7811_v54  ;;  %v10152_v9 = vpop.f32.mrf.mxu0  ;;  %v11543_v54 = vld [vmem:[#allocation2] sm:$0xff] }
 0x603   :  { %v7853_v40 = vpop.f32.mrf.mxu1  ;;  %v8911_v50 = vmul.f32 %v11543_v54, %v10090_v51 }
 0x604   :  { %v7854_v30 = vadd.f32 %v7853_v40, %v7813_v44  ;;  %v10153_v52 = vpop.f32.mrf.mxu0  ;;  %v7868_v12 = vmax.f32 %v7852_v18, 0.0 }
 0x605   :  { %v10154_v35 = vadd.f32 %v10153_v52, %v10152_v9  ;;  %v7855_v16 = vpop.f32.mrf.mxu1  ;;  %v8917_v55 = vadd.f32 %v10091_v22, %v8911_v50 }
 0x606   :  { %v7869_v17 = vmax.f32 %v7854_v30, 0.0  ;;  %v10155_v47 = vpop.f32.mrf.mxu0  ;;  %v7880_v63 = vpack.c.bf16 %v7868_v12, %v7868_v12 }
 0x607   :  { %v7856_v59 = vpop.f32.mrf.mxu1 }
 0x608   :  { %v7881_v61 = vpack.c.bf16 %v7869_v17, %v7869_v17  ;;  %v10156_v23 = vpop.f32.mrf.mxu0 }
 0x60a   :  { %8882 = vmatprep.mubr.bf16.mxu1 %v7881_v61 }
 0x60b   :  { %8883 = vmatmul.mubr.bf16.vlgmr.msra.gmra.mxu1 %v7880_v63 }
 0x621   :  { %v10130_v15 = vpop.f32.mrf.mxu1 }
 0x623   :  { %v10131_v25 = vpop.f32.mrf.mxu1 }
 0x624   :  { %v10132_v0 = vadd.f32 %v10131_v25, %v10130_v15 }
 0x625   :  { %v10133_v27 = vpop.f32.mrf.mxu1 }
 0x626   :  { %v8725_v29 = vadd.f32 %v10132_v0, %v10110_v26 }
 0x627   :  { %v10134_v53 = vpop.f32.mrf.mxu1 }
 0x628   :  { %v8765_v10 = vadd.f32 %v10154_v35, %v8725_v29 }
 0x641   :  { %v10174_v60 = vpop.f32.mrf.mxu1 }
 0x643   :  { %v10175_v31 = vpop.f32.mrf.mxu1 }
 0x644   :  { %v10176_v14 = vadd.f32 %v10175_v31, %v10174_v60 }
 0x645   :  { %v10177_v4 = vpop.f32.mrf.mxu1 }
 0x646   :  { %v8805_v57 = vadd.f32 %v10176_v14, %v8765_v10 }
 0x647   :  { %v10178_v37 = vpop.f32.mrf.mxu1 }
 0x64b   :  { %v10196_v8 = vpop.f32.mrf.mxu0 }
 0x64d   :  { %v10197_v24 = vpop.f32.mrf.mxu0 }
 0x64e   :  { %v10198_v36 = vadd.f32 %v10197_v24, %v10196_v8 }
 0x64f   :  { %v10199_v3 = vpop.f32.mrf.mxu0 }
 0x650   :  { %v8845_v13 = vadd.f32 %v10198_v36, %v8805_v57 }
 0x651   :  { %v10200_v58 = vpop.f32.mrf.mxu0 }
 0x6cb   :  { %v10218_v33 = vpop.f32.mrf.mxu1 }
 0x6cd   :  { %v10219_v41 = vpop.f32.mrf.mxu1 }
 0x6ce   :  { %v10220_v42 = vadd.f32 %v10219_v41, %v10218_v33 }
 0x6cf   :  { %v10221_v43 = vpop.f32.mrf.mxu1 }
 0x6d0   :  { %v8885_v45 = vadd.f32 %v10220_v42, %v8845_v13 }
 0x6d1   :  { %v10222_v20 = vpop.f32.mrf.mxu1 }
 0x6d2   :  { %v8893_v11 = vmul.f32 5.0, %v8885_v45 }
 0x6d4   :  { %v8894_v46 = vsel %vm8892_vm0, %v8893_v11, -1e+30 }
 0x6d5   :  { %8895 = vmax.xlane.f32.xlu0 %v8894_v46 }
 0x75e   :  { %v8896_v48 = vpop.xlane.xlu0 %8895 }
 0x75f   :  { %v8897_v38 = vsub.f32 %v8894_v46, %v8896_v48 }
 0x761   :  { %v8898_v28 = vmul.f32 1.442695, %v8897_v38 }
 0x763   :  { %11535 = vpow2.f32 %v8898_v28 }
 0x770   :  { %v11536_v49 = vpop.eup %11535 }
 0x771   :  { %v8900_v21 = vsel %vm8892_vm0, %v11536_v49, 0.0 }
 0x772   :  { %8901 = vadd.xlane.f32.xlu0 %v8900_v21 }
 0x7fb   :  { %v8902_v19 = vpop.xlane.xlu0 %8901 }
 0x7fc   :  { %11537 = vrcp.f32 %v8902_v19 }
 0x809   :  { %v11538_v56 = vpop.eup %11537 }
 0x80a   :  { %v8905_v62 = vmul.f32 %v11538_v56, %v8900_v21 }
 0x80c   :  { %v8918_v1 = vmul.f32 %v8917_v55, %v8905_v62 }
 0x80e   :  { %8919 = vadd.xlane.f32.xlu1 %v8918_v1 }
 0x897   :  { %v8920_v2 = vpop.xlane.xlu1 %8919 }
 0x898   :  { %v8921_v26 = vsub.f32 0.0, %v8920_v2 }
 0x89a   :  { %v8922_v34 = vmul.f32 1.442695, %v8921_v26 }
 0x89c   :  { %11539 = vpow2.f32 %v8922_v34 }
 0x8a9   :  { %v11540_v5 = vpop.eup %11539 }
 0x8aa   :  { %v8924_v6 = vadd.f32 1.0, %v11540_v5 }
 0x8ac   :  { %11541 = vrcp.f32 %v8924_v6 }
 0x8b9   :  { %v11542_v7 = vpop.eup %11541 }
 0x8ba   :  { %v8927_v44 = vadd.f32 0.1, %v11542_v7 }
 0x8bc   :  { %8929 = vst.msk [vmem:[%s11930_s6] sm:$0xff] %vm8928_vm1, %v8927_v44 }
 0x8bd   :  { %8934 = vsyncpa [#allocation3], 1 }
 0x8be   :  { %8935 = vsyncpa [#allocation5], 1 }
 0x8bf   :  { %8936 = vsyncpa [#allocation8], 1 }
 0x8c0   :  { %8937 = vsyncpa [#allocation11], 1 }

</bundles_post_ra>
